<compile_context>
chip_gen: v7x
topology: tpu7x:2x2x1
jax: 0.10.0
libtpu: 0.0.40
codegen_flags: <defaults>
</compile_context>

<pallas_src>
import functools
import math

import jax
import jax.numpy as jnp
from jax import lax
from jax.experimental import pallas as pl
from jax.experimental.pallas import tpu as pltpu


# ----------------------------------------------------------------------------
# Kernels
# ----------------------------------------------------------------------------
def _ln_rows_kernel(x_ref, w_ref, o_ref, *, eps, inv_c):
    """Simple path: one (tile_n, C) strip, C on the lane axis (C % 128 == 0 or fallback)."""
    x = x_ref[...].astype(jnp.float32)
    sx = jnp.sum(x, axis=-1, keepdims=True)
    sxx = jnp.sum(x * x, axis=-1, keepdims=True)
    mu = sx * inv_c
    var = jnp.maximum(sxx * inv_c - mu * mu, 0.0)        # clamp: E[x^2]-mu^2 can go -eps
    inv_std = lax.rsqrt(var + eps)                       # EUP slot
    o_ref[...] = (x * inv_std * w_ref[...]).astype(o_ref.dtype)


def _ln_packed_kernel(x_ref, s_ref, stw_ref, o_ref, *, eps, inv_c):
    """Lane-dense path: each kernel row holds R logical rows (block width = R*C)."""
    f32 = jnp.float32
    hi = lax.Precision.HIGHEST
    x = x_ref[...].astype(f32)                           # (tile_g, R*C)
    s = s_ref[...]                                       # (R*C, R)  0/1 segment matrix
    stw = stw_ref[...]                                   # (R, R*C)  segment->lane bcast * weight
    # Segmented per-logical-row sums on the (otherwise idle) MXU.
    sx = jnp.dot(x, s, precision=hi, preferred_element_type=f32)        # (tile_g, R)
    sxx = jnp.dot(x * x, s, precision=hi, preferred_element_type=f32)   # (tile_g, R)
    mu = sx * inv_c
    var = jnp.maximum(sxx * inv_c - mu * mu, 0.0)
    inv_std = lax.rsqrt(var + eps)                                       # (tile_g, R)
    # Broadcast 1/std back to the packed lane layout, fused with the weight.
    scale = jnp.dot(inv_std, stw, precision=hi, preferred_element_type=f32)  # (tile_g, R*C)
    o_ref[...] = (x * scale).astype(o_ref.dtype)


# ----------------------------------------------------------------------------
# Tiling helpers
# ----------------------------------------------------------------------------
def _chip_config():
    """Returns (per-block byte budget, vmem_limit_bytes, min grid steps)."""
    cap = 128 << 20
    try:
        info = pltpu.get_tpu_info()
        cap = int(getattr(info, "vmem_capacity_bytes", cap))
    except Exception:
        pass
    if cap <= (64 << 20):                 # v7x-class TensorCore: 64 MiB VMEM, 2 TCs
        return 16 << 20, 48 << 20, 2
    return 48 << 20, 96 << 20, 1          # v5e / v6e: 128 MiB VMEM, 1 TC


def _pick_tile_rows(n_rows, width, itemsize, budget_bytes, *, min_steps=1):
    """Largest strip height fitting the VMEM budget; prefers exact divisors of n_rows."""
    # Per block row: 2x-buffered input + 2x-buffered output in the input dtype,
    # plus ~3 full-width f32 temporaries inside the kernel.
    per_row = max(1, width * (4 * itemsize + 12))
    rows = max(1, budget_bytes // per_row)
    g = 8 if itemsize >= 4 else (16 if itemsize == 2 else 32)
    if rows >= n_rows and min_steps <= 1:
        return n_rows                                   # single full block (always legal)
    rows = min(rows, max(g, n_rows // max(1, min_steps)))
    rows = max(g, (rows // g) * g)
    if rows >= n_rows:
        return n_rows
    # Prefer a divisor of n_rows close to the budgeted size (no partial last block).
    r = rows
    while r >= max(g, rows // 2):
        if n_rows % r == 0:
            return r
        r -= g
    return rows                                         # partial final block: Pallas clips it


# ----------------------------------------------------------------------------
# Wrapper: works on any (..., C) input; normalization is over the last dim.
# ----------------------------------------------------------------------------
def biasfree_layernorm_pallas(x, weight, *, eps=1e-5):
    orig_shape = x.shape
    c = int(orig_shape[-1])
    n = 1
    for s in orig_shape[:-1]:
        n *= int(s)
    weight = weight.reshape(-1)
    itemsize = jnp.dtype(x.dtype).itemsize
    budget, vmem_limit, min_steps = _chip_config()
    cparams = pltpu.CompilerParams(
        dimension_semantics=("parallel",),
        vmem_limit_bytes=vmem_limit,
    )

    # Lane-dense packing decision for C not a multiple of 128.
    r_pack = 128 // math.gcd(c, 128)                    # smallest R with (R*C) % 128 == 0
    lane_occ = c / float((-(-c // 128)) * 128)
    use_packed = (
        c % 128 != 0
        and lane_occ < 0.9
        and r_pack * c <= 4096
        and n % r_pack == 0
        and n // r_pack >= 1
    )

    if use_packed:
        R = r_pack
        width = R * c
        g_rows = n // R
        x2 = x.reshape(g_rows, width)                   # free row-major reshape
        # Segment-sum matrix S[j, r] = 1 if j // C == r, and its transpose fused
        # with the tiled weight: Stw[r, j] = S[j, r] * weight[j % C].
        seg = jnp.arange(width, dtype=jnp.int32) // c
        s_mat = (seg[:, None] == jnp.arange(R, dtype=jnp.int32)[None, :]).astype(jnp.float32)
        w_tiled = jnp.tile(weight.astype(jnp.float32), R)
        stw = s_mat.T * w_tiled[None, :]

        tile_g = _pick_tile_rows(g_rows, width, itemsize, budget, min_steps=min_steps)
        grid = (pl.cdiv(g_rows, tile_g),)
        out = pl.pallas_call(
            functools.partial(_ln_packed_kernel, eps=float(eps), inv_c=1.0 / c),
            out_shape=jax.ShapeDtypeStruct((g_rows, width), x.dtype),
            grid=grid,
            in_specs=[
                pl.BlockSpec((tile_g, width), lambda i: (i, 0)),   # packed row strip
                pl.BlockSpec((width, R), lambda i: (0, 0)),        # segment matrix (resident)
                pl.BlockSpec((R, width), lambda i: (0, 0)),        # broadcast*weight (resident)
            ],
            out_specs=pl.BlockSpec((tile_g, width), lambda i: (i, 0)),
            compiler_params=cparams,
        )(x2, s_mat, stw)
        return out.reshape(orig_shape)

    # Simple path (C already lane-dense, or packing not applicable).
    x2 = x.reshape(n, c)
    w2 = weight.reshape(1, c).astype(jnp.float32)
    tile_n = _pick_tile_rows(n, c, itemsize, budget, min_steps=min_steps)
    grid = (pl.cdiv(n, tile_n),)
    out = pl.pallas_call(
        functools.partial(_ln_rows_kernel, eps=float(eps), inv_c=1.0 / c),
        out_shape=jax.ShapeDtypeStruct((n, c), x.dtype),
        grid=grid,
        in_specs=[
            pl.BlockSpec((tile_n, c), lambda i: (i, 0)),           # row strip
            pl.BlockSpec((1, c), lambda i: (0, 0)),                # weight (resident)
        ],
        out_specs=pl.BlockSpec((tile_n, c), lambda i: (i, 0)),
        compiler_params=cparams,
    )(x2, w2)
    return out.reshape(orig_shape)


# ----------------------------------------------------------------------------
# Pure-JAX reference (matches PyTorch forward exactly).
# ----------------------------------------------------------------------------
def biasfree_layernorm_reference(x, weight, eps=1e-5):
    x32 = x.astype(jnp.float32)
    var = jnp.var(x32, axis=-1, keepdims=True)           # ddof=0 == unbiased=False
    return (x32 / jnp.sqrt(var + eps) * weight.reshape(-1).astype(jnp.float32)).astype(x.dtype)


if __name__ == "__main__":
    key = jax.random.PRNGKey(0)
    kx, kw, kx2, kw2 = jax.random.split(key, 4)

    # Restormer-style usage: (B, H*W, C) tokens, normalized over the channel dim C.
    B, HW, C = 2, 256, 48
    x = jax.random.normal(kx, (B, HW, C), jnp.float32)
    w_ones = jnp.ones((C,), jnp.float32)                  # module init: weight = ones
    w_rand = 1.0 + 0.1 * jax.random.normal(kw, (C,), jnp.float32)

    for w in (w_ones, w_rand):
        out = jax.block_until_ready(biasfree_layernorm_pallas(x, w))
        ref = jax.block_until_ready(biasfree_layernorm_reference(x, w))
        assert out.shape == x.shape and out.dtype == x.dtype
        assert jnp.allclose(out, ref, atol=1e-4, rtol=1e-4), "f32 / C=48 mismatch"

    # Lane-dense channel count + bf16 input exercises the simple (non-packed) path.
    C2 = 128
    xb = jax.random.normal(kx2, (2, 64, C2), jnp.float32).astype(jnp.bfloat16)
    wb = 1.0 + 0.1 * jax.random.normal(kw2, (C2,), jnp.float32)
    outb = jax.block_until_ready(biasfree_layernorm_pallas(xb, wb))
    refb = jax.block_until_ready(biasfree_layernorm_reference(xb, wb))
    assert outb.shape == xb.shape and outb.dtype == xb.dtype
    assert jnp.allclose(outb.astype(jnp.float32), refb.astype(jnp.float32),
                        atol=2e-2, rtol=2e-2), "bf16 / C=128 mismatch"

    print("KERNEL_OK")
</pallas_src>

<mosaic_0001>
module attributes {stable_mosaic.version = 11 : i64} {
  func.func @_ln_packed_kernel(%arg0: i32, %arg1: memref<64x384xf32, #tpu.memory_space<vmem>>, %arg2: memref<384x8xf32, #tpu.memory_space<vmem>>, %arg3: memref<8x384xf32, #tpu.memory_space<vmem>>, %arg4: memref<64x384xf32, #tpu.memory_space<vmem>>) attributes {dimension_semantics = [#tpu.dimension_semantics<parallel>], iteration_bounds = array<i64: 1>, scalar_prefetch = 0 : i64, scratch_operands = 0 : i64, tpu.core_type = #tpu.core_type<tc>, window_params = [{transform_indices = @transform_0, window_bounds = array<i64: 64, 384>}, {pipeline_mode = #tpu.pipeline_mode<synchronous>, transform_indices = @transform_1, window_bounds = array<i64: 384, 8>}, {pipeline_mode = #tpu.pipeline_mode<synchronous>, transform_indices = @transform_2, window_bounds = array<i64: 8, 384>}, {transform_indices = @transform_3, window_bounds = array<i64: 64, 384>}]} {
    %c0 = arith.constant 0 : index
    %c0_0 = arith.constant 0 : index
    %0 = vector.load %arg1[%c0, %c0_0] : memref<64x384xf32, #tpu.memory_space<vmem>>, vector<64x384xf32>
    %c0_1 = arith.constant 0 : index
    %c0_2 = arith.constant 0 : index
    %1 = vector.load %arg2[%c0_1, %c0_2] : memref<384x8xf32, #tpu.memory_space<vmem>>, vector<384x8xf32>
    %c0_3 = arith.constant 0 : index
    %c0_4 = arith.constant 0 : index
    %2 = vector.load %arg3[%c0_3, %c0_4] : memref<8x384xf32, #tpu.memory_space<vmem>>, vector<8x384xf32>
    %cst = arith.constant dense<0.000000e+00> : vector<64x8xf32>
    %3 = tpu.matmul %0, %1, %cst {dimension_numbers = #tpu.dot_dimension_numbers<[1], [0], [0], [1], [0, 0, 1, 1], [], []>, precision = #tpu.contract_precision<fp32>} : vector<64x384xf32>, vector<384x8xf32>, vector<64x8xf32> -> vector<64x8xf32>
    %4 = arith.mulf %0, %0 : vector<64x384xf32>
    %cst_5 = arith.constant dense<0.000000e+00> : vector<64x8xf32>
    %5 = tpu.matmul %4, %1, %cst_5 {dimension_numbers = #tpu.dot_dimension_numbers<[1], [0], [0], [1], [0, 0, 1, 1], [], []>, precision = #tpu.contract_precision<fp32>} : vector<64x384xf32>, vector<384x8xf32>, vector<64x8xf32> -> vector<64x8xf32>
    %cst_6 = arith.constant 0.020833334 : f32
    %6 = vector.broadcast %cst_6 : f32 to vector<64x8xf32>
    %7 = arith.mulf %3, %6 : vector<64x8xf32>
    %cst_7 = arith.constant 0.020833334 : f32
    %8 = vector.broadcast %cst_7 : f32 to vector<64x8xf32>
    %9 = arith.mulf %5, %8 : vector<64x8xf32>
    %10 = arith.mulf %7, %7 : vector<64x8xf32>
    %11 = arith.subf %9, %10 : vector<64x8xf32>
    %cst_8 = arith.constant 0.000000e+00 : f32
    %12 = vector.broadcast %cst_8 : f32 to vector<64x8xf32>
    %13 = arith.maximumf %11, %12 : vector<64x8xf32>
    %cst_9 = arith.constant 9.99999974E-6 : f32
    %14 = vector.broadcast %cst_9 : f32 to vector<64x8xf32>
    %15 = arith.addf %13, %14 : vector<64x8xf32>
    %16 = math.rsqrt %15 : vector<64x8xf32>
    %cst_10 = arith.constant dense<0.000000e+00> : vector<64x384xf32>
    %17 = tpu.matmul %16, %2, %cst_10 {dimension_numbers = #tpu.dot_dimension_numbers<[1], [0], [0], [1], [0, 0, 1, 1], [], []>, precision = #tpu.contract_precision<fp32>} : vector<64x8xf32>, vector<8x384xf32>, vector<64x384xf32> -> vector<64x384xf32>
    %18 = arith.mulf %0, %17 : vector<64x384xf32>
    %c0_11 = arith.constant 0 : index
    %c0_12 = arith.constant 0 : index
    %19 = vector.load %arg4[%c0_11, %c0_12] : memref<64x384xf32, #tpu.memory_space<vmem>>, vector<64x384xf32>
    tpu.vector_store %arg4[%c0_11, %c0_12], %18 {strides = array<i32>} : memref<64x384xf32, #tpu.memory_space<vmem>>, vector<64x384xf32>,
    return
  }
  func.func @transform_0(%arg0: i32) -> (i32, i32) {
    %c0_i32 = arith.constant 0 : i32
    %c0_i32_0 = arith.constant 0 : i32
    return %arg0, %c0_i32 : i32, i32
  }
  func.func @transform_1(%arg0: i32) -> (i32, i32) {
    %c0_i32 = arith.constant 0 : i32
    %c0_i32_0 = arith.constant 0 : i32
    %c0_i32_1 = arith.constant 0 : i32
    return %c0_i32, %c0_i32_0 : i32, i32
  }
  func.func @transform_2(%arg0: i32) -> (i32, i32) {
    %c0_i32 = arith.constant 0 : i32
    %c0_i32_0 = arith.constant 0 : i32
    %c0_i32_1 = arith.constant 0 : i32
    return %c0_i32, %c0_i32_0 : i32, i32
  }
  func.func @transform_3(%arg0: i32) -> (i32, i32) {
    %c0_i32 = arith.constant 0 : i32
    %c0_i32_0 = arith.constant 0 : i32
    return %arg0, %c0_i32 : i32, i32
  }
}

</mosaic_0001>

<bundles_post_ra>
// kernel: tpu_custom_call.1
= control target key start
LH: loop header
LB: loop body
LE: loop exit
PB: predicated region body
PF: predicated region fallthrough
CT: control target
= control target key end

     0   :  { %8 = vsyncpa [#allocation3], 0  ;;  %s11328_s0 = inlined_call_operand.hbm [shape: f32[64,384], index: 0, kind: input, shape index: {}]   ;;  %s11329_s1 = inlined_call_operand.hbm [shape: f32[384,8], index: 1, kind: input, shape index: {}]   ;;  %s11330_s2 = inlined_call_operand.hbm [shape: f32[8,384], index: 2, kind: input, shape index: {}]   ;;  %s11331_s3 = inlined_call_operand.hbm [shape: f32[64,384], index: 3, kind: output, shape index: {}]  }
   0x1   :  { %9 = vsyncpa [#allocation6], 0 }
   0x2   :  { %10 = vsyncpa [#allocation4], 0  ;;  %s9036_s12 = smov [#allocation5]   ;;  %s8942_s16 = scalar_lea.hbm %s11329_s1, 6144 }
   0x3   :  { %s28_s13 = sshll.u32 %s9036_s12, 4  ;;  %p8943_p0 = scmp.ne.s32.totalorder %s11329_s1, %s8942_s16  ;;  %s29_s13 = int_to_ptr.vmem [resolvable:$true] %s28_s13 }
   0x4   :  { %p8946_p1 = scmp.lt.u32.totalorder %s8942_s16, %s11329_s1 }
   0x6   :  { %p8948_p2 = pnand %p8946_p1, %p8943_p0 }
   0x8   :  { %8951 = shalt.err (!%p8948_p2)
}
   0x9   :  { %s8952_s21 = scalar_lea.vmem %s29_s13, 6144  ;;  %p8957_p4 = scmp.lt.s32.totalorder %s29_s13, %s29_s13 }
   0xa   :  { %p8953_p3 = scmp.ne.s32.totalorder %s29_s13, %s8952_s21  ;;  %p8958_p5 = scmp.lt.s32.totalorder %s8952_s21, %s8952_s21 }
   0xc   :  { %p8959_p6 = por %p8958_p5, %p8957_p4 }
   0xe   :  { %p8960_p7 = pnand %p8959_p6, %p8953_p3 }
  0x10   :  { %8963 = shalt.err (!%p8960_p7)
}
  0x11   :  { %s9037_s22 = smov 128   ;;  %s9038_s23 = smov 8  }
  0x12   :  { %34 = dma.hbm_to_vmem [thread:$0]  %s11329_s1, 6144, %s29_s13, [#allocation6], %s9037_s22, %s9037_s22, %s9038_s23  }
  0x13   :  { %s9039_s26 = smov [#allocation2]   ;;  %s8964_s30 = scalar_lea.hbm %s11328_s0, 3072 }
  0x14   :  { %s16_s27 = sshll.u32 %s9039_s26, 4  ;;  %p8965_p8 = scmp.ne.s32.totalorder %s11328_s0, %s8964_s30  ;;  %s17_s27 = int_to_ptr.vmem [resolvable:$true] %s16_s27 }
  0x15   :  { %p8968_p9 = scmp.lt.u32.totalorder %s8964_s30, %s11328_s0 }
  0x17   :  { %p8970_p10 = pnand %p8968_p9, %p8965_p8 }
  0x19   :  { %8973 = shalt.err (!%p8970_p10)
}
  0x1a   :  { %s8974_s8 = scalar_lea.vmem %s17_s27, 3072  ;;  %p8979_p12 = scmp.lt.s32.totalorder %s17_s27, %s17_s27 }
  0x1b   :  { %p8975_p11 = scmp.ne.s32.totalorder %s17_s27, %s8974_s8  ;;  %p8980_p13 = scmp.lt.s32.totalorder %s8974_s8, %s8974_s8 }
  0x1d   :  { %p8981_p0 = por %p8980_p13, %p8979_p12 }
  0x1f   :  { %p8982_p1 = pnand %p8981_p0, %p8975_p11 }
  0x21   :  { %8985 = shalt.err (!%p8982_p1)
}
  0x22   :  { %s9040_s1 = smov 384   ;;  %s9041_s9 = smov 24  }
  0x23   :  { %22 = dma.hbm_to_vmem [thread:$0]  %s11328_s0, 3072, %s17_s27, [#allocation3], %s9040_s1, %s9040_s1, %s9041_s9  }
  0x24   :  { %s9042_s12 = smov [#allocation7]   ;;  %s8986_s16 = scalar_lea.hbm %s11330_s2, 384 }
  0x25   :  { %s41_s13 = sshll.u32 %s9042_s12, 4  ;;  %p8987_p2 = scmp.ne.s32.totalorder %s11330_s2, %s8986_s16  ;;  %s42_s13 = int_to_ptr.vmem [resolvable:$true] %s41_s13 }
  0x26   :  { %p8990_p3 = scmp.lt.u32.totalorder %s8986_s16, %s11330_s2 }
  0x28   :  { %p8992_p4 = pnand %p8990_p3, %p8987_p2 }
  0x2a   :  { %8995 = shalt.err (!%p8992_p4)
}
  0x2b   :  { %s8996_s21 = scalar_lea.vmem %s42_s13, 384  ;;  %p9001_p6 = scmp.lt.s32.totalorder %s42_s13, %s42_s13 }
  0x2c   :  { %p8997_p5 = scmp.ne.s32.totalorder %s42_s13, %s8996_s21  ;;  %p9002_p7 = scmp.lt.s32.totalorder %s8996_s21, %s8996_s21 }
  0x2e   :  { %p9003_p8 = por %p9002_p7, %p9001_p6 }
  0x30   :  { %p9004_p9 = pnand %p9003_p8, %p8997_p5 }
  0x32   :  { %9007 = shalt.err (!%p9004_p9)
}
  0x33   :  { %44 = dma.hbm_to_vmem [thread:$0]  %s11330_s2, 384, %s42_s13, [#allocation6]  }
  0x34   :  { %9030 = dma.done.wait [#allocation3], 3072  }
  0x35   :  { %9031 = vsyncadd [#allocation3], 4294964224 }
  0x36   :  { %9032 = dma.done.wait [#allocation6], 6528  }
  0x37   :  { %9033 = vsyncadd [#allocation6], 4294960768  ;;  %v94_v0 = vld [vmem:[#allocation5 + $0x80] sm:$0xff]  ;;  %v95_v1 = vld [vmem:[#allocation5 + $0x88] sm:$0xff]  ;;  %vm4601_vm0 = vcmask 64512   ;;  %s9044_s2 = smov [#allocation8]  }
  0x38   :  { %v78_v2 = vld [vmem:[#allocation5] sm:$0xff]  ;;  %v178_v3 = vand.u32 4294901760, %v94_v0  ;;  %v181_v4 = vand.u32 4294901760, %v95_v1  ;;  %v79_v5 = vld [vmem:[#allocation5 + $0x8] sm:$0xff]  ;;  %v96_v7 = vld [vmem:[#allocation5 + $0x90] sm:$0xff]  ;;  %s6234_s23 = sshll.u32 %s9044_s2, 4  ;;  %s6235_s23 = int_to_ptr.vmem [resolvable:$true] %s6234_s23 }
  0x39   :  { %v130_v6 = vand.u32 4294901760, %v78_v2  ;;  %v97_v8 = vld [vmem:[#allocation5 + $0x98] sm:$0xff]  ;;  %v133_v9 = vand.u32 4294901760, %v79_v5  ;;  %v184_v10 = vand.u32 4294901760, %v96_v7  ;;  %v80_v12 = vld [vmem:[#allocation5 + $0x10] sm:$0xff]  ;;  %v98_v22 = vld [vmem:[#allocation5 + $0xa0] sm:$0xff]  ;;  %p9013_p11 = scmp.lt.s32.totalorder %s6235_s23, %s6235_s23 }
  0x3a   :  { %v187_v11 = vand.u32 4294901760, %v97_v8  ;;  %v81_v13 = vld [vmem:[#allocation5 + $0x18] sm:$0xff]  ;;  %v9104_v14 = vpack.c.bf16 %v181_v4, %v178_v3  ;;  %v9106_v15 = vsub.f32 %v94_v0, %v178_v3  ;;  %v9108_v16 = vsub.f32 %v95_v1, %v181_v4  ;;  %v99_v23 = vld [vmem:[#allocation5 + $0xa8] sm:$0xff]  ;;  %v82_v27 = vld [vmem:[#allocation5 + $0x20] sm:$0xff]  ;;  %s9008_s24 = scalar_lea.vmem %s6235_s23, 3072 }
  0x3b   :  { %v9110_v17 = vsub.f32 %v78_v2, %v130_v6  ;;  %v9112_v18 = vpack.c.bf16 %v133_v9, %v130_v6  ;;  %v9114_v19 = vsub.f32 %v79_v5, %v133_v9  ;;  %v136_v21 = vand.u32 4294901760, %v80_v12  ;;  %v83_v28 = vld [vmem:[#allocation5 + $0x28] sm:$0xff]  ;;  %v100_v29 = vld [vmem:[#allocation5 + $0xb0] sm:$0xff]  ;;  %v101_v37 = vld [vmem:[#allocation5 + $0xb8] sm:$0xff]  ;;  %p9009_p10 = scmp.ne.s32.totalorder %s6235_s23, %s9008_s24  ;;  %p9014_p12 = scmp.lt.s32.totalorder %s9008_s24, %s9008_s24 }
  0x3c   :  { %v9116_v20 = vpack.c.bf16 %v187_v11, %v184_v10  ;;  %7874 = vmatprep.subr.bf16.mxu1 %v9104_v14  ;;  %v9121_v24 = vpack.c.bf16 %v9108_v16, %v9106_v15  ;;  %v139_v25 = vand.u32 4294901760, %v81_v13  ;;  %v9123_v26 = vsub.f32 %v96_v7, %v184_v10  ;;  %v84_v42 = vld [vmem:[#allocation5 + $0x30] sm:$0xff]  ;;  %v85_v43 = vld [vmem:[#allocation5 + $0x38] sm:$0xff]  ;;  %v102_v48 = vld [vmem:[#allocation5 + $0xc0] sm:$0xff] }
  0x3d   :  { %7876 = vmatpush3.bf16.msra.mxu1 %v9112_v18  ;;  %v9128_v30 = vpack.c.bf16 %v9114_v19, %v9110_v17  ;;  %v9130_v31 = vsub.f32 %v97_v8, %v187_v11  ;;  %v9132_v32 = vsub.f32 %v80_v12, %v136_v21  ;;  %v190_v35 = vand.u32 4294901760, %v98_v22  ;;  %v103_v53 = vld [vmem:[#allocation5 + $0xc8] sm:$0xff]  ;;  %v86_v58 = vld [vmem:[#allocation5 + $0x40] sm:$0xff]  ;;  %v104_v0 = vld [vmem:[#allocation5 + $0xd0] sm:$0xff]  ;;  %p9015_p13 = por %p9014_p12, %p9013_p11 }
  0x3e   :  { %11609 = vst [vmem:[#allocation12_spill] sm:$0xff] %v9121_v24  ;;  %7938 = vmatprep.subr.bf16.mxu0 %v9121_v24  ;;  %7878 = vmatprep.subr.bf16.mxu1 %v9116_v20  ;;  %v9136_v33 = vpack.c.bf16 %v139_v25, %v136_v21  ;;  %v9138_v34 = vsub.f32 %v81_v13, %v139_v25  ;;  %v193_v36 = vand.u32 4294901760, %v99_v23  ;;  %v142_v39 = vand.u32 4294901760, %v82_v27  ;;  %v87_v59 = vld [vmem:[#allocation5 + $0x48] sm:$0xff]  ;;  %v105_v5 = vld [vmem:[#allocation5 + $0xd8] sm:$0xff]  ;;  %v88_v10 = vld [vmem:[#allocation5 + $0x50] sm:$0xff] }
  0x3f   :  { %11610 = vst [vmem:[#allocation13_spill] sm:$0xff] %v9128_v30  ;;  %7940 = vmatpush3.bf16.msra.mxu0 %v9128_v30  ;;  %v9143_v38 = vpack.c.bf16 %v9130_v31, %v9123_v26  ;;  %v145_v40 = vand.u32 4294901760, %v83_v28  ;;  %v196_v41 = vand.u32 4294901760, %v100_v29  ;;  %v9151_v46 = vsub.f32 %v98_v22, %v190_v35  ;;  %v89_v11 = vld [vmem:[#allocation5 + $0x58] sm:$0xff]  ;;  %p9016_p0 = pnand %p9015_p13, %p9009_p10 }
  0x40   :  { %11611 = vst [vmem:[#allocation14_spill] sm:$0xff] %v9136_v33  ;;  %v9147_v44 = vpack.c.bf16 %v9138_v34, %v9132_v32  ;;  %v9149_v45 = vpack.c.bf16 %v193_v36, %v190_v35  ;;  %v9153_v47 = vsub.f32 %v99_v23, %v193_v36  ;;  %v9159_v50 = vsub.f32 %v82_v27, %v142_v39  ;;  %v106_v23 = vld [vmem:[#allocation5 + $0xe0] sm:$0xff]  ;;  %v107_v35 = vld [vmem:[#allocation5 + $0xe8] sm:$0xff]  ;;  %v93_v12 = vld [vmem:[#allocation5 + $0x78] sm:$0xff] }
  0x41   :  { %11612 = vst [vmem:[#allocation15_spill] sm:$0xff] %v9143_v38  ;;  %7880 = vmatpush3.bf16.msra.mxu1 %v9136_v33  ;;  %7942 = vmatprep.subr.bf16.mxu0 %v9143_v38  ;;  %v9157_v49 = vpack.c.bf16 %v145_v40, %v142_v39  ;;  %v9161_v51 = vsub.f32 %v83_v28, %v145_v40  ;;  %v199_v52 = vand.u32 4294901760, %v101_v37  ;;  %v148_v55 = vand.u32 4294901760, %v84_v42 }
  0x42   :  { %11613 = vst [vmem:[#allocation16_spill] sm:$0xff] %v9147_v44  ;;  %11614 = vst [vmem:[#allocation17_spill] sm:$0xff] %v9149_v45  ;;  %7882 = vmatprep.subr.bf16.mxu1 %v9149_v45  ;;  %v9166_v54 = vpack.c.bf16 %v9153_v47, %v9151_v46  ;;  %v151_v56 = vand.u32 4294901760, %v85_v43  ;;  %v9168_v57 = vsub.f32 %v100_v29, %v196_v41  ;;  %v202_v63 = vand.u32 4294901760, %v102_v48 }
  0x43   :  { %11615 = vst [vmem:[#allocation18_spill] sm:$0xff] %v9157_v49  ;;  %7944 = vmatpush3.bf16.msra.mxu0 %v9147_v44  ;;  %v9173_v60 = vpack.c.bf16 %v9161_v51, %v9159_v50  ;;  %v9175_v61 = vpack.c.bf16 %v199_v52, %v196_v41  ;;  %v9177_v62 = vsub.f32 %v101_v37, %v199_v52  ;;  %v205_v4 = vand.u32 4294901760, %v103_v53  ;;  %v90_v41 = vld [vmem:[#allocation5 + $0x60] sm:$0xff] }
  0x44   :  { %11616 = vst [vmem:[#allocation19_spill] sm:$0xff] %v9166_v54  ;;  %7946 = vmatprep.subr.bf16.mxu0 %v9166_v54  ;;  %v9180_v1 = vpack.c.bf16 %v151_v56, %v148_v55  ;;  %v9182_v2 = vsub.f32 %v84_v42, %v148_v55  ;;  %v9184_v3 = vsub.f32 %v85_v43, %v151_v56  ;;  %v154_v7 = vand.u32 4294901760, %v86_v58  ;;  %v91_v42 = vld [vmem:[#allocation5 + $0x68] sm:$0xff]  ;;  %v108_v55 = vld [vmem:[#allocation5 + $0xf0] sm:$0xff] }
  0x45   :  { %11617 = vst [vmem:[#allocation20_spill] sm:$0xff] %v9173_v60  ;;  %11618 = vst [vmem:[#allocation21_spill] sm:$0xff] %v9175_v61  ;;  %7884 = vmatpush3.bf16.msra.mxu1 %v9157_v49  ;;  %v9189_v6 = vpack.c.bf16 %v9177_v62, %v9168_v57  ;;  %v157_v8 = vand.u32 4294901760, %v87_v59  ;;  %v9191_v9 = vsub.f32 %v102_v48, %v202_v63  ;;  %v208_v22 = vand.u32 4294901760, %v104_v0  ;;  %v92_v43 = vld [vmem:[#allocation5 + $0x70] sm:$0xff] }
  0x46   :  { %11619 = vst [vmem:[#allocation22_spill] sm:$0xff] %v9180_v1  ;;  %7886 = vmatprep.subr.bf16.mxu1 %v9175_v61  ;;  %v9195_v13 = vpack.c.bf16 %v205_v4, %v202_v63  ;;  %v9197_v21 = vsub.f32 %v103_v53, %v205_v4  ;;  %v9202_v25 = vpack.c.bf16 %v9184_v3, %v9182_v2  ;;  %v211_v29 = vand.u32 4294901760, %v105_v5 }
  0x47   :  { %11620 = vst [vmem:[#allocation23_spill] sm:$0xff] %v9189_v6  ;;  %7948 = vmatpush3.bf16.msra.mxu0 %v9173_v60  ;;  %v9204_v27 = vsub.f32 %v86_v58, %v154_v7  ;;  %v9206_v28 = vsub.f32 %v87_v59, %v157_v8  ;;  %v160_v37 = vand.u32 4294901760, %v88_v10  ;;  %v163_v39 = vand.u32 4294901760, %v89_v11 }
  0x48   :  { %11621 = vst [vmem:[#allocation24_spill] sm:$0xff] %v9195_v13  ;;  %11622 = vst [vmem:[#allocation25_spill] sm:$0xff] %v9202_v25  ;;  %7950 = vmatprep.subr.bf16.mxu0 %v9189_v6  ;;  %v9211_v36 = vpack.c.bf16 %v9197_v21, %v9191_v9  ;;  %v9213_v40 = vsub.f32 %v104_v0, %v208_v22  ;;  %v9217_v48 = vpack.c.bf16 %v157_v8, %v154_v7  ;;  %v109_v0 = vld [vmem:[#allocation5 + $0xf8] sm:$0xff] }
  0x49   :  { %7888 = vmatpush3.bf16.msra.mxu1 %v9180_v1  ;;  %v9219_v52 = vsub.f32 %v105_v5, %v211_v29  ;;  %v214_v53 = vand.u32 4294901760, %v106_v23  ;;  %v9222_v56 = vpack.c.bf16 %v211_v29, %v208_v22  ;;  %v9224_v58 = vsub.f32 %v88_v10, %v160_v37 }
  0x4a   :  { %11623 = vst [vmem:[#allocation26_spill] sm:$0xff] %v9211_v36  ;;  %11624 = vst [vmem:[#allocation27_spill] sm:$0xff] %v9217_v48  ;;  %7890 = vmatprep.subr.bf16.mxu1 %v9195_v13  ;;  %v9226_v59 = vsub.f32 %v89_v11, %v163_v39  ;;  %v217_v63 = vand.u32 4294901760, %v107_v35  ;;  %v9231_v4 = vpack.c.bf16 %v9206_v28, %v9204_v27  ;;  %v166_v5 = vand.u32 4294901760, %v90_v41 }
  0x4b   :  { %11625 = vst [vmem:[#allocation28_spill] sm:$0xff] %v9222_v56  ;;  %7952 = vmatpush3.bf16.msra.mxu0 %v9202_v25  ;;  %v169_v7 = vand.u32 4294901760, %v91_v42  ;;  %v9233_v8 = vsub.f32 %v106_v23, %v214_v53  ;;  %v9236_v10 = vpack.c.bf16 %v163_v39, %v160_v37  ;;  %v9240_v11 = vpack.c.bf16 %v9219_v52, %v9213_v40  ;;  %v55_v25 = vld [vmem:[#allocation2 + $0x8] sm:$0xff]  ;;  %v54_v39 = vld [vmem:[#allocation2] sm:$0xff] }
  0x4c   :  { %11626 = vst [vmem:[#allocation29_spill] sm:$0xff] %v9231_v4  ;;  %7954 = vmatprep.subr.bf16.mxu0 %v9211_v36  ;;  %v9242_v22 = vsub.f32 %v107_v35, %v217_v63  ;;  %v220_v29 = vand.u32 4294901760, %v108_v55  ;;  %v9247_v23 = vpack.c.bf16 %v9226_v59, %v9224_v58  ;;  %v9249_v6 = vsub.f32 %v90_v41, %v166_v5 }
  0x4d   :  { %11627 = vst [vmem:[#allocation30_spill] sm:$0xff] %v9236_v10  ;;  %11628 = vst [vmem:[#allocation31_spill] sm:$0xff] %v9240_v11  ;;  %7892 = vmatpush3.bf16.msra.mxu1 %v9217_v48  ;;  %v9251_v60 = vsub.f32 %v91_v42, %v169_v7  ;;  %v223_v37 = vand.u32 4294901760, %v109_v0  ;;  %v9254_v36 = vpack.c.bf16 %v217_v63, %v214_v53  ;;  %v172_v35 = vand.u32 4294901760, %v92_v43 }
  0x4e   :  { %11629 = vst [vmem:[#allocation32_spill] sm:$0xff] %v9247_v23  ;;  %7894 = vmatprep.subr.bf16.mxu1 %v9222_v56  ;;  %v175_v54 = vand.u32 4294901760, %v93_v12  ;;  %v9256_v44 = vsub.f32 %v108_v55, %v220_v29  ;;  %v9259_v38 = vpack.c.bf16 %v169_v7, %v166_v5  ;;  %v9263_v41 = vpack.c.bf16 %v9242_v22, %v9233_v8  ;;  %v57_v56 = vld [vmem:[#allocation2 + $0x18] sm:$0xff] }
  0x4f   :  { %11630 = vst [vmem:[#allocation33_spill] sm:$0xff] %v9254_v36  ;;  %7956 = vmatpush3.bf16.msra.mxu0 %v9231_v4  ;;  %v9265_v42 = vsub.f32 %v109_v0, %v223_v37  ;;  %v9267_v30 = vand.u32 4294901760, %v55_v25  ;;  %v9272_v53 = vpack.c.bf16 %v9251_v60, %v9249_v6  ;;  %v9274_v55 = vsub.f32 %v92_v43, %v172_v35 }
  0x50   :  { %11631 = vst [vmem:[#allocation34_spill] sm:$0xff] %v9259_v38  ;;  %11632 = vst [vmem:[#allocation35_spill] sm:$0xff] %v9263_v41  ;;  %7958 = vmatprep.subr.bf16.mxu0 %v9240_v11  ;;  %v9276_v63 = vsub.f32 %v93_v12, %v175_v54  ;;  %v9278_v5 = vand.u32 4294901760, %v54_v39  ;;  %v9281_v7 = vpack.c.bf16 %v223_v37, %v220_v29  ;;  %v461_v11 = vand.u32 4294901760, %v9106_v15  ;;  %v58_v37 = vld [vmem:[#allocation2 + $0x20] sm:$0xff] }
  0x51   :  { %11633 = vst [vmem:[#allocation36_spill] sm:$0xff] %v9267_v30  ;;  %11634 = vst [vmem:[#allocation37_spill] sm:$0xff] %v9272_v53  ;;  %7896 = vmatpush3.bf16.msra.mxu1 %v9236_v10  ;;  %v9283_v0 = vpack.c.bf16 %v175_v54, %v172_v35  ;;  %v9286_v4 = vsub.f32 %v55_v25, %v9267_v30  ;;  %v9292_v43 = vpack.c.bf16 %v9265_v42, %v9256_v44 }
  0x52   :  { %11635 = vst [vmem:[#allocation38_spill] sm:$0xff] %v9278_v5  ;;  %11636 = vst [vmem:[#allocation39_spill] sm:$0xff] %v9281_v7  ;;  %7898 = vmatprep.subr.bf16.mxu1 %v9254_v36  ;;  %v9295_v12 = vsub.f32 %v54_v39, %v9278_v5  ;;  %v468_v24 = vand.u32 4294901760, %v9108_v16  ;;  %v11640_v29 = vand.u32 4294901760, %v9110_v17  ;;  %v9305_v35 = vpack.c.bf16 %v9276_v63, %v9274_v55 }
  0x53   :  { %11637 = vst [vmem:[#allocation40_spill] sm:$0xff] %v9283_v0  ;;  %11638 = vst [vmem:[#allocation41_spill] sm:$0xff] %v9286_v4  ;;  %7960 = vmatpush3.bf16.msra.mxu0 %v9247_v23  ;;  %v462_v36 = vsub.f32 %v9106_v15, %v461_v11  ;;  %v11642_v39 = vand.u32 4294901760, %v9114_v19  ;;  %757 = vmatprep.mubr.f32.mxu0 %v9286_v4  ;;  %v11644_v15 = vand.u32 4294901760, %v9286_v4  ;;  %v9321_v61 = vand.u32 4294901760, %v58_v37 }
  0x54   :  { %11639 = vst [vmem:[#allocation42_spill] sm:$0xff] %v9292_v43  ;;  %v350_v54 = vsub.f32 %v9110_v17, %v11640_v29  ;;  %11641 = vst [vmem:[#allocation43_spill] sm:$0xff] %v9305_v35  ;;  %7962 = vmatprep.subr.bf16.mxu0 %v9263_v41  ;;  %v11362_v29 = vand.u32 4294901760, %v9295_v12  ;;  %v469_v23 = vsub.f32 %v9108_v16, %v468_v24 }
  0x55   :  { %v357_v10 = vsub.f32 %v9114_v19, %v11642_v39  ;;  %v9315_v48 = vpack.c.bf16 %v468_v24, %v461_v11  ;;  %7900 = vmatpush3.bf16.msra.mxu1 %v9259_v38  ;;  %v228_v13 = vsub.f32 %v9286_v4, %v11644_v15  ;;  %v463_v1 = vand.u32 4294901760, %v462_v36  ;;  %11645 = vst [vmem:[#allocation45_spill] sm:$0xff] %v9321_v61 }
  0x56   :  { %v351_v25 = vand.u32 4294901760, %v350_v54  ;;  %7902 = vmatprep.subr.bf16.mxu1 %v9281_v7  ;;  %v234_v41 = vsub.f32 %v9295_v12, %v11362_v29  ;;  %v470_v16 = vand.u32 4294901760, %v469_v23  ;;  %v11646_v24 = vand.u32 4294901760, %v9110_v17  ;;  %v61_v29 = vld [vmem:[#allocation2 + $0x38] sm:$0xff] }
  0x57   :  { %11643 = vst [vmem:[#allocation44_spill] sm:$0xff] %v9315_v48  ;;  %v358_v39 = vand.u32 4294901760, %v357_v10  ;;  %v11647_v11 = vand.u32 4294901760, %v9114_v19  ;;  %v9333_v38 = vand.u32 4294901760, %v57_v56  ;;  %7964 = vmatpush3.bf16.msra.mxu0 %v9272_v53  ;;  %v229_v36 = vand.u32 4294901760, %v228_v13 }
  0x58   :  { %v9339_v15 = vsub.f32 %v58_v37, %v9321_v61  ;;  %v475_v4 = vand.u32 4294901760, %v9123_v26  ;;  %7966 = vmatprep.subr.bf16.mxu0 %v9292_v43  ;;  %v235_v17 = vand.u32 4294901760, %v234_v41  ;;  %v9343_v23 = vpack.c.bf16 %v470_v16, %v463_v1 }
  0x59   :  { %v9331_v54 = vpack.c.bf16 %v11647_v11, %v11646_v24  ;;  %11649 = vst [vmem:[#allocation47_spill] sm:$0xff] %v9333_v38  ;;  %v9336_v10 = vpack.c.bf16 %v358_v39, %v351_v25  ;;  %v9346_v19 = vsub.f32 %v57_v56, %v9333_v38  ;;  %v482_v24 = vand.u32 4294901760, %v9130_v31  ;;  %7904 = vmatpush3.bf16.msra.mxu1 %v9283_v0  ;;  %v60_v11 = vld [vmem:[#allocation2 + $0x30] sm:$0xff] }
  0x5a   :  { %11651 = vst [vmem:[#allocation49_spill] sm:$0xff] %v9343_v23  ;;  %230 = vmatprep.mubr.f32.mxu1 %v229_v36  ;;  %v11366_v13 = vand.u32 4294901760, %v9339_v15  ;;  %v476_v37 = vsub.f32 %v9123_v26, %v475_v4  ;;  %v363_v25 = vand.u32 4294901760, %v9132_v32  ;;  %v370_v39 = vand.u32 4294901760, %v9138_v34  ;;  %7906 = vmatprep.subr.bf16.mxu1 %v9343_v23 }
  0x5b   :  { %11648 = vst [vmem:[#allocation46_spill] sm:$0xff] %v9331_v54  ;;  %11650 = vst [vmem:[#allocation48_spill] sm:$0xff] %v9336_v10  ;;  %v11370_v1 = vand.u32 4294901760, %v9346_v19  ;;  %v483_v56 = vsub.f32 %v9130_v31, %v482_v24  ;;  %v9357_v41 = vpack.c.bf16 %v482_v24, %v475_v4  ;;  %v9359_v16 = vand.u32 4294901760, %v61_v29  ;;  %7968 = vmatpush3.bf16.msra.mxu0 %v9305_v35 }
  0x5c   :  { %v243_v26 = vsub.f32 %v9339_v15, %v11366_v13  ;;  %v477_v36 = vand.u32 4294901760, %v476_v37  ;;  %v364_v43 = vsub.f32 %v9132_v32, %v363_v25  ;;  %v371_v53 = vsub.f32 %v9138_v34, %v370_v39  ;;  %236 = vmatmul.mubr.f32.vlgmr.msra.gmra.mrb[0].mxu1 %v235_v17  ;;  %8002 = vmatprep.subr.bf16.mxu0 %v9315_v48  ;;  %v64_v34 = vld [vmem:[#allocation2 + $0x50] sm:$0xff] }
  0x5d   :  { %11652 = vst [vmem:[#allocation50_spill] sm:$0xff] %v9357_v41  ;;  %11653 = vst [vmem:[#allocation51_spill] sm:$0xff] %v9359_v16  ;;  %v249_v31 = vsub.f32 %v9346_v19, %v11370_v1  ;;  %v484_v4 = vand.u32 4294901760, %v483_v56  ;;  %v9372_v24 = vsub.f32 %v61_v29, %v9359_v16  ;;  %v9374_v35 = vpack.c.bf16 %v370_v39, %v363_v25 }
  0x5e   :  { %7908 = vmatpush3.bf16.msra.mxu1 %v9336_v10  ;;  %v244_v37 = vand.u32 4294901760, %v243_v26  ;;  %v365_v13 = vand.u32 4294901760, %v364_v43  ;;  %v372_v32 = vand.u32 4294901760, %v371_v53  ;;  %v9377_v23 = vand.u32 4294901760, %v60_v11  ;;  %760 = vmatmul.mubr.f32.vlgmr.msra.gmra.mrb[0].mxu0 %v9295_v12  ;;  %v9710_v10 = vld [vmem:[#allocation5 + $0x158] sm:$0xff] }
  0x5f   :  { %11654 = vst [vmem:[#allocation52_spill] sm:$0xff] %v9374_v35  ;;  %v250_v17 = vand.u32 4294901760, %v249_v31  ;;  %v9380_v48 = vpack.c.bf16 %v484_v4, %v477_v36  ;;  %v11369_v56 = vand.u32 4294901760, %v9372_v24  ;;  %v489_v29 = vand.u32 4294901760, %v9151_v46  ;;  %8004 = vmatpush3.bf16.msra.mxu0 %v9331_v54  ;;  %766 = vmatprep.mubr.f32.mxu0 %v9339_v15 }
  0x60   :  { %11655 = vst [vmem:[#allocation53_spill] sm:$0xff] %v9377_v23  ;;  %245 = vmatprep.mubr.f32.mxu1 %v244_v37  ;;  %v9385_v25 = vpack.c.bf16 %v372_v32, %v365_v13  ;;  %v9388_v43 = vsub.f32 %v60_v11, %v9377_v23  ;;  %v496_v53 = vand.u32 4294901760, %v9153_v47  ;;  %v377_v39 = vand.u32 4294901760, %v9159_v50  ;;  %8006 = vmatprep.subr.bf16.mxu0 %v9357_v41 }
  0x61   :  { %11656 = vst [vmem:[#allocation54_spill] sm:$0xff] %v9380_v48  ;;  %251 = vmatmul.mubr.f32.gmra.mrb[2].mxu1 %v250_v17  ;;  %7910 = vmatprep.subr.bf16.mxu1 %v9380_v48  ;;  %v258_v26 = vsub.f32 %v9372_v24, %v11369_v56  ;;  %v490_v36 = vsub.f32 %v9151_v46, %v489_v29  ;;  %v384_v31 = vand.u32 4294901760, %v9161_v51  ;;  %v9398_v13 = vand.u32 4294901760, %v64_v34  ;;  %v63_v17 = vld [vmem:[#allocation2 + $0x48] sm:$0xff] }
  0x62   :  { %11657 = vst [vmem:[#allocation55_spill] sm:$0xff] %v9385_v25  ;;  %7912 = vmatpush3.bf16.msra.mxu1 %v9385_v25  ;;  %v11374_v11 = vand.u32 4294901760, %v9388_v43  ;;  %v497_v4 = vsub.f32 %v9153_v47, %v496_v53  ;;  %v378_v37 = vsub.f32 %v9159_v50, %v377_v39  ;;  %v9405_v32 = vpack.c.bf16 %v496_v53, %v489_v29 }
  0x63   :  { %11658 = vst [vmem:[#allocation56_spill] sm:$0xff] %v9398_v13  ;;  %769 = vmatmul.mubr.f32.gmra.mrb[2].mxu0 %v9346_v19  ;;  %v259_v46 = vand.u32 4294901760, %v258_v26  ;;  %v491_v56 = vand.u32 4294901760, %v490_v36  ;;  %v385_v1 = vsub.f32 %v9161_v51, %v384_v31  ;;  %v9411_v54 = vsub.f32 %v64_v34, %v9398_v13 }
  0x64   :  { %11659 = vst [vmem:[#allocation57_spill] sm:$0xff] %v9405_v32  ;;  %8008 = vmatpush3.bf16.msra.mxu0 %v9374_v35  ;;  %v264_v47 = vsub.f32 %v9388_v43, %v11374_v11  ;;  %v498_v50 = vand.u32 4294901760, %v497_v4  ;;  %v379_v29 = vand.u32 4294901760, %v378_v37  ;;  %775 = vmatprep.mubr.f32.mxu0 %v9372_v24  ;;  %v9418_v53 = vpack.c.bf16 %v384_v31, %v377_v39  ;;  %v67_v11 = vld [vmem:[#allocation2 + $0x68] sm:$0xff] }
  0x65   :  { %260 = vmatprep.mubr.f32.mxu1 %v259_v46  ;;  %v386_v26 = vand.u32 4294901760, %v385_v1  ;;  %8010 = vmatprep.subr.bf16.mxu0 %v9405_v32  ;;  %v11375_v51 = vand.u32 4294901760, %v9411_v54  ;;  %v9422_v34 = vand.u32 4294901760, %v63_v17  ;;  %v503_v36 = vand.u32 4294901760, %v9168_v57 }
  0x66   :  { %11660 = vst [vmem:[#allocation58_spill] sm:$0xff] %v9418_v53  ;;  %v265_v35 = vand.u32 4294901760, %v264_v47  ;;  %v9425_v41 = vpack.c.bf16 %v498_v50, %v491_v56  ;;  %v510_v4 = vand.u32 4294901760, %v9177_v62  ;;  %v391_v37 = vand.u32 4294901760, %v9182_v2 }
  0x67   :  { %11661 = vst [vmem:[#allocation59_spill] sm:$0xff] %v9422_v34  ;;  %v9429_v39 = vpack.c.bf16 %v386_v26, %v379_v29  ;;  %778 = vmatmul.mubr.f32.gmra.mrb[4].mxu0 %v9388_v43  ;;  %v273_v1 = vsub.f32 %v9411_v54, %v11375_v51  ;;  %v9436_v31 = vsub.f32 %v63_v17, %v9422_v34  ;;  %v398_v50 = vand.u32 4294901760, %v9184_v3  ;;  %v66_v26 = vld [vmem:[#allocation2 + $0x60] sm:$0xff] }
  0x68   :  { %11662 = vst [vmem:[#allocation60_spill] sm:$0xff] %v9425_v41  ;;  %v504_v46 = vsub.f32 %v9168_v57, %v503_v36  ;;  %266 = vmatmul.mubr.f32.gmra.mrb[4].mxu1 %v265_v35  ;;  %7914 = vmatprep.subr.bf16.mxu1 %v9425_v41  ;;  %v511_v56 = vsub.f32 %v9177_v62, %v510_v4  ;;  %v9448_v35 = vand.u32 4294901760, %v67_v11 }
  0x69   :  { %11663 = vst [vmem:[#allocation61_spill] sm:$0xff] %v9429_v39  ;;  %v392_v47 = vsub.f32 %v9182_v2, %v391_v37  ;;  %v9443_v29 = vpack.c.bf16 %v510_v4, %v503_v36  ;;  %7916 = vmatpush3.bf16.msra.mxu1 %v9429_v39  ;;  %v274_v51 = vand.u32 4294901760, %v273_v1  ;;  %8012 = vmatpush3.bf16.msra.mxu0 %v9418_v53  ;;  %v11378_v17 = vand.u32 4294901760, %v9436_v31 }
  0x6a   :  { %v505_v57 = vand.u32 4294901760, %v504_v46  ;;  %11665 = vst [vmem:[#allocation63_spill] sm:$0xff] %v9448_v35  ;;  %v512_v32 = vand.u32 4294901760, %v511_v56  ;;  %v399_v62 = vsub.f32 %v9184_v3, %v398_v50  ;;  %784 = vmatprep.mubr.f32.mxu0 %v9411_v54  ;;  %v9453_v2 = vpack.c.bf16 %v398_v50, %v391_v37  ;;  %v69_v50 = vld [vmem:[#allocation2 + $0x78] sm:$0xff] }
  0x6b   :  { %11664 = vst [vmem:[#allocation62_spill] sm:$0xff] %v9443_v29  ;;  %v393_v41 = vand.u32 4294901760, %v392_v47  ;;  %8014 = vmatprep.subr.bf16.mxu0 %v9443_v29  ;;  %275 = vmatprep.mubr.f32.mxu1 %v274_v51  ;;  %v279_v36 = vsub.f32 %v9436_v31, %v11378_v17  ;;  %v9460_v4 = vsub.f32 %v67_v11, %v9448_v35  ;;  %v9462_v1 = vand.u32 4294901760, %v66_v26  ;;  %v70_v29 = vld [vmem:[#allocation2 + $0x80] sm:$0xff] }
  0x6c   :  { %11666 = vst [vmem:[#allocation64_spill] sm:$0xff] %v9453_v2  ;;  %787 = vmatmul.mubr.f32.gmra.mrb[6].mxu0 %v9436_v31  ;;  %v517_v3 = vand.u32 4294901760, %v9191_v9  ;;  %v9465_v46 = vpack.c.bf16 %v512_v32, %v505_v57  ;;  %v400_v56 = vand.u32 4294901760, %v399_v62  ;;  %v524_v37 = vand.u32 4294901760, %v9197_v21 }
  0x6d   :  { %11667 = vst [vmem:[#allocation65_spill] sm:$0xff] %v9462_v1  ;;  %v405_v51 = vand.u32 4294901760, %v9204_v27  ;;  %v280_v47 = vand.u32 4294901760, %v279_v36  ;;  %8016 = vmatpush3.bf16.msra.mxu0 %v9453_v2  ;;  %v9472_v17 = vsub.f32 %v66_v26, %v9462_v1  ;;  %793 = vmatprep.mubr.f32.mxu0 %v9460_v4  ;;  %v412_v36 = vand.u32 4294901760, %v9206_v28 }
  0x6e   :  { %11668 = vst [vmem:[#allocation66_spill] sm:$0xff] %v9465_v46  ;;  %v518_v11 = vsub.f32 %v9191_v9, %v517_v3  ;;  %7918 = vmatprep.subr.bf16.mxu1 %v9465_v46  ;;  %v9477_v32 = vpack.c.bf16 %v400_v56, %v393_v41  ;;  %v525_v57 = vsub.f32 %v9197_v21, %v524_v37  ;;  %v11670_v26 = vand.u32 4294901760, %v9460_v4 }
  0x6f   :  { %v406_v62 = vsub.f32 %v9204_v27, %v405_v51  ;;  %281 = vmatmul.mubr.f32.gmra.mrb[6].mxu1 %v280_v47  ;;  %v11384_v9 = vand.u32 4294901760, %v9472_v17  ;;  %v9487_v46 = vpack.c.bf16 %v524_v37, %v517_v3  ;;  %v413_v27 = vsub.f32 %v9206_v28, %v412_v36 }
  0x70   :  { %11669 = vst [vmem:[#allocation67_spill] sm:$0xff] %v9477_v32  ;;  %v288_v2 = vsub.f32 %v9460_v4, %v11670_v26  ;;  %v519_v53 = vand.u32 4294901760, %v518_v11  ;;  %796 = vmatmul.mubr.f32.gmra.mrb[8].mxu0 %v9472_v17  ;;  %7920 = vmatpush3.bf16.msra.mxu1 %v9477_v32  ;;  %v526_v21 = vand.u32 4294901760, %v525_v57  ;;  %v9491_v56 = vand.u32 4294901760, %v70_v29 }
  0x71   :  { %11671 = vst [vmem:[#allocation68_spill] sm:$0xff] %v9487_v46  ;;  %v407_v41 = vand.u32 4294901760, %v406_v62  ;;  %v294_v26 = vsub.f32 %v9472_v17, %v11384_v9  ;;  %8018 = vmatprep.subr.bf16.mxu0 %v9487_v46  ;;  %v9497_v11 = vpack.c.bf16 %v412_v36, %v405_v51  ;;  %v9499_v39 = vand.u32 4294901760, %v69_v50  ;;  %v9513_v9 = vld [vmem:[#allocation2 + $0x98] sm:$0xff] }
  0x72   :  { %11672 = vst [vmem:[#allocation69_spill] sm:$0xff] %v9491_v56  ;;  %v289_v47 = vand.u32 4294901760, %v288_v2  ;;  %v9501_v3 = vpack.c.bf16 %v526_v21, %v519_v53  ;;  %v414_v37 = vand.u32 4294901760, %v413_v27  ;;  %v9504_v57 = vsub.f32 %v70_v29, %v9491_v56  ;;  %11678 = vst [vmem:[#allocation75_spill] sm:$0xff] %v9513_v9 }
  0x73   :  { %11673 = vst [vmem:[#allocation70_spill] sm:$0xff] %v9497_v11  ;;  %11674 = vst [vmem:[#allocation71_spill] sm:$0xff] %v9499_v39  ;;  %v531_v28 = vand.u32 4294901760, %v9213_v40  ;;  %v295_v2 = vand.u32 4294901760, %v294_v26  ;;  %8020 = vmatpush3.bf16.msra.mxu0 %v9497_v11  ;;  %v9509_v62 = vsub.f32 %v69_v50, %v9499_v39  ;;  %v538_v51 = vand.u32 4294901760, %v9219_v52 }
  0x74   :  { %11675 = vst [vmem:[#allocation72_spill] sm:$0xff] %v9501_v3  ;;  %11676 = vst [vmem:[#allocation73_spill] sm:$0xff] %v9504_v57  ;;  %290 = vmatprep.mubr.f32.mxu1 %v289_v47  ;;  %v419_v36 = vand.u32 4294901760, %v9224_v58  ;;  %7922 = vmatprep.subr.bf16.mxu1 %v9501_v3  ;;  %v9516_v53 = vpack.c.bf16 %v414_v37, %v407_v41  ;;  %v11389_v29 = vand.u32 4294901760, %v9504_v57  ;;  %v426_v27 = vand.u32 4294901760, %v9226_v59  ;;  %v9528_v41 = vld [vmem:[#allocation2 + $0x90] sm:$0xff] }
  0x75   :  { %11677 = vst [vmem:[#allocation74_spill] sm:$0xff] %v9509_v62  ;;  %v532_v21 = vsub.f32 %v9213_v40, %v531_v28  ;;  %802 = vmatprep.mubr.f32.mxu0 %v9504_v57  ;;  %296 = vmatmul.mubr.f32.gmra.mrb[8].mxu1 %v295_v2  ;;  %v539_v47 = vsub.f32 %v9219_v52, %v538_v51  ;;  %11681 = vst [vmem:[#allocation78_spill] sm:$0xff] %v9528_v41  ;;  %v9536_v50 = vand.u32 4294901760, %v9513_v9 }
  0x76   :  { %11679 = vst [vmem:[#allocation76_spill] sm:$0xff] %v9516_v53  ;;  %v420_v26 = vsub.f32 %v9224_v58, %v419_v36  ;;  %805 = vmatmul.mubr.f32.gmra.mrb[10].mxu0 %v9509_v62  ;;  %v9526_v11 = vpack.c.bf16 %v538_v51, %v531_v28  ;;  %7924 = vmatpush3.bf16.msra.mxu1 %v9516_v53  ;;  %v11683_v52 = vand.u32 4294901760, %v9509_v62 }
  0x77   :  { %v303_v40 = vsub.f32 %v9504_v57, %v11389_v29  ;;  %v533_v37 = vand.u32 4294901760, %v532_v21  ;;  %v427_v2 = vsub.f32 %v9226_v59, %v426_v27  ;;  %11682 = vst [vmem:[#allocation79_spill] sm:$0xff] %v9536_v50  ;;  %v540_v28 = vand.u32 4294901760, %v539_v47  ;;  %v11738_v57 = vld [vmem:[#allocation28_spill] sm:$0xff] }
  0x78   :  { %11680 = vst [vmem:[#allocation77_spill] sm:$0xff] %v9526_v11  ;;  %v309_v58 = vsub.f32 %v9509_v62, %v11683_v52  ;;  %v421_v51 = vand.u32 4294901760, %v420_v26  ;;  %8022 = vmatprep.subr.bf16.mxu0 %v9526_v11  ;;  %v9542_v46 = vpack.c.bf16 %v426_v27, %v419_v36  ;;  %v9546_v21 = vsub.f32 %v9513_v9, %v9536_v50  ;;  %v9556_v36 = vld [vmem:[#allocation2 + $0xb0] sm:$0xff] }
  0x79   :  { %v304_v53 = vand.u32 4294901760, %v303_v40  ;;  %v428_v3 = vand.u32 4294901760, %v427_v2  ;;  %v9549_v59 = vand.u32 4294901760, %v9528_v41  ;;  %v9551_v32 = vpack.c.bf16 %v540_v28, %v533_v37  ;;  %11688 = vst [vmem:[#allocation84_spill] sm:$0xff] %v9556_v36 }
  0x7a   :  { %11684 = vst [vmem:[#allocation80_spill] sm:$0xff] %v9542_v46  ;;  %11685 = vst [vmem:[#allocation81_spill] sm:$0xff] %v9546_v21  ;;  %v310_v29 = vand.u32 4294901760, %v309_v58  ;;  %8024 = vmatpush3.bf16.msra.mxu0 %v9542_v46  ;;  %v545_v47 = vand.u32 4294901760, %v9233_v8  ;;  %v552_v26 = vand.u32 4294901760, %v9242_v22  ;;  %v11393_v40 = vand.u32 4294901760, %v9546_v21  ;;  %811 = vmatprep.mubr.f32.mxu0 %v9546_v21 }
  0x7b   :  { %11686 = vst [vmem:[#allocation82_spill] sm:$0xff] %v9549_v59  ;;  %11687 = vst [vmem:[#allocation83_spill] sm:$0xff] %v9551_v32  ;;  %305 = vmatprep.mubr.f32.mxu1 %v304_v53  ;;  %v9558_v27 = vpack.c.bf16 %v428_v3, %v421_v51  ;;  %v9563_v2 = vsub.f32 %v9528_v41, %v9549_v59  ;;  %v433_v37 = vand.u32 4294901760, %v9249_v6  ;;  %7926 = vmatprep.subr.bf16.mxu1 %v9551_v32 }
  0x7c   :  { %311 = vmatmul.mubr.f32.gmra.mrb[10].mxu1 %v310_v29  ;;  %v546_v52 = vsub.f32 %v9233_v8, %v545_v47  ;;  %v553_v58 = vsub.f32 %v9242_v22, %v552_v26  ;;  %v440_v3 = vand.u32 4294901760, %v9251_v60  ;;  %v9571_v53 = vpack.c.bf16 %v552_v26, %v545_v47  ;;  %v9583_v22 = vld [vmem:[#allocation2 + $0xa8] sm:$0xff] }
  0x7d   :  { %11689 = vst [vmem:[#allocation85_spill] sm:$0xff] %v9558_v27  ;;  %11690 = vst [vmem:[#allocation86_spill] sm:$0xff] %v9563_v2  ;;  %7928 = vmatpush3.bf16.msra.mxu1 %v9558_v27  ;;  %v318_v28 = vsub.f32 %v9546_v21, %v11393_v40  ;;  %v11397_v51 = vand.u32 4294901760, %v9563_v2  ;;  %v434_v29 = vsub.f32 %v9249_v6, %v433_v37  ;;  %814 = vmatmul.mubr.f32.gmra.mrb[12].mxu0 %v9563_v2 }
  0x7e   :  { %11691 = vst [vmem:[#allocation87_spill] sm:$0xff] %v9571_v53  ;;  %v9581_v8 = vand.u32 4294901760, %v9556_v36  ;;  %11693 = vst [vmem:[#allocation89_spill] sm:$0xff] %v9583_v22  ;;  %v547_v46 = vand.u32 4294901760, %v546_v52  ;;  %v554_v47 = vand.u32 4294901760, %v553_v58  ;;  %v441_v26 = vsub.f32 %v9251_v60, %v440_v3  ;;  %8026 = vmatprep.subr.bf16.mxu0 %v9571_v53  ;;  %v9625_v53 = vld [vmem:[#allocation5 + $0x108] sm:$0xff] }
  0x7f   :  { %v9587_v11 = vpack.c.bf16 %v440_v3, %v433_v37  ;;  %v319_v40 = vand.u32 4294901760, %v318_v28  ;;  %v324_v6 = vsub.f32 %v9563_v2, %v11397_v51  ;;  %v435_v27 = vand.u32 4294901760, %v434_v29 }
  0x80   :  { %11692 = vst [vmem:[#allocation88_spill] sm:$0xff] %v9581_v8  ;;  %v9594_v32 = vsub.f32 %v9556_v36, %v9581_v8  ;;  %v9596_v25 = vpack.c.bf16 %v554_v47, %v547_v46  ;;  %v442_v52 = vand.u32 4294901760, %v441_v26  ;;  %v9600_v60 = vand.u32 4294901760, %v9583_v22 }
  0x81   :  { %11694 = vst [vmem:[#allocation90_spill] sm:$0xff] %v9587_v11  ;;  %8028 = vmatpush3.bf16.msra.mxu0 %v9587_v11  ;;  %v559_v37 = vand.u32 4294901760, %v9256_v44  ;;  %320 = vmatprep.mubr.f32.mxu1 %v319_v40  ;;  %v325_v58 = vand.u32 4294901760, %v324_v6  ;;  %v566_v28 = vand.u32 4294901760, %v9265_v42  ;;  %v447_v29 = vand.u32 4294901760, %v9274_v55  ;;  %v9616_v6 = vld [vmem:[#allocation5 + $0x100] sm:$0xff] }
  0x82   :  { %11695 = vst [vmem:[#allocation91_spill] sm:$0xff] %v9594_v32  ;;  %11696 = vst [vmem:[#allocation92_spill] sm:$0xff] %v9596_v25  ;;  %v11402_v3 = vand.u32 4294901760, %v9594_v32  ;;  %820 = vmatprep.mubr.f32.mxu0 %v9594_v32  ;;  %7930 = vmatprep.subr.bf16.mxu1 %v9596_v25  ;;  %v9608_v46 = vpack.c.bf16 %v442_v52, %v435_v27  ;;  %v9612_v47 = vsub.f32 %v9583_v22, %v9600_v60  ;;  %v9627_v25 = vld [vmem:[#allocation5 + $0x110] sm:$0xff] }
  0x83   :  { %v560_v26 = vsub.f32 %v9256_v44, %v559_v37  ;;  %v454_v40 = vand.u32 4294901760, %v9276_v63  ;;  %326 = vmatmul.mubr.f32.gmra.mrb[12].mxu1 %v325_v58  ;;  %v567_v11 = vsub.f32 %v9265_v42, %v566_v28  ;;  %v448_v27 = vsub.f32 %v9274_v55, %v447_v29  ;;  %v9635_v42 = vld [vmem:[#allocation5 + $0x118] sm:$0xff] }
  0x84   :  { %11697 = vst [vmem:[#allocation93_spill] sm:$0xff] %v9608_v46  ;;  %11698 = vst [vmem:[#allocation94_spill] sm:$0xff] %v9612_v47  ;;  %v333_v51 = vsub.f32 %v9594_v32, %v11402_v3  ;;  %v9623_v52 = vpack.c.bf16 %v566_v28, %v559_v37  ;;  %7932 = vmatpush3.bf16.msra.mxu1 %v9608_v46  ;;  %v11407_v44 = vand.u32 4294901760, %v9612_v47  ;;  %823 = vmatmul.mubr.f32.gmra.mrb[14].mxu0 %v9612_v47 }
  0x85   :  { %v561_v22 = vand.u32 4294901760, %v560_v26  ;;  %v455_v58 = vsub.f32 %v9276_v63, %v454_v40  ;;  %v9633_v3 = vpack.c.bf16 %v454_v40, %v447_v29  ;;  %v568_v37 = vand.u32 4294901760, %v567_v11  ;;  %1174 = vmatprep.mubr.f32.mxu0 %v9267_v30  ;;  %v9648_v11 = vld [vmem:[#allocation5 + $0x128] sm:$0xff] }
  0x86   :  { %11699 = vst [vmem:[#allocation95_spill] sm:$0xff] %v9623_v52  ;;  %v334_v55 = vand.u32 4294901760, %v333_v51  ;;  %v449_v28 = vand.u32 4294901760, %v448_v27  ;;  %8030 = vmatprep.subr.bf16.mxu0 %v9623_v52  ;;  %v1384_v46 = vand.u32 4294901760, %v9616_v6  ;;  %v339_v26 = vsub.f32 %v9612_v47, %v11407_v44  ;;  %v9646_v51 = vld [vmem:[#allocation5 + $0x120] sm:$0xff]  ;;  %v11724_v47 = vld [vmem:[#allocation22_spill] sm:$0xff] }
  0x87   :  { %11700 = vst [vmem:[#allocation96_spill] sm:$0xff] %v9633_v3  ;;  %v456_v63 = vand.u32 4294901760, %v455_v58  ;;  %8032 = vmatpush3.bf16.msra.mxu0 %v9633_v3  ;;  %v1387_v29 = vand.u32 4294901760, %v9625_v53  ;;  %v11409_v40 = vand.u32 4294901760, %v9627_v25  ;;  %v9650_v27 = vpack.c.bf16 %v568_v37, %v561_v22  ;;  %v9668_v37 = vld [vmem:[#allocation5 + $0x130] sm:$0xff] }
  0x88   :  { %335 = vmatprep.mubr.f32.mxu1 %v334_v55  ;;  %v11408_v52 = vand.u32 4294901760, %v9635_v42  ;;  %v340_v48 = vand.u32 4294901760, %v339_v26  ;;  %v11411_v22 = vand.u32 4294901760, %v9646_v51  ;;  %v11410_v55 = vand.u32 4294901760, %v9648_v11 }
  0x89   :  { %11701 = vst [vmem:[#allocation97_spill] sm:$0xff] %v9650_v27  ;;  %v9653_v36 = vpack.c.bf16 %v456_v63, %v449_v28  ;;  %v9655_v44 = vpack.c.bf16 %v1387_v29, %v1384_v46  ;;  %7934 = vmatprep.subr.bf16.mxu1 %v9650_v27  ;;  %v9670_v28 = vld [vmem:[#allocation5 + $0x138] sm:$0xff]  ;;  %v11418_v26 = vand.u32 4294901760, %v9668_v37  ;;  %v9708_v27 = vld [vmem:[#allocation5 + $0x150] sm:$0xff]  ;;  %v11737_v21 = vand.u32 4294901760, %v9668_v37 }
  0x8a   :  { %1176 = vmatmul.mubr.f32.vlgmr.msra.gmra.mrb[16].mxu0 %v9278_v5  ;;  %v9663_v58 = vpack.c.bf16 %v11408_v52, %v11409_v40  ;;  %341 = vmatmul.mubr.f32.gmra.mrb[14].mxu1 %v340_v48  ;;  %v9682_v48 = vpack.c.bf16 %v11410_v55, %v11411_v22  ;;  %v11417_v63 = vand.u32 4294901760, %v9670_v28  ;;  %v9688_v52 = vld [vmem:[#allocation5 + $0x140] sm:$0xff]  ;;  %v9690_v40 = vld [vmem:[#allocation5 + $0x148] sm:$0xff]  ;;  %v56_v55 = vld [vmem:[#allocation2 + $0x10] sm:$0xff] }
  0x8b   :  { %11702 = vst [vmem:[#allocation98_spill] sm:$0xff] %v9653_v36  ;;  %11703 = vst [vmem:[#allocation99_spill] sm:$0xff] %v9655_v44  ;;  %8066 = vmatprep.subr.bf16.mxu0 %v9655_v44  ;;  %7936 = vmatpush3.bf16.msra.mxu1 %v9653_v36  ;;  %v11426_v3 = vand.u32 4294901760, %v9688_v52  ;;  %v9714_v41 = vand.u32 4294901760, %v56_v55  ;;  %v59_v36 = vld [vmem:[#allocation2 + $0x28] sm:$0xff]  ;;  %v9834_v62 = vsub.f32 %v9668_v37, %v11737_v21  ;;  %v11745_v21 = vand.u32 4294901760, %v9670_v28 }
  0x8c   :  { %11704 = vst [vmem:[#allocation100_spill] sm:$0xff] %v9663_v58  ;;  %571 = vmatprep.mubr.f32.mxu1 %v9267_v30  ;;  %7970 = vmatprep.subr.bf16.mxu1 %v9104_v14  ;;  %11705 = vst [vmem:[#allocation101_spill] sm:$0xff] %v9682_v48  ;;  %v9702_v22 = vpack.c.bf16 %v11417_v63, %v11418_v26  ;;  %v9717_v63 = vsub.f32 %v9616_v6, %v1384_v46  ;;  %v9736_v6 = vld [vmem:[#allocation5 + $0x160] sm:$0xff]  ;;  %v68_v30 = vld [vmem:[#allocation2 + $0x70] sm:$0xff] }
  0x8d   :  { %8068 = vmatpush3.bf16.msra.mxu0 %v9655_v44  ;;  %1181 = vmatprep.mubr.f32.mxu0 %v9321_v61  ;;  %v9720_v26 = vsub.f32 %v9625_v53, %v1387_v29  ;;  %v9738_v29 = vld [vmem:[#allocation5 + $0x168] sm:$0xff]  ;;  %v62_v44 = vld [vmem:[#allocation2 + $0x40] sm:$0xff]  ;;  %v9857_v37 = vsub.f32 %v9670_v28, %v11745_v21 }
  0x8e   :  { %8070 = vmatprep.subr.bf16.mxu0 %v9663_v58  ;;  %573 = vmatmul.mubr.f32.vlgmr.msra.gmra.mrb[16].mxu1 %v9278_v5  ;;  %11706 = vst [vmem:[#allocation102_spill] sm:$0xff] %v9702_v22  ;;  %11707 = vst [vmem:[#allocation103_spill] sm:$0xff] %v9717_v63  ;;  %v11713_v46 = vld [vmem:[#allocation21_spill] sm:$0xff] }
  0x8f   :  { %1183 = vmatmul.mubr.f32.gmra.mrb[18].mxu0 %v9333_v38  ;;  %7972 = vmatpush3.bf16.msra.mxu1 %v9112_v18  ;;  %11708 = vst [vmem:[#allocation104_spill] sm:$0xff] %v9720_v26  ;;  %v11726_v32 = vand.u32 4294901760, %v9720_v26 }
  0x90   :  { %578 = vmatprep.mubr.f32.mxu1 %v9321_v61  ;;  %7974 = vmatprep.subr.bf16.mxu1 %v9116_v20  ;;  %v9768_v61 = vld [vmem:[#allocation5 + $0x178] sm:$0xff] }
  0x91   :  { %8072 = vmatpush3.bf16.msra.mxu0 %v9663_v58  ;;  %1188 = vmatprep.mubr.f32.mxu0 %v9359_v16  ;;  %v11709_v58 = vand.u32 4294901760, %v9690_v40 }
  0x92   :  { %8074 = vmatprep.subr.bf16.mxu0 %v9682_v48  ;;  %580 = vmatmul.mubr.f32.gmra.mrb[18].mxu1 %v9333_v38  ;;  %v11723_v38 = vand.u32 4294901760, %v9646_v51 }
  0x93   :  { %1190 = vmatmul.mubr.f32.gmra.mrb[20].mxu0 %v9377_v23  ;;  %7976 = vmatpush3.bf16.msra.mxu1 %v9136_v33  ;;  %v9730_v9 = vpack.c.bf16 %v11709_v58, %v11426_v3  ;;  %v9745_v58 = vsub.f32 %v56_v55, %v9714_v41  ;;  %v11716_v55 = vand.u32 4294901760, %v9708_v27 }
  0x94   :  { %585 = vmatprep.mubr.f32.mxu1 %v9359_v16  ;;  %7978 = vmatprep.subr.bf16.mxu1 %v9149_v45  ;;  %v9785_v53 = vsub.f32 %v9646_v51, %v11723_v38  ;;  %v9814_v38 = vand.u32 4294901760, %v68_v30  ;;  %v71_v51 = vld [vmem:[#allocation2 + $0x88] sm:$0xff] }
  0x95   :  { %8076 = vmatpush3.bf16.msra.mxu0 %v9682_v48  ;;  %1195 = vmatprep.mubr.f32.mxu0 %v9398_v13  ;;  %11710 = vst [vmem:[#allocation105_spill] sm:$0xff] %v9730_v9  ;;  %v9740_v48 = vand.u32 4294901760, %v59_v36  ;;  %11712 = vst [vmem:[#allocation107_spill] sm:$0xff] %v9745_v58 }
  0x96   :  { %8078 = vmatprep.subr.bf16.mxu0 %v9702_v22  ;;  %587 = vmatmul.mubr.f32.gmra.mrb[20].mxu1 %v9377_v23  ;;  %v11714_v23 = vand.u32 4294901760, %v9627_v25  ;;  %11733 = vst [vmem:[#allocation116_spill] sm:$0xff] %v9814_v38  ;;  %v11749_v21 = vand.u32 4294901760, %v9785_v53 }
  0x97   :  { %1197 = vmatmul.mubr.f32.gmra.mrb[22].mxu0 %v9422_v34  ;;  %11711 = vst [vmem:[#allocation106_spill] sm:$0xff] %v9740_v48  ;;  %7980 = vmatpush3.bf16.msra.mxu1 %v9157_v49  ;;  %v9775_v5 = vsub.f32 %v59_v36, %v9740_v48  ;;  %v11725_v36 = vand.u32 4294901760, %v9717_v63 }
  0x98   :  { %592 = vmatprep.mubr.f32.mxu1 %v9398_v13  ;;  %7982 = vmatprep.subr.bf16.mxu1 %v11713_v46  ;;  %v9754_v16 = vsub.f32 %v9627_v25, %v11714_v23  ;;  %v11717_v13 = vand.u32 4294901760, %v9710_v10  ;;  %v9770_v23 = vand.u32 4294901760, %v62_v44  ;;  %v65_v25 = vld [vmem:[#allocation2 + $0x58] sm:$0xff] }
  0x99   :  { %8080 = vmatpush3.bf16.msra.mxu0 %v9702_v22  ;;  %1202 = vmatprep.mubr.f32.mxu0 %v9448_v35  ;;  %v9766_v22 = vld [vmem:[#allocation5 + $0x170] sm:$0xff]  ;;  %11720 = vst [vmem:[#allocation111_spill] sm:$0xff] %v9775_v5  ;;  %v1548_v48 = vsub.f32 %v9717_v63, %v11725_v36  ;;  %v9801_v2 = vand.u32 4294901760, %v65_v25  ;;  %v11729_v36 = vand.u32 4294901760, %v9736_v6 }
  0x9a   :  { %11715 = vst [vmem:[#allocation108_spill] sm:$0xff] %v9754_v16  ;;  %8082 = vmatprep.subr.bf16.mxu0 %v9730_v9  ;;  %v9762_v3 = vpack.c.bf16 %v11717_v13, %v11716_v55  ;;  %11719 = vst [vmem:[#allocation110_spill] sm:$0xff] %v9770_v23  ;;  %594 = vmatmul.mubr.f32.gmra.mrb[22].mxu1 %v9422_v34  ;;  %v11721_v13 = vand.u32 4294901760, %v9635_v42 }
  0x9b   :  { %1204 = vmatmul.mubr.f32.gmra.mrb[24].mxu0 %v9462_v1  ;;  %7984 = vmatpush3.bf16.msra.mxu1 %v11724_v47  ;;  %11728 = vst [vmem:[#allocation113_spill] sm:$0xff] %v9801_v2  ;;  %v1549_v63 = vand.u32 4294901760, %v1548_v48  ;;  %v9848_v48 = vsub.f32 %v65_v25, %v9801_v2  ;;  %v77_v25 = vld [vmem:[#allocation2 + $0xb8] sm:$0xff] }
  0x9c   :  { %11718 = vst [vmem:[#allocation109_spill] sm:$0xff] %v9762_v3  ;;  %v9780_v55 = vsub.f32 %v9635_v42, %v11721_v13  ;;  %599 = vmatprep.mubr.f32.mxu1 %v9448_v35  ;;  %v1555_v42 = vsub.f32 %v9720_v26, %v11726_v32  ;;  %v11727_v13 = vld [vmem:[#allocation24_spill] sm:$0xff]  ;;  %1209 = vmatprep.mubr.f32.mxu0 %v9491_v56  ;;  %v11730_v32 = vand.u32 4294901760, %v9738_v29  ;;  %v11734_v26 = vand.u32 4294901760, %v9648_v11 }
  0x9d   :  { %7986 = vmatprep.subr.bf16.mxu1 %v11727_v13  ;;  %8084 = vmatpush3.bf16.msra.mxu0 %v9730_v9  ;;  %v9812_v9 = vsub.f32 %v62_v44, %v9770_v23  ;;  %v74_v44 = vld [vmem:[#allocation2 + $0xa0] sm:$0xff]  ;;  %11743 = vst [vmem:[#allocation118_spill] sm:$0xff] %v9848_v48 }
  0x9e   :  { %11722 = vst [vmem:[#allocation112_spill] sm:$0xff] %v9780_v55  ;;  %8086 = vmatprep.subr.bf16.mxu0 %v9762_v3  ;;  %v9809_v34 = vpack.c.bf16 %v11730_v32, %v11729_v36  ;;  %601 = vmatmul.mubr.f32.gmra.mrb[24].mxu1 %v9462_v1  ;;  %v9824_v36 = vsub.f32 %v9648_v11, %v11734_v26  ;;  %v11735_v32 = vld [vmem:[#allocation27_spill] sm:$0xff]  ;;  %v11736_v1 = vand.u32 4294901760, %v9745_v58  ;;  %v1556_v35 = vand.u32 4294901760, %v1555_v42 }
  0x9f   :  { %11732 = vst [vmem:[#allocation115_spill] sm:$0xff] %v9812_v9  ;;  %1211 = vmatmul.mubr.f32.gmra.mrb[26].mxu0 %v9499_v39  ;;  %7988 = vmatpush3.bf16.msra.mxu1 %v11735_v32  ;;  %v11739_v11 = vand.u32 4294901760, %v9766_v22  ;;  %v11740_v26 = vand.u32 4294901760, %v9768_v61  ;;  %v11742_v32 = vand.u32 4294901760, %v9754_v16  ;;  %v9850_v42 = vand.u32 4294901760, %v71_v51 }
  0xa0   :  { %11731 = vst [vmem:[#allocation114_spill] sm:$0xff] %v9809_v34  ;;  %606 = vmatprep.mubr.f32.mxu1 %v9491_v56  ;;  %v1467_v23 = vsub.f32 %v9745_v58, %v11736_v1  ;;  %7990 = vmatprep.subr.bf16.mxu1 %v11738_v57  ;;  %v11748_v2 = vand.u32 4294901760, %v9780_v55 }
  0xa1   :  { %8088 = vmatpush3.bf16.msra.mxu0 %v9762_v3  ;;  %v9842_v56 = vpack.c.bf16 %v11740_v26, %v11739_v11  ;;  %v1562_v1 = vsub.f32 %v9754_v16, %v11742_v32  ;;  %11744 = vst [vmem:[#allocation119_spill] sm:$0xff] %v9850_v42  ;;  %1216 = vmatprep.mubr.f32.mxu0 %v9536_v50  ;;  %v9863_v32 = vand.u32 4294901760, %v74_v44  ;;  %v11747_v3 = vand.u32 4294901760, %v9775_v5 }
  0xa2   :  { %8090 = vmatprep.subr.bf16.mxu0 %v9809_v34  ;;  %v9861_v26 = vsub.f32 %v68_v30, %v9814_v38  ;;  %608 = vmatmul.mubr.f32.gmra.mrb[26].mxu1 %v9499_v39  ;;  %v1569_v28 = vsub.f32 %v9780_v55, %v11748_v2  ;;  %v9876_v30 = vsub.f32 %v9785_v53, %v11749_v21  ;;  %v11750_v38 = vld [vmem:[#allocation30_spill] sm:$0xff]  ;;  %v1468_v39 = vand.u32 4294901760, %v1467_v23  ;;  %v11753_v55 = vld [vmem:[#allocation33_spill] sm:$0xff] }
  0xa3   :  { %11741 = vst [vmem:[#allocation117_spill] sm:$0xff] %v9842_v56  ;;  %11746 = vst [vmem:[#allocation120_spill] sm:$0xff] %v9863_v32  ;;  %1218 = vmatmul.mubr.f32.gmra.mrb[28].mxu0 %v9549_v59  ;;  %v1477_v58 = vsub.f32 %v9775_v5, %v11747_v3  ;;  %7992 = vmatpush3.bf16.msra.mxu1 %v11750_v38  ;;  %v9881_v16 = vpack.c.bf16 %v1556_v35, %v1549_v63  ;;  %v11752_v5 = vand.u32 4294901760, %v9688_v52 }
  0xa4   :  { %613 = vmatprep.mubr.f32.mxu1 %v9536_v50  ;;  %7994 = vmatprep.subr.bf16.mxu1 %v11753_v55  ;;  %v11754_v21 = vand.u32 4294901760, %v9690_v40  ;;  %v9898_v35 = vsub.f32 %v71_v51, %v9850_v42  ;;  %v9900_v63 = vand.u32 4294901760, %v77_v25  ;;  %v1563_v23 = vand.u32 4294901760, %v1562_v1  ;;  %v11758_v42 = vld [vmem:[#allocation34_spill] sm:$0xff] }
  0xa5   :  { %11751 = vst [vmem:[#allocation121_spill] sm:$0xff] %v9881_v16  ;;  %v9887_v2 = vsub.f32 %v9688_v52, %v11752_v5  ;;  %8092 = vmatpush3.bf16.msra.mxu0 %v9809_v34  ;;  %1223 = vmatprep.mubr.f32.mxu0 %v9581_v8  ;;  %v11756_v52 = vand.u32 4294901760, %v9812_v9  ;;  %v1478_v51 = vand.u32 4294901760, %v1477_v58  ;;  %v1570_v34 = vand.u32 4294901760, %v1569_v28 }
  0xa6   :  { %v9894_v11 = vsub.f32 %v9690_v40, %v11754_v21  ;;  %11755 = vst [vmem:[#allocation122_spill] sm:$0xff] %v9900_v63  ;;  %8094 = vmatprep.subr.bf16.mxu0 %v9842_v56  ;;  %v9910_v21 = vsub.f32 %v74_v44, %v9863_v32  ;;  %615 = vmatmul.mubr.f32.gmra.mrb[28].mxu1 %v9549_v59  ;;  %v11757_v50 = vand.u32 4294901760, %v9824_v36  ;;  %v11761_v1 = vand.u32 4294901760, %v9710_v10 }
  0xa7   :  { %v1487_v3 = vsub.f32 %v9812_v9, %v11756_v52  ;;  %1225 = vmatmul.mubr.f32.gmra.mrb[30].mxu0 %v9600_v60  ;;  %7996 = vmatpush3.bf16.msra.mxu1 %v11758_v42  ;;  %v11759_v52 = vand.u32 4294901760, %v9834_v62  ;;  %v11760_v9 = vand.u32 4294901760, %v9708_v27 }
  0xa8   :  { %v1583_v5 = vsub.f32 %v9824_v36, %v11757_v50  ;;  %620 = vmatprep.mubr.f32.mxu1 %v9581_v8  ;;  %v9931_v28 = vsub.f32 %v9710_v10, %v11761_v1  ;;  %7998 = vmatprep.subr.bf16.mxu1 %v9281_v7  ;;  %v11763_v10 = vand.u32 4294901760, %v9857_v37  ;;  %v11487_v59 = vand.u32 4294901760, %v9910_v21  ;;  %v11766_v8 = vld [vmem:[#allocation41_spill] sm:$0xff] }
  0xa9   :  { %v1590_v44 = vsub.f32 %v9834_v62, %v11759_v52  ;;  %v9926_v58 = vsub.f32 %v9708_v27, %v11760_v9  ;;  %8096 = vmatpush3.bf16.msra.mxu0 %v9842_v56  ;;  %v11762_v52 = vand.u32 4294901760, %v9848_v48  ;;  %v9941_v9 = vsub.f32 %v77_v25, %v9900_v63  ;;  %7293 = vmatprep.mubr.f32.mxu0 %v1468_v39 }
  0xaa   :  { %8098 = vmatprep.subr.bf16.mxu0 %v9881_v16  ;;  %v1597_v27 = vsub.f32 %v9857_v37, %v11763_v10  ;;  %v1488_v1 = vand.u32 4294901760, %v1487_v3  ;;  %v11764_v56 = vand.u32 4294901760, %v9861_v26  ;;  %622 = vmatmul.mubr.f32.gmra.mrb[30].mxu1 %v9600_v60  ;;  %v1577_v25 = vand.u32 4294901760, %v9876_v30 }
  0xab   :  { %v1497_v40 = vsub.f32 %v9848_v48, %v11762_v52  ;;  %v9952_v52 = vpack.c.bf16 %v1570_v34, %v1563_v23  ;;  %v1584_v39 = vand.u32 4294901760, %v1583_v5  ;;  %8000 = vmatpush3.bf16.msra.mxu1 %v9283_v0  ;;  %v11767_v48 = vand.u32 4294901760, %v11766_v8 }
  0xac   :  { %v1507_v50 = vsub.f32 %v9861_v26, %v11764_v56  ;;  %v1591_v10 = vand.u32 4294901760, %v1590_v44  ;;  %v11768_v3 = vand.u32 4294901760, %v9887_v2  ;;  %8034 = vmatprep.subr.bf16.mxu1 %v9104_v14  ;;  %7294 = vmatmul.mubr.f32.vlgmr.msra.gmra.mrb[32].mxu0 %v1478_v51  ;;  %v11769_v30 = vand.u32 4294901760, %v9898_v35 }
  0xad   :  { %11765 = vst [vmem:[#allocation123_spill] sm:$0xff] %v9952_v52  ;;  %927 = vmatprep.mubr.f32.mxu1 %v11767_v48  ;;  %v1498_v23 = vand.u32 4294901760, %v1497_v40  ;;  %v11486_v8 = vand.u32 4294901760, %v9941_v9  ;;  %8100 = vmatpush3.bf16.msra.mxu0 %v9881_v16  ;;  %v1598_v48 = vand.u32 4294901760, %v1597_v27  ;;  %v11770_v44 = vand.u32 4294901760, %v9894_v11  ;;  %v8906_v16 = vld [vmem:[#allocation2 + $0x68] sm:$0xff] }
  0xae   :  { %v1604_v63 = vsub.f32 %v9887_v2, %v11768_v3  ;;  %v1517_v5 = vsub.f32 %v9898_v35, %v11769_v30  ;;  %7296 = vmatprep.mubr.f32.mxu0 %v1488_v1  ;;  %v1508_v56 = vand.u32 4294901760, %v1507_v50  ;;  %v1527_v51 = vsub.f32 %v9910_v21, %v11487_v59  ;;  %8102 = vmatprep.subr.bf16.mxu0 %v9952_v52 }
  0xaf   :  { %v1611_v3 = vsub.f32 %v9894_v11, %v11770_v44  ;;  %v11771_v40 = vand.u32 4294901760, %v9295_v12  ;;  %v9978_v30 = vpack.c.bf16 %v1584_v39, %v1577_v25  ;;  %v11773_v34 = vand.u32 4294901760, %v9736_v6 }
  0xb0   :  { %v11774_v44 = vand.u32 4294901760, %v9738_v29  ;;  %v11775_v1 = vand.u32 4294901760, %v9339_v15  ;;  %v1605_v12 = vand.u32 4294901760, %v1604_v63  ;;  %v11776_v25 = vand.u32 4294901760, %v9926_v58  ;;  %7297 = vmatmul.mubr.f32.gmra.mrb[34].mxu0 %v1498_v23 }
  0xb1   :  { %931 = vmatmul.mubr.f32.vlgmr.msra.gmra.mrb[32].mxu1 %v11771_v40  ;;  %11772 = vst [vmem:[#allocation41_spill] sm:$0xff] %v9978_v30  ;;  %v9983_v27 = vsub.f32 %v9736_v6, %v11773_v34  ;;  %v1518_v6 = vand.u32 4294901760, %v1517_v5  ;;  %v1537_v34 = vsub.f32 %v9941_v9, %v11486_v8  ;;  %8104 = vmatpush3.bf16.msra.mxu0 %v9952_v52  ;;  %v1612_v40 = vand.u32 4294901760, %v1611_v3  ;;  %v11810_v8 = vld [vmem:[#allocation81_spill] sm:$0xff]  ;;  %v11855_v52 = vld [vmem:[#allocation71_spill] sm:$0xff] }
  0xb2   :  { %v9988_v50 = vsub.f32 %v9738_v29, %v11774_v44  ;;  %8036 = vmatpush3.bf16.msra.mxu1 %v9112_v18  ;;  %938 = vmatprep.mubr.f32.mxu1 %v11775_v1  ;;  %v1618_v39 = vsub.f32 %v9926_v58, %v11776_v25  ;;  %v10001_v29 = vpack.c.bf16 %v1598_v48, %v1591_v10  ;;  %v11778_v15 = vand.u32 4294901760, %v9931_v28 }
  0xb3   :  { %8038 = vmatprep.subr.bf16.mxu1 %v9116_v20  ;;  %7299 = vmatprep.mubr.f32.mxu0 %v1508_v56  ;;  %v1528_v63 = vand.u32 4294901760, %v1527_v51  ;;  %v11779_v1 = vand.u32 4294901760, %v9346_v19  ;;  %v1631_v23 = vand.u32 4294901760, %v9983_v27  ;;  %v11780_v25 = vand.u32 4294901760, %v9766_v22 }
  0xb4   :  { %11777 = vst [vmem:[#allocation124_spill] sm:$0xff] %v10001_v29  ;;  %v1625_v44 = vsub.f32 %v9931_v28, %v11778_v15  ;;  %8106 = vmatprep.subr.bf16.mxu0 %v9978_v30  ;;  %v1638_v5 = vand.u32 4294901760, %v9988_v50  ;;  %v11781_v48 = vand.u32 4294901760, %v9768_v61  ;;  %v11782_v19 = vand.u32 4294901760, %v9372_v24  ;;  %7300 = vmatmul.mubr.f32.gmra.mrb[36].mxu0 %v1518_v6 }
  0xb5   :  { %942 = vmatmul.mubr.f32.gmra.mrb[34].mxu1 %v11779_v1  ;;  %v10014_v10 = vsub.f32 %v9766_v22, %v11780_v25  ;;  %v1538_v56 = vand.u32 4294901760, %v1537_v34  ;;  %8108 = vmatpush3.bf16.msra.mxu0 %v9978_v30  ;;  %v10026_v51 = vpack.c.bf16 %v1612_v40, %v1605_v12  ;;  %v1619_v22 = vand.u32 4294901760, %v1618_v39 }
  0xb6   :  { %v10019_v3 = vsub.f32 %v9768_v61, %v11781_v48  ;;  %8040 = vmatpush3.bf16.msra.mxu1 %v9136_v33  ;;  %949 = vmatprep.mubr.f32.mxu1 %v11782_v19  ;;  %v1626_v15 = vand.u32 4294901760, %v1625_v44  ;;  %v11784_v1 = vand.u32 4294901760, %v9388_v43  ;;  %v1632_v61 = vsub.f32 %v9983_v27, %v1631_v23 }
  0xb7   :  { %8042 = vmatprep.subr.bf16.mxu1 %v9149_v45  ;;  %11783 = vst [vmem:[#allocation125_spill] sm:$0xff] %v10026_v51  ;;  %7302 = vmatprep.mubr.f32.mxu0 %v1528_v63  ;;  %v1639_v24 = vsub.f32 %v9988_v50, %v1638_v5  ;;  %v1645_v25 = vand.u32 4294901760, %v10014_v10  ;;  %v11785_v12 = vand.u32 4294901760, %v9411_v54  ;;  %v11787_v39 = vand.u32 4294901760, %v9436_v31 }
  0xb8   :  { %8110 = vmatprep.subr.bf16.mxu0 %v10001_v29  ;;  %v1652_v6 = vand.u32 4294901760, %v10019_v3  ;;  %7303 = vmatmul.mubr.f32.gmra.mrb[38].mxu0 %v1538_v56  ;;  %v10040_v43 = vpack.c.bf16 %v1626_v15, %v1619_v22  ;;  %v1633_v34 = vand.u32 4294901760, %v1632_v61  ;;  %v11788_v63 = vand.u32 4294901760, %v9460_v4  ;;  %v11791_v22 = vld [vmem:[#allocation27_spill] sm:$0xff]  ;;  %v11792_v15 = vld [vmem:[#allocation73_spill] sm:$0xff] }
  0xb9   :  { %953 = vmatmul.mubr.f32.gmra.mrb[36].mxu1 %v11784_v1  ;;  %8112 = vmatpush3.bf16.msra.mxu0 %v10001_v29  ;;  %v1640_v40 = vand.u32 4294901760, %v1639_v24  ;;  %v1646_v44 = vsub.f32 %v10014_v10, %v1645_v25  ;;  %v11789_v31 = vand.u32 4294901760, %v9472_v17  ;;  %v11793_v1 = vand.u32 4294901760, %v11792_v15  ;;  %v11794_v4 = vld [vmem:[#allocation103_spill] sm:$0xff]  ;;  %v11796_v24 = vld [vmem:[#allocation104_spill] sm:$0xff] }
  0xba   :  { %8044 = vmatpush3.bf16.msra.mxu1 %v9157_v49  ;;  %960 = vmatprep.mubr.f32.mxu1 %v11785_v12  ;;  %11786 = vst [vmem:[#allocation126_spill] sm:$0xff] %v10040_v43  ;;  %v1653_v54 = vsub.f32 %v10019_v3, %v1652_v6  ;;  %v11795_v61 = vand.u32 4294901760, %v11794_v4  ;;  %v11797_v12 = vand.u32 4294901760, %v11796_v24  ;;  %v11799_v17 = vld [vmem:[#allocation108_spill] sm:$0xff]  ;;  %v11811_v59 = vand.u32 4294901760, %v11810_v8 }
  0xbb   :  { %8046 = vmatprep.subr.bf16.mxu1 %v11713_v46  ;;  %7337 = vmatprep.mubr.f32.mxu0 %v9714_v41  ;;  %v10056_v48 = vpack.c.bf16 %v1640_v40, %v1633_v34  ;;  %v1647_v19 = vand.u32 4294901760, %v1646_v44  ;;  %v11800_v34 = vand.u32 4294901760, %v11799_v17  ;;  %v11801_v40 = vld [vmem:[#allocation112_spill] sm:$0xff] }
  0xbc   :  { %8114 = vmatprep.subr.bf16.mxu0 %v10026_v51  ;;  %v1654_v56 = vand.u32 4294901760, %v1653_v54  ;;  %v11802_v44 = vand.u32 4294901760, %v11801_v40 }
  0xbd   :  { %964 = vmatmul.mubr.f32.gmra.mrb[38].mxu1 %v11787_v39  ;;  %8116 = vmatpush3.bf16.msra.mxu0 %v10026_v51  ;;  %11790 = vst [vmem:[#allocation127_spill] sm:$0xff] %v10056_v48  ;;  %v10065_v39 = vpack.c.bf16 %v11797_v12, %v11795_v61  ;;  %v11808_v61 = vand.u32 4294901760, %v9824_v36 }
  0xbe   :  { %8048 = vmatpush3.bf16.msra.mxu1 %v11724_v47  ;;  %971 = vmatprep.mubr.f32.mxu1 %v11788_v63  ;;  %v10073_v54 = vpack.c.bf16 %v11802_v44, %v11800_v34  ;;  %v11804_v63 = vld [vmem:[#allocation74_spill] sm:$0xff]  ;;  %v10078_v15 = vpack.c.bf16 %v1654_v56, %v1647_v19  ;;  %v11812_v34 = vand.u32 4294901760, %v9834_v62  ;;  %v11813_v44 = vand.u32 4294901760, %v9857_v37 }
  0xbf   :  { %8050 = vmatprep.subr.bf16.mxu1 %v11727_v13  ;;  %8118 = vmatprep.subr.bf16.mxu0 %v10040_v43  ;;  %11798 = vst [vmem:[#allocation73_spill] sm:$0xff] %v10065_v39  ;;  %v11815_v19 = vand.u32 4294901760, %v9887_v2  ;;  %v11816_v56 = vand.u32 4294901760, %v9894_v11 }
  0xc0   :  { %11803 = vst [vmem:[#allocation103_spill] sm:$0xff] %v10073_v54  ;;  %11806 = vst [vmem:[#allocation104_spill] sm:$0xff] %v10078_v15 }
  0xc1   :  { %975 = vmatmul.mubr.f32.gmra.mrb[40].mxu1 %v11789_v31  ;;  %8120 = vmatpush3.bf16.msra.mxu0 %v10040_v43  ;;  %v11805_v31 = vand.u32 4294901760, %v11804_v63  ;;  %v10093_v63 = vpack.c.bf16 %v11813_v44, %v11812_v34  ;;  %v10110_v43 = vpack.c.bf16 %v1652_v6, %v1645_v25  ;;  %v11823_v34 = vld [vmem:[#allocation86_spill] sm:$0xff]  ;;  %v10130_v25 = vpack.c.bf16 %v11801_v40, %v11799_v17  ;;  %v11831_v6 = vld [vmem:[#allocation36_spill] sm:$0xff]  ;;  %v11836_v40 = vld [vmem:[#allocation45_spill] sm:$0xff] }
  0xc2   :  { %8052 = vmatpush3.bf16.msra.mxu1 %v11791_v22  ;;  %982 = vmatprep.mubr.f32.mxu1 %v11793_v1  ;;  %v11807_v1 = vand.u32 4294901760, %v9785_v53  ;;  %v11824_v44 = vand.u32 4294901760, %v11823_v34  ;;  %v10142_v17 = vpack.c.bf16 %v9824_v36, %v9785_v53  ;;  %v11837_v34 = vld [vmem:[#allocation113_spill] sm:$0xff]  ;;  %v10154_v53 = vpack.c.bf16 %v9857_v37, %v9834_v62  ;;  %v11841_v36 = vld [vmem:[#allocation51_spill] sm:$0xff]  ;;  %v11845_v37 = vld [vmem:[#allocation56_spill] sm:$0xff] }
  0xc3   :  { %8054 = vmatprep.subr.bf16.mxu1 %v11738_v57  ;;  %8122 = vmatprep.subr.bf16.mxu0 %v10056_v48  ;;  %11814 = vst [vmem:[#allocation112_spill] sm:$0xff] %v10093_v63  ;;  %11822 = vst [vmem:[#allocation129_spill] sm:$0xff] %v10110_v43  ;;  %v10166_v62 = vpack.c.bf16 %v9894_v11, %v9887_v2  ;;  %v11848_v2 = vld [vmem:[#allocation59_spill] sm:$0xff] }
  0xc4   :  { %v10084_v12 = vpack.c.bf16 %v11808_v61, %v11807_v1  ;;  %v11818_v1 = vand.u32 4294901760, %v9926_v58  ;;  %v11819_v61 = vand.u32 4294901760, %v9931_v28  ;;  %11840 = vst [vmem:[#allocation36_spill] sm:$0xff] %v10154_v53 }
  0xc5   :  { %986 = vmatmul.mubr.f32.gmra.mrb[42].mxu1 %v11805_v31  ;;  %v10099_v31 = vpack.c.bf16 %v11816_v56, %v11815_v19  ;;  %8124 = vmatpush3.bf16.msra.mxu0 %v10056_v48  ;;  %v10118_v19 = vpack.c.bf16 %v11796_v24, %v11794_v4  ;;  %v11826_v56 = vld [vmem:[#allocation91_spill] sm:$0xff]  ;;  %v11832_v4 = vld [vmem:[#allocation106_spill] sm:$0xff] }
  0xc6   :  { %11809 = vst [vmem:[#allocation108_spill] sm:$0xff] %v10084_v12  ;;  %8056 = vmatpush3.bf16.msra.mxu1 %v11750_v38  ;;  %993 = vmatprep.mubr.f32.mxu1 %v11811_v59  ;;  %v10106_v8 = vpack.c.bf16 %v11819_v61, %v11818_v1  ;;  %v10108_v59 = vpack.c.bf16 %v1638_v5, %v1631_v23  ;;  %v11827_v1 = vand.u32 4294901760, %v11826_v56  ;;  %v11828_v23 = vld [vmem:[#allocation94_spill] sm:$0xff]  ;;  %11830 = vst [vmem:[#allocation91_spill] sm:$0xff] %v10130_v25  ;;  %v11839_v56 = vld [vmem:[#allocation47_spill] sm:$0xff] }
  0xc7   :  { %11817 = vst [vmem:[#allocation74_spill] sm:$0xff] %v10099_v31  ;;  %8058 = vmatprep.subr.bf16.mxu1 %v11753_v55  ;;  %8126 = vmatprep.subr.bf16.mxu0 %v10078_v15  ;;  %11825 = vst [vmem:[#allocation86_spill] sm:$0xff] %v10118_v19  ;;  %v11829_v5 = vand.u32 4294901760, %v11828_v23  ;;  %v11833_v24 = vld [vmem:[#allocation110_spill] sm:$0xff]  ;;  %v8903_v48 = vld [vmem:[#allocation2 + $0x30] sm:$0xff] }
  0xc8   :  { %11820 = vst [vmem:[#allocation81_spill] sm:$0xff] %v10106_v8  ;;  %11821 = vst [vmem:[#allocation128_spill] sm:$0xff] %v10108_v59  ;;  %v11834_v61 = vld [vmem:[#allocation38_spill] sm:$0xff] }
  0xc9   :  { %997 = vmatmul.mubr.f32.gmra.mrb[44].mxu1 %v11824_v44  ;;  %8128 = vmatpush3.bf16.msra.mxu0 %v10078_v15  ;;  %11835 = vst [vmem:[#allocation94_spill] sm:$0xff] %v10142_v17  ;;  %v11838_v44 = vld [vmem:[#allocation116_spill] sm:$0xff]  ;;  %11844 = vst [vmem:[#allocation106_spill] sm:$0xff] %v10166_v62  ;;  %v11850_v15 = vld [vmem:[#allocation63_spill] sm:$0xff] }
  0xca   :  { %8060 = vmatpush3.bf16.msra.mxu1 %v11758_v42  ;;  %1004 = vmatprep.mubr.f32.mxu1 %v11827_v1  ;;  %v8898_v1 = vld [vmem:[#allocation2 + $0x8] sm:$0xff] }
  0xcb   :  { %8062 = vmatprep.subr.bf16.mxu1 %v9281_v7  ;;  %8130 = vmatprep.subr.bf16.mxu0 %v10118_v19  ;;  %v2326_v23 = vmul.f32 %v8898_v1, %v8898_v1 }
  0xcc   :  { %7338 = vmatmul.mubr.f32.vlgmr.msra.gmra.mrb[32].mxu0 %v11832_v4 }
  0xcd   :  { %1008 = vmatmul.mubr.f32.gmra.mrb[46].mxu1 %v11829_v5  ;;  %8132 = vmatpush3.bf16.msra.mxu0 %v10118_v19  ;;  %v11842_v5 = vld [vmem:[#allocation119_spill] sm:$0xff] }
  0xce   :  { %8064 = vmatpush3.bf16.msra.mxu1 %v9283_v0  ;;  %1327 = vmatprep.mubr.f32.mxu1 %v11831_v6  ;;  %v8899_v6 = vld [vmem:[#allocation2] sm:$0xff] }
  0xcf   :  { %8258 = vmatprep.subr.bf16.mxu1 %v9104_v14  ;;  %7340 = vmatprep.mubr.f32.mxu0 %v11833_v24 }
  0xd0   :  { %8134 = vmatprep.subr.bf16.mxu0 %v10130_v25  ;;  %7341 = vmatmul.mubr.f32.gmra.mrb[34].mxu0 %v11837_v34 }
  0xd1   :  { %1329 = vmatmul.mubr.f32.vlgmr.msra.gmra.mrb[48].mxu1 %v11834_v61  ;;  %8136 = vmatpush3.bf16.msra.mxu0 %v10130_v25  ;;  %v2325_v61 = vmul.f32 %v8899_v6, %v8899_v6  ;;  %v11847_v6 = vld [vmem:[#allocation107_spill] sm:$0xff] }
  0xd2   :  { %8260 = vmatpush3.bf16.msra.mxu1 %v9112_v18  ;;  %1334 = vmatprep.mubr.f32.mxu1 %v11836_v40  ;;  %v11843_v40 = vld [vmem:[#allocation53_spill] sm:$0xff] }
  0xd3   :  { %8262 = vmatprep.subr.bf16.mxu1 %v9116_v20  ;;  %7343 = vmatprep.mubr.f32.mxu0 %v11838_v44  ;;  %v10176_v11 = vand.u32 4294901760, %v2325_v61 }
  0xd4   :  { %8138 = vmatprep.subr.bf16.mxu0 %v10142_v17  ;;  %7344 = vmatmul.mubr.f32.gmra.mrb[36].mxu0 %v11842_v5  ;;  %v11883_v5 = vld [vmem:[#allocation78_spill] sm:$0xff] }
  0xd5   :  { %1336 = vmatmul.mubr.f32.gmra.mrb[50].mxu1 %v11839_v56  ;;  %8140 = vmatpush3.bf16.msra.mxu0 %v10142_v17  ;;  %v10170_v56 = vand.u32 4294901760, %v2326_v23  ;;  %v11846_v17 = vld [vmem:[#allocation122_spill] sm:$0xff] }
  0xd6   :  { %8264 = vmatpush3.bf16.msra.mxu1 %v9136_v33  ;;  %1341 = vmatprep.mubr.f32.mxu1 %v11841_v36  ;;  %v8900_v36 = vld [vmem:[#allocation2 + $0x20] sm:$0xff] }
  0xd7   :  { %8266 = vmatprep.subr.bf16.mxu1 %v9149_v45  ;;  %7346 = vmatprep.mubr.f32.mxu0 %v9863_v32  ;;  %v2329_v1 = vmul.f32 %v8900_v36, %v8900_v36  ;;  %v8902_v36 = vld [vmem:[#allocation2 + $0x38] sm:$0xff]  ;;  %v11888_v45 = vld [vmem:[#allocation118_spill] sm:$0xff]  ;;  %v11892_v33 = vld [vmem:[#allocation89_spill] sm:$0xff] }
  0xd8   :  { %8142 = vmatprep.subr.bf16.mxu0 %v10154_v53  ;;  %7347 = vmatmul.mubr.f32.gmra.mrb[38].mxu0 %v11846_v17  ;;  %v2332_v19 = vmul.f32 %v8902_v36, %v8902_v36  ;;  %v11851_v36 = vld [vmem:[#allocation65_spill] sm:$0xff] }
  0xd9   :  { %1343 = vmatmul.mubr.f32.gmra.mrb[52].mxu1 %v11843_v40  ;;  %8144 = vmatpush3.bf16.msra.mxu0 %v10154_v53  ;;  %v8901_v40 = vld [vmem:[#allocation2 + $0x18] sm:$0xff]  ;;  %v10187_v53 = vsub.f32 %v2326_v23, %v10170_v56  ;;  %v10202_v23 = vsub.f32 %v2325_v61, %v10176_v11  ;;  %v11876_v17 = vld [vmem:[#allocation49_spill] sm:$0xff] }
  0xda   :  { %8268 = vmatpush3.bf16.msra.mxu1 %v9157_v49  ;;  %1348 = vmatprep.mubr.f32.mxu1 %v11845_v37  ;;  %v2328_v25 = vmul.f32 %v8901_v40, %v8901_v40  ;;  %v10182_v37 = vpack.c.bf16 %v9931_v28, %v9926_v58  ;;  %v10189_v40 = vand.u32 4294901760, %v2329_v1  ;;  %v2331_v58 = vmul.f32 %v8903_v48, %v8903_v48  ;;  %v8904_v28 = vld [vmem:[#allocation2 + $0x50] sm:$0xff] }
  0xdb   :  { %8270 = vmatprep.subr.bf16.mxu1 %v11713_v46  ;;  %7381 = vmatprep.mubr.f32.mxu0 %v11847_v6  ;;  %v2335_v51 = vmul.f32 %v8904_v28, %v8904_v28  ;;  %v10204_v29 = vand.u32 4294901760, %v2332_v19  ;;  %v11877_v46 = vld [vmem:[#allocation111_spill] sm:$0xff] }
  0xdc   :  { %8146 = vmatprep.subr.bf16.mxu0 %v10166_v62  ;;  %11849 = vst [vmem:[#allocation110_spill] sm:$0xff] %v10182_v37  ;;  %v10210_v28 = vsub.f32 %v2329_v1, %v10189_v40  ;;  %v11863_v1 = vld [vmem:[#allocation82_spill] sm:$0xff]  ;;  %v11880_v49 = vld [vmem:[#allocation115_spill] sm:$0xff] }
  0xdd   :  { %1350 = vmatmul.mubr.f32.gmra.mrb[54].mxu1 %v11848_v2  ;;  %8148 = vmatpush3.bf16.msra.mxu0 %v10166_v62  ;;  %v10193_v2 = vand.u32 4294901760, %v2328_v25  ;;  %v11853_v62 = vld [vmem:[#allocation69_spill] sm:$0xff]  ;;  %v10219_v61 = vand.u32 4294901760, %v2335_v51  ;;  %v10229_v48 = vsub.f32 %v2332_v19, %v10204_v29 }
  0xde   :  { %8272 = vmatpush3.bf16.msra.mxu1 %v11724_v47  ;;  %1355 = vmatprep.mubr.f32.mxu1 %v11850_v15  ;;  %v10199_v15 = vpack.c.bf16 %v9988_v50, %v9983_v27  ;;  %v10217_v50 = vand.u32 4294901760, %v2331_v58  ;;  %v8909_v47 = vld [vmem:[#allocation2 + $0x78] sm:$0xff] }
  0xdf   :  { %8274 = vmatprep.subr.bf16.mxu1 %v11727_v13  ;;  %8150 = vmatprep.subr.bf16.mxu0 %v10182_v37  ;;  %v10215_v27 = vsub.f32 %v2328_v25, %v10193_v2  ;;  %11857 = vst [vmem:[#allocation51_spill] sm:$0xff] %v10229_v48  ;;  %v11858_v25 = vld [vmem:[#allocation79_spill] sm:$0xff]  ;;  %v10244_v19 = vsub.f32 %v2335_v51, %v10219_v61 }
  0xe0   :  { %11852 = vst [vmem:[#allocation38_spill] sm:$0xff] %v10199_v15 }
  0xe1   :  { %1357 = vmatmul.mubr.f32.gmra.mrb[56].mxu1 %v11851_v36  ;;  %8152 = vmatpush3.bf16.msra.mxu0 %v10182_v37  ;;  %11854 = vst [vmem:[#allocation45_spill] sm:$0xff] %v10215_v27  ;;  %v8905_v36 = vld [vmem:[#allocation2 + $0x48] sm:$0xff]  ;;  %v11859_v37 = vand.u32 4294901760, %v10187_v53  ;;  %11861 = vst [vmem:[#allocation56_spill] sm:$0xff] %v10244_v19 }
  0xe2   :  { %8276 = vmatpush3.bf16.msra.mxu1 %v11791_v22  ;;  %1362 = vmatprep.mubr.f32.mxu1 %v11853_v62  ;;  %v2334_v30 = vmul.f32 %v8905_v36, %v8905_v36  ;;  %v10225_v62 = vpack.c.bf16 %v10019_v3, %v10014_v10  ;;  %v10241_v3 = vsub.f32 %v2331_v58, %v10217_v50  ;;  %v11865_v58 = vld [vmem:[#allocation88_spill] sm:$0xff]  ;;  %v8908_v22 = vld [vmem:[#allocation2 + $0x80] sm:$0xff] }
  0xe3   :  { %8278 = vmatprep.subr.bf16.mxu1 %v11738_v57  ;;  %8154 = vmatprep.subr.bf16.mxu0 %v10199_v15  ;;  %v2448_v36 = vsub.f32 %v10187_v53, %v11859_v37  ;;  %v2338_v57 = vmul.f32 %v8906_v16, %v8906_v16  ;;  %v11864_v16 = vand.u32 4294901760, %v10202_v23  ;;  %v2341_v13 = vmul.f32 %v8908_v22, %v8908_v22 }
  0xe4   :  { %11856 = vst [vmem:[#allocation47_spill] sm:$0xff] %v10225_v62  ;;  %11860 = vst [vmem:[#allocation53_spill] sm:$0xff] %v10241_v3  ;;  %v11871_v22 = vand.u32 4294901760, %v10229_v48 }
  0xe5   :  { %1364 = vmatmul.mubr.f32.gmra.mrb[58].mxu1 %v11855_v52  ;;  %8156 = vmatpush3.bf16.msra.mxu0 %v10199_v15  ;;  %v2454_v37 = vsub.f32 %v10202_v23, %v11864_v16  ;;  %v8907_v15 = vld [vmem:[#allocation2 + $0x60] sm:$0xff]  ;;  %v2449_v51 = vand.u32 4294901760, %v2448_v36  ;;  %v11868_v16 = vand.u32 4294901760, %v10215_v27  ;;  %v10282_v52 = vand.u32 4294901760, %v2341_v13 }
  0xe6   :  { %8280 = vmatpush3.bf16.msra.mxu1 %v11750_v38  ;;  %1369 = vmatprep.mubr.f32.mxu1 %v11858_v25  ;;  %v10246_v25 = vand.u32 4294901760, %v2334_v30  ;;  %v2337_v10 = vmul.f32 %v8907_v15, %v8907_v15 }
  0xe7   :  { %8282 = vmatprep.subr.bf16.mxu1 %v11753_v55  ;;  %8158 = vmatprep.subr.bf16.mxu0 %v10225_v62  ;;  %v11866_v55 = vand.u32 4294901760, %v10210_v28  ;;  %v2469_v15 = vsub.f32 %v10215_v27, %v11868_v16  ;;  %v2340_v16 = vmul.f32 %v8909_v47, %v8909_v47  ;;  %11874 = vst [vmem:[#allocation71_spill] sm:$0xff] %v10282_v52  ;;  %v11878_v47 = vand.u32 4294901760, %v10241_v3 }
  0xe8   :  { %11862 = vst [vmem:[#allocation107_spill] sm:$0xff] %v10246_v25 }
  0xe9   :  { %1371 = vmatmul.mubr.f32.gmra.mrb[60].mxu1 %v11863_v1  ;;  %v2463_v38 = vsub.f32 %v10210_v28, %v11866_v55  ;;  %v10259_v1 = vand.u32 4294901760, %v2338_v57  ;;  %8160 = vmatpush3.bf16.msra.mxu0 %v10225_v62  ;;  %v2455_v55 = vand.u32 4294901760, %v2454_v37  ;;  %v2478_v62 = vsub.f32 %v10229_v48, %v11871_v22 }
  0xea   :  { %8284 = vmatpush3.bf16.msra.mxu1 %v11758_v42  ;;  %1376 = vmatprep.mubr.f32.mxu1 %v11865_v58  ;;  %v10269_v58 = vsub.f32 %v2334_v30, %v10246_v25  ;;  %v11870_v42 = vld [vmem:[#allocation99_spill] sm:$0xff]  ;;  %v2470_v22 = vand.u32 4294901760, %v2469_v15  ;;  %v10301_v15 = vand.u32 4294901760, %v2340_v16 }
  0xeb   :  { %11867 = vst [vmem:[#allocation59_spill] sm:$0xff] %v10259_v1  ;;  %8286 = vmatprep.subr.bf16.mxu1 %v9281_v7  ;;  %8162 = vmatprep.subr.bf16.mxu0 %v11870_v42  ;;  %v10276_v7 = vand.u32 4294901760, %v2337_v10  ;;  %v2464_v36 = vand.u32 4294901760, %v2463_v38  ;;  %v10280_v30 = vsub.f32 %v2338_v57, %v10259_v1  ;;  %v11879_v38 = vand.u32 4294901760, %v10244_v19 }
  0xec   :  { %11869 = vst [vmem:[#allocation63_spill] sm:$0xff] %v10269_v58  ;;  %7382 = vmatmul.mubr.f32.vlgmr.msra.gmra.mrb[32].mxu0 %v11877_v46  ;;  %11882 = vst [vmem:[#allocation79_spill] sm:$0xff] %v10301_v15 }
  0xed   :  { %1378 = vmatmul.mubr.f32.gmra.mrb[62].mxu1 %v9600_v60  ;;  %11872 = vst [vmem:[#allocation65_spill] sm:$0xff] %v10276_v7  ;;  %11873 = vst [vmem:[#allocation69_spill] sm:$0xff] %v10280_v30  ;;  %v11875_v60 = vld [vmem:[#allocation75_spill] sm:$0xff]  ;;  %8164 = vmatpush3.bf16.msra.mxu0 %v11870_v42  ;;  %v2493_v57 = vsub.f32 %v10244_v19, %v11879_v38  ;;  %v10299_v32 = vsub.f32 %v2337_v10, %v10276_v7  ;;  %v11886_v19 = vld [vmem:[#allocation84_spill] sm:$0xff] }
  0xee   :  { %8288 = vmatpush3.bf16.msra.mxu1 %v9283_v0  ;;  %2450 = vmatprep.mubr.f32.mxu1 %v2449_v51  ;;  %v2344_v37 = vmul.f32 %v11875_v60, %v11875_v60  ;;  %v2484_v51 = vsub.f32 %v10241_v3, %v11878_v47  ;;  %v11881_v60 = vld [vmem:[#allocation100_spill] sm:$0xff]  ;;  %v2343_v47 = vmul.f32 %v11883_v5, %v11883_v5  ;;  %v11887_v10 = vld [vmem:[#allocation54_spill] sm:$0xff] }
  0xef   :  { %8290 = vmatprep.subr.bf16.mxu1 %v11876_v17  ;;  %7384 = vmatprep.mubr.f32.mxu0 %v11880_v49  ;;  %v2479_v17 = vand.u32 4294901760, %v2478_v62  ;;  %v11884_v3 = vld [vmem:[#allocation48_spill] sm:$0xff]  ;;  %v10308_v0 = vsub.f32 %v2341_v13, %v10282_v52  ;;  %v2347_v62 = vmul.f32 %v11886_v19, %v11886_v19  ;;  %v2494_v48 = vand.u32 4294901760, %v2493_v57  ;;  %v11890_v13 = vld [vmem:[#allocation101_spill] sm:$0xff]  ;;  %v11893_v57 = vld [vmem:[#allocation55_spill] sm:$0xff] }
  0xf0   :  { %8166 = vmatprep.subr.bf16.mxu0 %v11881_v60  ;;  %7385 = vmatmul.mubr.f32.gmra.mrb[34].mxu0 %v11888_v45  ;;  %v2485_v5 = vand.u32 4294901760, %v2484_v51  ;;  %v10324_v19 = vsub.f32 %v2340_v16, %v10301_v15  ;;  %v2346_v51 = vmul.f32 %v11892_v33, %v11892_v33  ;;  %v11897_v16 = vld [vmem:[#allocation60_spill] sm:$0xff] }
  0xf1   :  { %2456 = vmatmul.mubr.f32.vlgmr.msra.gmra.mrb[64].mxu1 %v2455_v55  ;;  %v10310_v55 = vand.u32 4294901760, %v2344_v37  ;;  %8168 = vmatpush3.bf16.msra.mxu0 %v11881_v60  ;;  %v10338_v38 = vand.u32 4294901760, %v2347_v62 }
  0xf2   :  { %8292 = vmatpush3.bf16.msra.mxu1 %v11884_v3  ;;  %2465 = vmatprep.mubr.f32.mxu1 %v2464_v36  ;;  %v11889_v3 = vand.u32 4294901760, %v10269_v58 }
  0xf3   :  { %11885 = vst [vmem:[#allocation82_spill] sm:$0xff] %v10310_v55  ;;  %8294 = vmatprep.subr.bf16.mxu1 %v11887_v10  ;;  %7387 = vmatprep.mubr.f32.mxu0 %v9861_v26  ;;  %v10326_v10 = vand.u32 4294901760, %v2343_v47  ;;  %v10336_v27 = vsub.f32 %v2344_v37, %v10310_v55  ;;  %11896 = vst [vmem:[#allocation75_spill] sm:$0xff] %v10338_v38  ;;  %v11553_v37 = vand.u32 4294901760, %v10324_v19 }
  0xf4   :  { %v2499_v36 = vsub.f32 %v10269_v58, %v11889_v3  ;;  %8170 = vmatprep.subr.bf16.mxu0 %v11890_v13  ;;  %v11894_v3 = vand.u32 4294901760, %v10280_v30  ;;  %7388 = vmatmul.mubr.f32.gmra.mrb[36].mxu0 %v9898_v35  ;;  %v10360_v34 = vsub.f32 %v2347_v62, %v10338_v38  ;;  %v11910_v62 = vld [vmem:[#allocation109_spill] sm:$0xff] }
  0xf5   :  { %2471 = vmatmul.mubr.f32.gmra.mrb[66].mxu1 %v2470_v22  ;;  %11891 = vst [vmem:[#allocation88_spill] sm:$0xff] %v10326_v10  ;;  %11895 = vst [vmem:[#allocation99_spill] sm:$0xff] %v10336_v27  ;;  %8172 = vmatpush3.bf16.msra.mxu0 %v11890_v13  ;;  %v10350_v22 = vsub.f32 %v2343_v47, %v10326_v10  ;;  %v11903_v13 = vand.u32 4294901760, %v10308_v0  ;;  %v11905_v47 = vand.u32 4294901760, %v11847_v6  ;;  %v11908_v6 = vand.u32 4294901760, %v10336_v27 }
  0xf6   :  { %8296 = vmatpush3.bf16.msra.mxu1 %v11893_v57  ;;  %2480 = vmatprep.mubr.f32.mxu1 %v2479_v17  ;;  %v2508_v58 = vsub.f32 %v10280_v30, %v11894_v3  ;;  %v2500_v33 = vand.u32 4294901760, %v2499_v36  ;;  %v11898_v17 = vld [vmem:[#allocation102_spill] sm:$0xff]  ;;  %v11899_v57 = vand.u32 4294901760, %v10299_v32  ;;  %v11902_v30 = vld [vmem:[#allocation61_spill] sm:$0xff] }
  0xf7   :  { %8298 = vmatprep.subr.bf16.mxu1 %v11897_v16  ;;  %7390 = vmatprep.mubr.f32.mxu0 %v9910_v21  ;;  %11900 = vst [vmem:[#allocation49_spill] sm:$0xff] %v10350_v22  ;;  %v10352_v16 = vand.u32 4294901760, %v2346_v51 }
  0xf8   :  { %8174 = vmatprep.subr.bf16.mxu0 %v11898_v17  ;;  %v2514_v3 = vsub.f32 %v10299_v32, %v11899_v57  ;;  %v2509_v36 = vand.u32 4294901760, %v2508_v58  ;;  %v11904_v57 = vld [vmem:[#allocation66_spill] sm:$0xff]  ;;  %7391 = vmatmul.mubr.f32.gmra.mrb[38].mxu0 %v9941_v9  ;;  %v11906_v58 = vld [vmem:[#allocation105_spill] sm:$0xff] }
  0xf9   :  { %2486 = vmatmul.mubr.f32.gmra.mrb[68].mxu1 %v2485_v5  ;;  %11901 = vst [vmem:[#allocation111_spill] sm:$0xff] %v10352_v16  ;;  %v2523_v5 = vsub.f32 %v10308_v0, %v11903_v13  ;;  %8176 = vmatpush3.bf16.msra.mxu0 %v11898_v17  ;;  %v10373_v13 = vsub.f32 %v2346_v51, %v10352_v16  ;;  %v11911_v51 = vand.u32 4294901760, %v10350_v22 }
  0xfa   :  { %8300 = vmatpush3.bf16.msra.mxu1 %v11902_v30  ;;  %2495 = vmatprep.mubr.f32.mxu1 %v2494_v48  ;;  %v2515_v48 = vand.u32 4294901760, %v2514_v3  ;;  %v2529_v30 = vsub.f32 %v10324_v19, %v11553_v37  ;;  %v11559_v3 = vand.u32 4294901760, %v10360_v34 }
  0xfb   :  { %8302 = vmatprep.subr.bf16.mxu1 %v11904_v57  ;;  %7425 = vmatprep.mubr.f32.mxu0 %v11905_v47  ;;  %v11907_v57 = vld [vmem:[#allocation67_spill] sm:$0xff]  ;;  %v2524_v44 = vand.u32 4294901760, %v2523_v5  ;;  %v11909_v47 = vld [vmem:[#allocation72_spill] sm:$0xff] }
  0xfc   :  { %8178 = vmatprep.subr.bf16.mxu0 %v11906_v58  ;;  %v2530_v37 = vand.u32 4294901760, %v2529_v30  ;;  %v11912_v5 = vld [vmem:[#allocation76_spill] sm:$0xff]  ;;  %v11914_v30 = vld [vmem:[#allocation114_spill] sm:$0xff] }
  0xfd   :  { %2501 = vmatmul.mubr.f32.gmra.mrb[70].mxu1 %v2500_v33  ;;  %v2538_v33 = vsub.f32 %v10336_v27, %v11908_v6  ;;  %8180 = vmatpush3.bf16.msra.mxu0 %v11906_v58  ;;  %v11913_v27 = vld [vmem:[#allocation83_spill] sm:$0xff] }
  0xfe   :  { %8304 = vmatpush3.bf16.msra.mxu1 %v11907_v57  ;;  %2510 = vmatprep.mubr.f32.mxu1 %v2509_v36  ;;  %v2544_v57 = vsub.f32 %v10350_v22, %v11911_v51  ;;  %v11558_v36 = vand.u32 4294901760, %v10373_v13  ;;  %v11915_v22 = vld [vmem:[#allocation85_spill] sm:$0xff] }
  0xff   :  { %8306 = vmatprep.subr.bf16.mxu1 %v11909_v47  ;;  %8182 = vmatprep.subr.bf16.mxu0 %v11910_v62  ;;  %v2539_v6 = vand.u32 4294901760, %v2538_v33  ;;  %v2553_v47 = vsub.f32 %v10360_v34, %v11559_v3  ;;  %v11916_v33 = vld [vmem:[#allocation92_spill] sm:$0xff]  ;;  %v11954_v3 = vld [vmem:[#allocation18_spill] sm:$0xff] }
 0x100   :  { %v2559_v51 = vsub.f32 %v10373_v13, %v11558_v36 }
 0x101   :  { %2516 = vmatmul.mubr.f32.gmra.mrb[72].mxu1 %v2515_v48  ;;  %8184 = vmatpush3.bf16.msra.mxu0 %v11910_v62  ;;  %v2545_v48 = vand.u32 4294901760, %v2544_v57  ;;  %v11919_v57 = vld [vmem:[#allocation97_spill] sm:$0xff] }
 0x102   :  { %8308 = vmatpush3.bf16.msra.mxu1 %v11912_v5  ;;  %2525 = vmatprep.mubr.f32.mxu1 %v2524_v44  ;;  %v2554_v44 = vand.u32 4294901760, %v2553_v47  ;;  %v11917_v5 = vld [vmem:[#allocation117_spill] sm:$0xff]  ;;  %v11922_v47 = vand.u32 4294901760, %v11877_v46  ;;  %v11927_v46 = vand.u32 4294901760, %v9861_v26  ;;  %v11932_v26 = vld [vmem:[#allocation20_spill] sm:$0xff] }
 0x103   :  { %8310 = vmatprep.subr.bf16.mxu1 %v11913_v27  ;;  %8186 = vmatprep.subr.bf16.mxu0 %v11914_v30  ;;  %v2560_v27 = vand.u32 4294901760, %v2559_v51  ;;  %v11924_v51 = vld [vmem:[#allocation13_spill] sm:$0xff] }
 0x105   :  { %2531 = vmatmul.mubr.f32.gmra.mrb[74].mxu1 %v2530_v37  ;;  %8188 = vmatpush3.bf16.msra.mxu0 %v11914_v30  ;;  %v11918_v37 = vld [vmem:[#allocation93_spill] sm:$0xff] }
 0x106   :  { %8312 = vmatpush3.bf16.msra.mxu1 %v11915_v22  ;;  %2540 = vmatprep.mubr.f32.mxu1 %v2539_v6  ;;  %v11920_v22 = vld [vmem:[#allocation98_spill] sm:$0xff]  ;;  %v11921_v6 = vld [vmem:[#allocation12_spill] sm:$0xff] }
 0x107   :  { %8314 = vmatprep.subr.bf16.mxu1 %v11916_v33  ;;  %8190 = vmatprep.subr.bf16.mxu0 %v11917_v5  ;;  %v11926_v33 = vand.u32 4294901760, %v11888_v45  ;;  %v11931_v45 = vand.u32 4294901760, %v9910_v21  ;;  %v11936_v21 = vld [vmem:[#allocation26_spill] sm:$0xff] }
 0x109   :  { %2546 = vmatmul.mubr.f32.gmra.mrb[76].mxu1 %v2545_v48  ;;  %8192 = vmatpush3.bf16.msra.mxu0 %v11917_v5  ;;  %v11923_v48 = vand.u32 4294901760, %v11880_v49  ;;  %v11928_v49 = vld [vmem:[#allocation16_spill] sm:$0xff] }
 0x10a   :  { %8316 = vmatpush3.bf16.msra.mxu1 %v11918_v37  ;;  %2555 = vmatprep.mubr.f32.mxu1 %v2554_v44  ;;  %v11925_v44 = vld [vmem:[#allocation15_spill] sm:$0xff]  ;;  %v11930_v37 = vand.u32 4294901760, %v9898_v35  ;;  %v11935_v35 = vld [vmem:[#allocation25_spill] sm:$0xff] }
 0x10b   :  { %8318 = vmatprep.subr.bf16.mxu1 %v11919_v57  ;;  %8194 = vmatprep.subr.bf16.mxu0 %v10065_v39  ;;  %v11933_v57 = vld [vmem:[#allocation23_spill] sm:$0xff] }
 0x10c   :  { %7426 = vmatmul.mubr.f32.vlgmr.msra.gmra.mrb[32].mxu0 %v11922_v47  ;;  %v11939_v47 = vld [vmem:[#allocation32_spill] sm:$0xff] }
 0x10d   :  { %2561 = vmatmul.mubr.f32.gmra.mrb[78].mxu1 %v2560_v27  ;;  %8196 = vmatpush3.bf16.msra.mxu0 %v10065_v39  ;;  %v11929_v27 = vld [vmem:[#allocation19_spill] sm:$0xff] }
 0x10e   :  { %8320 = vmatpush3.bf16.msra.mxu1 %v11920_v22  ;;  %2791 = vmatprep.mubr.f32.mxu1 %v10170_v56  ;;  %v11934_v22 = vand.u32 4294901760, %v9941_v9  ;;  %v11937_v9 = vld [vmem:[#allocation29_spill] sm:$0xff] }
 0x10f   :  { %8322 = vmatprep.subr.bf16.mxu1 %v11921_v6  ;;  %7428 = vmatprep.mubr.f32.mxu0 %v11923_v48  ;;  %v11938_v6 = vld [vmem:[#allocation31_spill] sm:$0xff] }
 0x110   :  { %8198 = vmatprep.subr.bf16.mxu0 %v10073_v54  ;;  %7429 = vmatmul.mubr.f32.gmra.mrb[34].mxu0 %v11926_v33  ;;  %v11940_v48 = vld [vmem:[#allocation35_spill] sm:$0xff] }
 0x111   :  { %2793 = vmatmul.mubr.f32.vlgmr.msra.gmra.mrb[80].mxu1 %v10176_v11  ;;  %8200 = vmatpush3.bf16.msra.mxu0 %v10073_v54  ;;  %v11943_v33 = vld [vmem:[#allocation43_spill] sm:$0xff] }
 0x112   :  { %8324 = vmatpush3.bf16.msra.mxu1 %v11924_v51  ;;  %2798 = vmatprep.mubr.f32.mxu1 %v10189_v40  ;;  %v11941_v51 = vld [vmem:[#allocation37_spill] sm:$0xff] }
 0x113   :  { %8326 = vmatprep.subr.bf16.mxu1 %v11925_v44  ;;  %7431 = vmatprep.mubr.f32.mxu0 %v11927_v46  ;;  %v11942_v44 = vld [vmem:[#allocation42_spill] sm:$0xff]  ;;  %v11944_v46 = vld [vmem:[#allocation113_spill] sm:$0xff] }
 0x114   :  { %8202 = vmatprep.subr.bf16.mxu0 %v10084_v12  ;;  %7432 = vmatmul.mubr.f32.gmra.mrb[36].mxu0 %v11930_v37  ;;  %v11946_v37 = vld [vmem:[#allocation45_spill] sm:$0xff] }
 0x115   :  { %2800 = vmatmul.mubr.f32.gmra.mrb[82].mxu1 %v10193_v2  ;;  %8204 = vmatpush3.bf16.msra.mxu0 %v10084_v12  ;;  %v11960_v12 = vld [vmem:[#allocation69_spill] sm:$0xff] }
 0x116   :  { %8328 = vmatpush3.bf16.msra.mxu1 %v11928_v49  ;;  %2805 = vmatprep.mubr.f32.mxu1 %v10204_v29  ;;  %v11945_v49 = vld [vmem:[#allocation116_spill] sm:$0xff] }
 0x117   :  { %8330 = vmatprep.subr.bf16.mxu1 %v11929_v27  ;;  %7434 = vmatprep.mubr.f32.mxu0 %v11931_v45  ;;  %v11947_v45 = vld [vmem:[#allocation101_spill] sm:$0xff] }
 0x118   :  { %8206 = vmatprep.subr.bf16.mxu0 %v10093_v63  ;;  %7435 = vmatmul.mubr.f32.gmra.mrb[38].mxu0 %v11934_v22  ;;  %v11949_v22 = vld [vmem:[#allocation51_spill] sm:$0xff] }
 0x119   :  { %2807 = vmatmul.mubr.f32.gmra.mrb[84].mxu1 %v10217_v50  ;;  %8208 = vmatpush3.bf16.msra.mxu0 %v10093_v63  ;;  %v11959_v63 = vld [vmem:[#allocation22_spill] sm:$0xff] }
 0x11a   :  { %8332 = vmatpush3.bf16.msra.mxu1 %v11932_v26  ;;  %2812 = vmatprep.mubr.f32.mxu1 %v10219_v61 }
 0x11b   :  { %8334 = vmatprep.subr.bf16.mxu1 %v11933_v57  ;;  %7469 = vmatprep.mubr.f32.mxu0 %v9714_v41  ;;  %v11948_v57 = vld [vmem:[#allocation14_spill] sm:$0xff] }
 0x11c   :  { %8210 = vmatprep.subr.bf16.mxu0 %v10099_v31 }
 0x11d   :  { %2814 = vmatmul.mubr.f32.gmra.mrb[86].mxu1 %v10246_v25  ;;  %8212 = vmatpush3.bf16.msra.mxu0 %v10099_v31  ;;  %v11958_v31 = vld [vmem:[#allocation63_spill] sm:$0xff] }
 0x11e   :  { %8336 = vmatpush3.bf16.msra.mxu1 %v11935_v35  ;;  %2819 = vmatprep.mubr.f32.mxu1 %v10259_v1  ;;  %v11969_v1 = vld [vmem:[#allocation49_spill] sm:$0xff] }
 0x11f   :  { %8338 = vmatprep.subr.bf16.mxu1 %v11936_v21  ;;  %8214 = vmatprep.subr.bf16.mxu0 %v10106_v8 }
 0x121   :  { %2821 = vmatmul.mubr.f32.gmra.mrb[88].mxu1 %v10276_v7  ;;  %8216 = vmatpush3.bf16.msra.mxu0 %v10106_v8  ;;  %v11966_v7 = vld [vmem:[#allocation33_spill] sm:$0xff] }
 0x122   :  { %8340 = vmatpush3.bf16.msra.mxu1 %v11937_v9  ;;  %2826 = vmatprep.mubr.f32.mxu1 %v10282_v52  ;;  %v11950_v9 = vld [vmem:[#allocation17_spill] sm:$0xff] }
 0x123   :  { %8342 = vmatprep.subr.bf16.mxu1 %v11938_v6  ;;  %8218 = vmatprep.subr.bf16.mxu0 %v10108_v59 }
 0x125   :  { %2828 = vmatmul.mubr.f32.gmra.mrb[90].mxu1 %v10301_v15  ;;  %8220 = vmatpush3.bf16.msra.mxu0 %v10108_v59  ;;  %v11956_v59 = vld [vmem:[#allocation21_spill] sm:$0xff] }
 0x126   :  { %8344 = vmatpush3.bf16.msra.mxu1 %v11939_v47  ;;  %2833 = vmatprep.mubr.f32.mxu1 %v10310_v55  ;;  %v11951_v47 = vld [vmem:[#allocation119_spill] sm:$0xff] }
 0x127   :  { %8346 = vmatprep.subr.bf16.mxu1 %v11940_v48  ;;  %8222 = vmatprep.subr.bf16.mxu0 %v10110_v43 }
 0x129   :  { %2835 = vmatmul.mubr.f32.gmra.mrb[92].mxu1 %v10326_v10  ;;  %8224 = vmatpush3.bf16.msra.mxu0 %v10110_v43  ;;  %v11963_v10 = vld [vmem:[#allocation28_spill] sm:$0xff] }
 0x12a   :  { %8348 = vmatpush3.bf16.msra.mxu1 %v11941_v51  ;;  %2840 = vmatprep.mubr.f32.mxu1 %v10338_v38  ;;  %v11952_v51 = vld [vmem:[#allocation120_spill] sm:$0xff] }
 0x12b   :  { %8350 = vmatprep.subr.bf16.mxu1 %v11942_v44  ;;  %8226 = vmatprep.subr.bf16.mxu0 %v11870_v42 }
 0x12c   :  { %7470 = vmatmul.mubr.f32.vlgmr.msra.gmra.mrb[32].mxu0 %v11832_v4 }
 0x12d   :  { %2842 = vmatmul.mubr.f32.gmra.mrb[94].mxu1 %v10352_v16  ;;  %8228 = vmatpush3.bf16.msra.mxu0 %v11870_v42 }
 0x12e   :  { %8352 = vmatpush3.bf16.msra.mxu1 %v11943_v33  ;;  %2977 = vmatprep.mubr.f32.mxu1 %v10187_v53  ;;  %v11953_v33 = vld [vmem:[#allocation53_spill] sm:$0xff] }
 0x12f   :  { %8354 = vmatprep.subr.bf16.mxu1 %v9104_v14  ;;  %7472 = vmatprep.mubr.f32.mxu0 %v11833_v24  ;;  %v6279_v27 = vpop.f32.mrb[0].mxu1 }
 0x130   :  { %8230 = vmatprep.subr.bf16.mxu0 %v11881_v60  ;;  %7473 = vmatmul.mubr.f32.gmra.mrb[34].mxu0 %v11944_v46  ;;  %v6280_v26 = vpop.f32.mrb[1].mxu1 }
 0x131   :  { %2980 = vmatmul.mubr.f32.vlgmr.msra.gmra.mrb[96].mxu1 %v10202_v23  ;;  %8232 = vmatpush3.bf16.msra.mxu0 %v11881_v60  ;;  %v6391_v35 = vpop.f32.mrb[0].mxu0  ;;  %v10486_v21 = vadd.f32 %v6280_v26, %v6279_v27  ;;  %v11955_v27 = vld [vmem:[#allocation56_spill] sm:$0xff] }
 0x132   :  { %8356 = vmatpush3.bf16.msra.mxu1 %v9112_v18  ;;  %2986 = vmatprep.mubr.f32.mxu1 %v10210_v28  ;;  %v6392_v6 = vpop.f32.mrb[1].mxu0 }
 0x133   :  { %8358 = vmatprep.subr.bf16.mxu1 %v9116_v20  ;;  %7475 = vmatprep.mubr.f32.mxu0 %v11945_v49  ;;  %v10491_v48 = vadd.f32 %v6392_v6, %v6391_v35  ;;  %v11957_v35 = vld [vmem:[#allocation122_spill] sm:$0xff] }
 0x134   :  { %8234 = vmatprep.subr.bf16.mxu0 %v11947_v45  ;;  %7476 = vmatmul.mubr.f32.gmra.mrb[36].mxu0 %v11951_v47  ;;  %v6282_v44 = vpop.f32.mrb[2].mxu1 }
 0x135   :  { %2989 = vmatmul.mubr.f32.gmra.mrb[98].mxu1 %v11946_v37  ;;  %8236 = vmatpush3.bf16.msra.mxu0 %v11947_v45  ;;  %v6283_v36 = vpop.f32.mrb[3].mxu1 }
 0x136   :  { %8360 = vmatpush3.bf16.msra.mxu1 %v11948_v57  ;;  %2995 = vmatprep.mubr.f32.mxu1 %v11949_v22  ;;  %v6394_v26 = vpop.f32.mrb[2].mxu0  ;;  %v10498_v43 = vadd.f32 %v6283_v36, %v6282_v44  ;;  %v11961_v44 = vld [vmem:[#allocation24_spill] sm:$0xff] }
 0x137   :  { %8362 = vmatprep.subr.bf16.mxu1 %v11950_v9  ;;  %7478 = vmatprep.mubr.f32.mxu0 %v11952_v51  ;;  %v6395_v8 = vpop.f32.mrb[3].mxu0 }
 0x138   :  { %8238 = vmatprep.subr.bf16.mxu0 %v11898_v17  ;;  %7479 = vmatmul.mubr.f32.gmra.mrb[38].mxu0 %v11957_v35  ;;  %v10503_v6 = vadd.f32 %v6395_v8, %v6394_v26  ;;  %v11962_v26 = vld [vmem:[#allocation27_spill] sm:$0xff] }
 0x139   :  { %2998 = vmatmul.mubr.f32.gmra.mrb[100].mxu1 %v11953_v33  ;;  %8240 = vmatpush3.bf16.msra.mxu0 %v11898_v17 }
 0x13a   :  { %8364 = vmatpush3.bf16.msra.mxu1 %v11954_v3  ;;  %3004 = vmatprep.mubr.f32.mxu1 %v11955_v27  ;;  %v6397_v36 = vpop.f32.mrb[4].mxu0 }
 0x13b   :  { %8366 = vmatprep.subr.bf16.mxu1 %v11956_v59  ;;  %7513 = vmatprep.mubr.f32.mxu0 %v9714_v41  ;;  %v6398_v54 = vpop.f32.mrb[5].mxu0  ;;  %v6285_v39 = vpop.f32.mrb[4].mxu1 }
 0x13c   :  { %8242 = vmatprep.subr.bf16.mxu0 %v11906_v58  ;;  %v10512_v16 = vadd.f32 %v6398_v54, %v6397_v36  ;;  %v6286_v8 = vpop.f32.mrb[5].mxu1  ;;  %v8910_v54 = vld [vmem:[#allocation2 + $0x10] sm:$0xff] }
 0x13d   :  { %3007 = vmatmul.mubr.f32.gmra.mrb[102].mxu1 %v11958_v31  ;;  %8244 = vmatpush3.bf16.msra.mxu0 %v11906_v58  ;;  %v10516_v41 = vadd.f32 %v6286_v8, %v6285_v39  ;;  %v2327_v36 = vmul.f32 %v8910_v54, %v8910_v54  ;;  %v11964_v39 = vld [vmem:[#allocation30_spill] sm:$0xff]  ;;  %v11965_v8 = vld [vmem:[#allocation99_spill] sm:$0xff] }
 0x13e   :  { %8368 = vmatpush3.bf16.msra.mxu1 %v11959_v63  ;;  %3013 = vmatprep.mubr.f32.mxu1 %v11960_v12  ;;  %v11971_v63 = vld [vmem:[#allocation39_spill] sm:$0xff] }
 0x13f   :  { %8370 = vmatprep.subr.bf16.mxu1 %v11961_v44  ;;  %8246 = vmatprep.subr.bf16.mxu0 %v11910_v62  ;;  %v6400_v38 = vpop.f32.mrb[6].mxu0  ;;  %v10534_v54 = vand.u32 4294901760, %v2327_v36 }
 0x140   :  { %v6401_v55 = vpop.f32.mrb[7].mxu0 }
 0x141   :  { %3016 = vmatmul.mubr.f32.gmra.mrb[104].mxu1 %v10299_v32  ;;  %8248 = vmatpush3.bf16.msra.mxu0 %v11910_v62  ;;  %v10522_v15 = vadd.f32 %v6401_v55, %v6400_v38  ;;  %11968 = vst [vmem:[#allocation100_spill] sm:$0xff] %v10534_v54 }
 0x142   :  { %8372 = vmatpush3.bf16.msra.mxu1 %v11962_v26  ;;  %3022 = vmatprep.mubr.f32.mxu1 %v10308_v0  ;;  %v6288_v26 = vpop.f32.mrb[6].mxu1 }
 0x143   :  { %8374 = vmatprep.subr.bf16.mxu1 %v11963_v10  ;;  %8250 = vmatprep.subr.bf16.mxu0 %v11914_v30  ;;  %v6403_v52 = vpop.f32.mrb[8].mxu0  ;;  %v6289_v44 = vpop.f32.mrb[7].mxu1 }
 0x144   :  { %v6404_v10 = vpop.f32.mrb[9].mxu0  ;;  %v10532_v55 = vadd.f32 %v6289_v44, %v6288_v26  ;;  %v11973_v26 = vld [vmem:[#allocation40_spill] sm:$0xff] }
 0x145   :  { %3025 = vmatmul.mubr.f32.gmra.mrb[106].mxu1 %v10324_v19  ;;  %8252 = vmatpush3.bf16.msra.mxu0 %v11914_v30  ;;  %v10530_v38 = vadd.f32 %v6404_v10, %v6403_v52  ;;  %v10543_v52 = vsub.f32 %v2327_v36, %v10534_v54  ;;  %v11976_v54 = vand.u32 4294901760, %v10202_v23 }
 0x146   :  { %8376 = vmatpush3.bf16.msra.mxu1 %v11964_v39  ;;  %3031 = vmatprep.mubr.f32.mxu1 %v11965_v8  ;;  %v11970_v39 = vld [vmem:[#allocation34_spill] sm:$0xff] }
 0x147   :  { %8378 = vmatprep.subr.bf16.mxu1 %v11966_v7  ;;  %11967 = vst [vmem:[#allocation115_spill] sm:$0xff] %v10530_v38  ;;  %8254 = vmatprep.subr.bf16.mxu0 %v11917_v5  ;;  %11972 = vst [vmem:[#allocation78_spill] sm:$0xff] %v10543_v52  ;;  %v11975_v38 = vld [vmem:[#allocation44_spill] sm:$0xff]  ;;  %v11596_v36 = vand.u32 4294901760, %v10543_v52 }
 0x148   :  { %v6291_v25 = vpop.f32.mrb[8].mxu1 }
 0x149   :  { %3034 = vmatmul.mubr.f32.gmra.mrb[108].mxu1 %v11969_v1  ;;  %8256 = vmatpush3.bf16.msra.mxu0 %v11917_v5  ;;  %v6406_v7 = vpop.f32.mrb[10].mxu0  ;;  %v6292_v44 = vpop.f32.mrb[9].mxu1 }
 0x14a   :  { %8380 = vmatpush3.bf16.msra.mxu1 %v11970_v39  ;;  %3040 = vmatprep.mubr.f32.mxu1 %v10360_v34  ;;  %v6407_v10 = vpop.f32.mrb[11].mxu0  ;;  %v11974_v39 = vand.u32 4294901760, %v10187_v53  ;;  %v11977_v53 = vld [vmem:[#allocation46_spill] sm:$0xff] }
 0x14b   :  { %8382 = vmatprep.subr.bf16.mxu1 %v11971_v63  ;;  %8450 = vmatprep.subr.bf16.mxu0 %v11870_v42  ;;  %v10550_v59 = vadd.f32 %v6407_v10, %v6406_v7  ;;  %v10552_v63 = vadd.f32 %v6292_v44, %v6291_v25  ;;  %v11978_v7 = vand.u32 4294901760, %v10210_v28  ;;  %v11980_v28 = vand.u32 4294901760, %v11946_v37 }
 0x14c   :  { %7514 = vmatmul.mubr.f32.vlgmr.msra.gmra.mrb[32].mxu0 %v11832_v4  ;;  %v11982_v44 = vand.u32 4294901760, %v11949_v22 }
 0x14d   :  { %3043 = vmatmul.mubr.f32.gmra.mrb[110].mxu1 %v10373_v13  ;;  %8452 = vmatpush3.bf16.msra.mxu0 %v11870_v42 }
 0x14e   :  { %8384 = vmatpush3.bf16.msra.mxu1 %v11973_v26  ;;  %3147 = vmatprep.mubr.f32.mxu1 %v11974_v39  ;;  %v11979_v39 = vld [vmem:[#allocation50_spill] sm:$0xff] }
 0x14f   :  { %8386 = vmatprep.subr.bf16.mxu1 %v11975_v38  ;;  %7516 = vmatprep.mubr.f32.mxu0 %v11833_v24  ;;  %v6294_v25 = vpop.f32.mrb[10].mxu1 }
 0x150   :  { %8454 = vmatprep.subr.bf16.mxu0 %v11881_v60  ;;  %7517 = vmatmul.mubr.f32.gmra.mrb[34].mxu0 %v11944_v46  ;;  %v6409_v4 = vpop.f32.mrb[12].mxu0  ;;  %v6295_v38 = vpop.f32.mrb[11].mxu1  ;;  %v11981_v46 = vld [vmem:[#allocation52_spill] sm:$0xff] }
 0x151   :  { %3151 = vmatmul.mubr.f32.vlgmr.msra.gmra.mrb[112].mxu1 %v11976_v54  ;;  %8456 = vmatpush3.bf16.msra.mxu0 %v11881_v60  ;;  %v10569_v24 = vadd.f32 %v6295_v38, %v6294_v25  ;;  %v6410_v23 = vpop.f32.mrb[13].mxu0  ;;  %v3687_v54 = vsub.f32 %v10543_v52, %v11596_v36  ;;  %v8912_v25 = vld [vmem:[#allocation2 + $0x40] sm:$0xff]  ;;  %v11985_v38 = vld [vmem:[#allocation58_spill] sm:$0xff] }
 0x152   :  { %8388 = vmatpush3.bf16.msra.mxu1 %v11977_v53  ;;  %3158 = vmatprep.mubr.f32.mxu1 %v11978_v7  ;;  %v10577_v10 = vadd.f32 %v6410_v23, %v6409_v4  ;;  %v8911_v53 = vld [vmem:[#allocation2 + $0x28] sm:$0xff]  ;;  %v11984_v4 = vand.u32 4294901760, %v11953_v33  ;;  %v11986_v23 = vand.u32 4294901760, %v11955_v27  ;;  %v8913_v33 = vld [vmem:[#allocation2 + $0x58] sm:$0xff] }
 0x153   :  { %8390 = vmatprep.subr.bf16.mxu1 %v11979_v39  ;;  %7519 = vmatprep.mubr.f32.mxu0 %v11945_v49  ;;  %v11983_v49 = vld [vmem:[#allocation57_spill] sm:$0xff]  ;;  %v2330_v7 = vmul.f32 %v8911_v53, %v8911_v53  ;;  %v3688_v37 = vand.u32 4294901760, %v3687_v54  ;;  %v2333_v39 = vmul.f32 %v8912_v25, %v8912_v25  ;;  %v8914_v25 = vld [vmem:[#allocation2 + $0x70] sm:$0xff] }
 0x154   :  { %8458 = vmatprep.subr.bf16.mxu0 %v11947_v45  ;;  %7520 = vmatmul.mubr.f32.gmra.mrb[36].mxu0 %v11951_v47 }
 0x155   :  { %3162 = vmatmul.mubr.f32.gmra.mrb[114].mxu1 %v11980_v28  ;;  %8460 = vmatpush3.bf16.msra.mxu0 %v11947_v45  ;;  %v10601_v27 = vand.u32 4294901760, %v2333_v39 }
 0x156   :  { %8392 = vmatpush3.bf16.msra.mxu1 %v11981_v46  ;;  %3169 = vmatprep.mubr.f32.mxu1 %v11982_v44  ;;  %v6297_v22 = vpop.f32.mrb[12].mxu1  ;;  %v11987_v46 = vld [vmem:[#allocation62_spill] sm:$0xff]  ;;  %v10596_v44 = vand.u32 4294901760, %v2330_v7 }
 0x157   :  { %8394 = vmatprep.subr.bf16.mxu1 %v11983_v49  ;;  %7522 = vmatprep.mubr.f32.mxu0 %v11952_v51  ;;  %v6298_v47 = vpop.f32.mrb[13].mxu1  ;;  %v6412_v28 = vpop.f32.mrb[14].mxu0  ;;  %v2336_v49 = vmul.f32 %v8913_v33, %v8913_v33 }
 0x158   :  { %8462 = vmatprep.subr.bf16.mxu0 %v11898_v17  ;;  %7523 = vmatmul.mubr.f32.gmra.mrb[38].mxu0 %v11957_v35  ;;  %v10594_v51 = vadd.f32 %v6298_v47, %v6297_v22  ;;  %v6413_v54 = vpop.f32.mrb[15].mxu0  ;;  %v11989_v35 = vld [vmem:[#allocation64_spill] sm:$0xff]  ;;  %v11990_v22 = vand.u32 4294901760, %v11960_v12  ;;  %v8916_v12 = vld [vmem:[#allocation2 + $0xa0] sm:$0xff] }
 0x159   :  { %3173 = vmatmul.mubr.f32.gmra.mrb[116].mxu1 %v11984_v4  ;;  %8464 = vmatpush3.bf16.msra.mxu0 %v11898_v17  ;;  %v10599_v53 = vadd.f32 %v6413_v54, %v6412_v28  ;;  %v2339_v4 = vmul.f32 %v8914_v25, %v8914_v25  ;;  %v10611_v28 = vsub.f32 %v2330_v7, %v10596_v44 }
 0x15a   :  { %8396 = vmatpush3.bf16.msra.mxu1 %v11985_v38  ;;  %3180 = vmatprep.mubr.f32.mxu1 %v11986_v23  ;;  %v11988_v38 = vand.u32 4294901760, %v11958_v31  ;;  %v11991_v23 = vld [vmem:[#allocation68_spill] sm:$0xff]  ;;  %v10617_v25 = vsub.f32 %v2333_v39, %v10601_v27  ;;  %v11998_v39 = vld [vmem:[#allocation77_spill] sm:$0xff] }
 0x15b   :  { %8398 = vmatprep.subr.bf16.mxu1 %v11987_v46  ;;  %7557 = vmatprep.mubr.f32.mxu0 %v3688_v37  ;;  %11992 = vst [vmem:[#allocation48_spill] sm:$0xff] %v10611_v28  ;;  %v10613_v37 = vand.u32 4294901760, %v2336_v49  ;;  %v8915_v46 = vld [vmem:[#allocation2 + $0x88] sm:$0xff] }
 0x15c   :  { %8466 = vmatprep.subr.bf16.mxu0 %v11906_v58  ;;  %v2342_v54 = vmul.f32 %v8915_v46, %v8915_v46  ;;  %11993 = vst [vmem:[#allocation84_spill] sm:$0xff] %v10617_v25  ;;  %v11996_v46 = vld [vmem:[#allocation70_spill] sm:$0xff] }
 0x15d   :  { %3184 = vmatmul.mubr.f32.gmra.mrb[118].mxu1 %v11988_v38  ;;  %v6503_v47 = vpop.f32.mrb[16].mxu0  ;;  %v6300_v33 = vpop.f32.mrb[14].mxu1  ;;  %8468 = vmatpush3.bf16.msra.mxu0 %v11906_v58  ;;  %v10619_v38 = vand.u32 4294901760, %v2339_v4  ;;  %v11997_v58 = vand.u32 4294901760, %v10308_v0 }
 0x15e   :  { %8400 = vmatpush3.bf16.msra.mxu1 %v11989_v35  ;;  %3191 = vmatprep.mubr.f32.mxu1 %v11990_v22  ;;  %v6504_v31 = vpop.f32.mrb[17].mxu0  ;;  %v2345_v35 = vmul.f32 %v8916_v12, %v8916_v12  ;;  %v11995_v22 = vand.u32 4294901760, %v10299_v32  ;;  %v6301_v7 = vpop.f32.mrb[15].mxu1  ;;  %v10634_v12 = vsub.f32 %v2336_v49, %v10613_v37  ;;  %v10636_v32 = vand.u32 4294901760, %v2342_v54 }
 0x15f   :  { %8402 = vmatprep.subr.bf16.mxu1 %v11991_v23  ;;  %11994 = vst [vmem:[#allocation54_spill] sm:$0xff] %v10619_v38  ;;  %v10623_v23 = vadd.f32 %v6504_v31, %v6503_v47  ;;  %8470 = vmatprep.subr.bf16.mxu0 %v11910_v62  ;;  %v10627_v36 = vadd.f32 %v6301_v7, %v6300_v33  ;;  %v8917_v47 = vld [vmem:[#allocation2 + $0xb8] sm:$0xff]  ;;  %v12002_v33 = vld [vmem:[#allocation87_spill] sm:$0xff] }
 0x160   :  { %v2348_v31 = vmul.f32 %v8917_v47, %v8917_v47  ;;  %v10641_v0 = vsub.f32 %v2339_v4, %v10619_v38  ;;  %v12000_v47 = vld [vmem:[#allocation80_spill] sm:$0xff]  ;;  %v12003_v4 = vand.u32 4294901760, %v10611_v28 }
 0x161   :  { %3195 = vmatmul.mubr.f32.gmra.mrb[120].mxu1 %v11995_v22  ;;  %v6335_v22 = vpop.f32.mrb[16].mxu1  ;;  %8472 = vmatpush3.bf16.msra.mxu0 %v11910_v62  ;;  %v12001_v62 = vand.u32 4294901760, %v11965_v8  ;;  %v12004_v8 = vand.u32 4294901760, %v10617_v25 }
 0x162   :  { %8404 = vmatpush3.bf16.msra.mxu1 %v11996_v46  ;;  %3202 = vmatprep.mubr.f32.mxu1 %v11997_v58  ;;  %v6506_v46 = vpop.f32.mrb[18].mxu0  ;;  %v10643_v58 = vand.u32 4294901760, %v2345_v35  ;;  %v6336_v7 = vpop.f32.mrb[17].mxu1  ;;  %v3697_v45 = vsub.f32 %v10611_v28, %v12003_v4  ;;  %v10661_v38 = vand.u32 4294901760, %v2348_v31 }
 0x163   :  { %8406 = vmatprep.subr.bf16.mxu1 %v11998_v39  ;;  %v11999_v39 = vand.u32 4294901760, %v10324_v19  ;;  %v6507_v49 = vpop.f32.mrb[19].mxu0  ;;  %8474 = vmatprep.subr.bf16.mxu0 %v11914_v30  ;;  %v6337_v52 = vadd.f32 %v6336_v7, %v6335_v22  ;;  %v12007_v19 = vand.u32 4294901760, %v10360_v34 }
 0x164   :  { %v10651_v17 = vadd.f32 %v6507_v49, %v6506_v46  ;;  %v3707_v46 = vsub.f32 %v10617_v25, %v12004_v8  ;;  %v10670_v49 = vsub.f32 %v2345_v35, %v10643_v58  ;;  %v12008_v35 = vld [vmem:[#allocation95_spill] sm:$0xff] }
 0x165   :  { %3206 = vmatmul.mubr.f32.gmra.mrb[122].mxu1 %v11999_v39  ;;  %v10659_v39 = vsub.f32 %v2342_v54, %v10636_v32  ;;  %v575_v22 = vadd.f32 %v6337_v52, %v10486_v21  ;;  %v6338_v7 = vpop.f32.mrb[18].mxu1  ;;  %8476 = vmatpush3.bf16.msra.mxu0 %v11914_v30  ;;  %v12005_v54 = vand.u32 4294901760, %v11969_v1  ;;  %v12006_v52 = vld [vmem:[#allocation90_spill] sm:$0xff]  ;;  %v12009_v1 = vand.u32 4294901760, %v10634_v12 }
 0x166   :  { %8408 = vmatpush3.bf16.msra.mxu1 %v12000_v47  ;;  %3213 = vmatprep.mubr.f32.mxu1 %v12001_v62  ;;  %v6509_v62 = vpop.f32.mrb[20].mxu0  ;;  %v6339_v47 = vpop.f32.mrb[19].mxu1 }
 0x167   :  { %8410 = vmatprep.subr.bf16.mxu1 %v12002_v33  ;;  %v6510_v4 = vpop.f32.mrb[21].mxu0  ;;  %8478 = vmatprep.subr.bf16.mxu0 %v11917_v5  ;;  %v6340_v21 = vadd.f32 %v6339_v47, %v6338_v7  ;;  %v10681_v8 = vadd.f32 %v10491_v48, %v575_v22  ;;  %v3698_v33 = vand.u32 4294901760, %v3697_v45  ;;  %v3736_v25 = vand.u32 4294901760, %v10659_v39 }
 0x168   :  { %v10678_v28 = vadd.f32 %v6510_v4, %v6509_v62  ;;  %v10689_v7 = vsub.f32 %v2348_v31, %v10661_v38  ;;  %v3708_v48 = vand.u32 4294901760, %v3707_v46  ;;  %v12010_v22 = vand.u32 4294901760, %v10641_v0  ;;  %v12012_v31 = vld [vmem:[#allocation121_spill] sm:$0xff] }
 0x169   :  { %3217 = vmatmul.mubr.f32.gmra.mrb[124].mxu1 %v12005_v54  ;;  %v3717_v54 = vsub.f32 %v10634_v12, %v12009_v1  ;;  %v582_v34 = vadd.f32 %v6340_v21, %v10498_v43  ;;  %8480 = vmatpush3.bf16.msra.mxu0 %v11917_v5  ;;  %v3746_v47 = vand.u32 4294901760, %v10670_v49  ;;  %v12013_v43 = vld [vmem:[#allocation96_spill] sm:$0xff] }
 0x16a   :  { %8412 = vmatpush3.bf16.msra.mxu1 %v12006_v52  ;;  %3224 = vmatprep.mubr.f32.mxu1 %v12007_v19  ;;  %v6341_v19 = vpop.f32.mrb[20].mxu1  ;;  %v6512_v62 = vpop.f32.mrb[22].mxu0  ;;  %v3727_v45 = vsub.f32 %v10641_v0, %v12010_v22  ;;  %v12011_v52 = vand.u32 4294901760, %v10373_v13  ;;  %v3737_v13 = vsub.f32 %v10659_v39, %v3736_v25 }
 0x16b   :  { %8414 = vmatprep.subr.bf16.mxu1 %v12008_v35  ;;  %v6342_v4 = vpop.f32.mrb[21].mxu1  ;;  %v6513_v35 = vpop.f32.mrb[23].mxu0  ;;  %8482 = vmatprep.subr.bf16.mxu0 %v12012_v31  ;;  %v10705_v46 = vadd.f32 %v10503_v6, %v582_v34  ;;  %v3718_v22 = vand.u32 4294901760, %v3717_v54  ;;  %v12014_v54 = vld [vmem:[#allocation123_spill] sm:$0xff] }
 0x16c   :  { %v6343_v1 = vadd.f32 %v6342_v4, %v6341_v19  ;;  %v10702_v21 = vadd.f32 %v6513_v35, %v6512_v62  ;;  %7558 = vmatmul.mubr.f32.vlgmr.msra.gmra.mrb[40].mxu0 %v3698_v33  ;;  %v3728_v35 = vand.u32 4294901760, %v3727_v45  ;;  %v3738_v45 = vand.u32 4294901760, %v3737_v13 }
 0x16d   :  { %3228 = vmatmul.mubr.f32.gmra.mrb[126].mxu1 %v12011_v52  ;;  %v3756_v52 = vand.u32 4294901760, %v10689_v7  ;;  %v6344_v4 = vpop.f32.mrb[22].mxu1  ;;  %8484 = vmatpush3.bf16.msra.mxu0 %v12012_v31 }
 0x16e   :  { %8416 = vmatpush3.bf16.msra.mxu1 %v12013_v43  ;;  %3394 = vmatprep.mubr.f32.mxu1 %v10170_v56  ;;  %v589_v19 = vadd.f32 %v6343_v1, %v10516_v41  ;;  %v6515_v62 = vpop.f32.mrb[24].mxu0  ;;  %v6345_v6 = vpop.f32.mrb[23].mxu1 }
 0x16f   :  { %8418 = vmatprep.subr.bf16.mxu1 %v9104_v14  ;;  %7560 = vmatprep.mubr.f32.mxu0 %v3708_v48  ;;  %v3747_v14 = vsub.f32 %v10670_v49, %v3746_v47  ;;  %v6516_v33 = vpop.f32.mrb[25].mxu0  ;;  %v6346_v34 = vadd.f32 %v6345_v6, %v6344_v4  ;;  %v3757_v31 = vsub.f32 %v10689_v7, %v3756_v52 }
 0x170   :  { %8486 = vmatprep.subr.bf16.mxu0 %v12014_v54  ;;  %v10721_v41 = vadd.f32 %v6516_v33, %v6515_v62  ;;  %v10724_v48 = vadd.f32 %v10512_v16, %v589_v19  ;;  %7561 = vmatmul.mubr.f32.gmra.mrb[42].mxu0 %v3718_v22  ;;  %v12015_v19 = vld [vmem:[#allocation41_spill] sm:$0xff] }
 0x171   :  { %3396 = vmatmul.mubr.f32.vlgmr.msra.gmra.mrb[128].mxu1 %v10176_v11  ;;  %v596_v1 = vadd.f32 %v6346_v34, %v10532_v55  ;;  %v6347_v43 = vpop.f32.mrb[24].mxu1  ;;  %8488 = vmatpush3.bf16.msra.mxu0 %v12014_v54  ;;  %v3748_v4 = vand.u32 4294901760, %v3747_v14  ;;  %v3758_v13 = vand.u32 4294901760, %v3757_v31  ;;  %v12016_v54 = vld [vmem:[#allocation124_spill] sm:$0xff] }
 0x172   :  { %8420 = vmatpush3.bf16.msra.mxu1 %v9112_v18  ;;  %3401 = vmatprep.mubr.f32.mxu1 %v10189_v40  ;;  %v6518_v18 = vpop.f32.mrb[26].mxu0  ;;  %v6348_v62 = vpop.f32.mrb[25].mxu1 }
 0x173   :  { %8422 = vmatprep.subr.bf16.mxu1 %v9116_v20  ;;  %7563 = vmatprep.mubr.f32.mxu0 %v3728_v35  ;;  %v6519_v16 = vpop.f32.mrb[27].mxu0  ;;  %v6349_v20 = vadd.f32 %v6348_v62, %v6347_v43  ;;  %v10739_v55 = vadd.f32 %v10522_v15, %v596_v1 }
 0x174   :  { %8490 = vmatprep.subr.bf16.mxu0 %v12015_v19  ;;  %v10736_v22 = vadd.f32 %v6519_v16, %v6518_v18  ;;  %7564 = vmatmul.mubr.f32.gmra.mrb[44].mxu0 %v3738_v45  ;;  %v12018_v45 = vld [vmem:[#allocation21_spill] sm:$0xff]  ;;  %v12019_v18 = vld [vmem:[#allocation100_spill] sm:$0xff] }
 0x175   :  { %3403 = vmatmul.mubr.f32.gmra.mrb[130].mxu1 %v10193_v2  ;;  %v603_v35 = vadd.f32 %v6349_v20, %v10552_v63  ;;  %v6350_v14 = vpop.f32.mrb[26].mxu1  ;;  %8492 = vmatpush3.bf16.msra.mxu0 %v12015_v19  ;;  %v12021_v16 = vld [vmem:[#allocation125_spill] sm:$0xff]  ;;  %v12022_v20 = vld [vmem:[#allocation22_spill] sm:$0xff] }
 0x176   :  { %8424 = vmatpush3.bf16.msra.mxu1 %v11948_v57  ;;  %3408 = vmatprep.mubr.f32.mxu1 %v10204_v29  ;;  %v6521_v6 = vpop.f32.mrb[28].mxu0  ;;  %v6351_v33 = vpop.f32.mrb[27].mxu1 }
 0x177   :  { %8426 = vmatprep.subr.bf16.mxu1 %v11950_v9  ;;  %7566 = vmatprep.mubr.f32.mxu0 %v3748_v4  ;;  %v6522_v57 = vpop.f32.mrb[29].mxu0  ;;  %v6352_v34 = vadd.f32 %v6351_v33, %v6350_v14  ;;  %v12017_v9 = vld [vmem:[#allocation115_spill] sm:$0xff]  ;;  %v12024_v14 = vld [vmem:[#allocation24_spill] sm:$0xff] }
 0x178   :  { %8494 = vmatprep.subr.bf16.mxu0 %v12016_v54  ;;  %v10748_v15 = vadd.f32 %v6522_v57, %v6521_v6  ;;  %v10751_v63 = vadd.f32 %v12017_v9, %v603_v35  ;;  %7567 = vmatmul.mubr.f32.gmra.mrb[46].mxu0 %v3758_v13  ;;  %v12023_v35 = vld [vmem:[#allocation59_spill] sm:$0xff] }
 0x179   :  { %3410 = vmatmul.mubr.f32.gmra.mrb[132].mxu1 %v10217_v50  ;;  %v610_v31 = vadd.f32 %v6352_v34, %v10569_v24  ;;  %v6353_v1 = vpop.f32.mrb[28].mxu1  ;;  %8496 = vmatpush3.bf16.msra.mxu0 %v12016_v54  ;;  %v12025_v54 = vld [vmem:[#allocation65_spill] sm:$0xff]  ;;  %v12026_v34 = vld [vmem:[#allocation126_spill] sm:$0xff] }
 0x17a   :  { %8428 = vmatpush3.bf16.msra.mxu1 %v11954_v3  ;;  %3415 = vmatprep.mubr.f32.mxu1 %v10219_v61  ;;  %v6524_v43 = vpop.f32.mrb[30].mxu0  ;;  %v6354_v4 = vpop.f32.mrb[29].mxu1  ;;  %v12020_v3 = vld [vmem:[#allocation107_spill] sm:$0xff] }
 0x17b   :  { %8430 = vmatprep.subr.bf16.mxu1 %v12018_v45  ;;  %7601 = vmatprep.mubr.f32.mxu0 %v12019_v18  ;;  %v6525_v62 = vpop.f32.mrb[31].mxu0  ;;  %v6355_v19 = vadd.f32 %v6354_v4, %v6353_v1  ;;  %v10764_v24 = vadd.f32 %v10550_v59, %v610_v31  ;;  %v12027_v45 = vld [vmem:[#allocation27_spill] sm:$0xff]  ;;  %v12029_v31 = vld [vmem:[#allocation28_spill] sm:$0xff] }
 0x17c   :  { %8498 = vmatprep.subr.bf16.mxu0 %v12021_v16  ;;  %v10761_v13 = vadd.f32 %v6525_v62, %v6524_v43  ;;  %v12028_v1 = vld [vmem:[#allocation71_spill] sm:$0xff] }
 0x17d   :  { %3417 = vmatmul.mubr.f32.gmra.mrb[134].mxu1 %v12020_v3  ;;  %v617_v6 = vadd.f32 %v6355_v19, %v10594_v51  ;;  %v6356_v33 = vpop.f32.mrb[30].mxu1  ;;  %8500 = vmatpush3.bf16.msra.mxu0 %v12021_v16  ;;  %v12030_v62 = vld [vmem:[#allocation79_spill] sm:$0xff] }
 0x17e   :  { %8432 = vmatpush3.bf16.msra.mxu1 %v12022_v20  ;;  %3422 = vmatprep.mubr.f32.mxu1 %v12023_v35  ;;  %v6357_v57 = vpop.f32.mrb[31].mxu1  ;;  %v12031_v16 = vld [vmem:[#allocation127_spill] sm:$0xff]  ;;  %v12032_v20 = vld [vmem:[#allocation30_spill] sm:$0xff] }
 0x17f   :  { %8434 = vmatprep.subr.bf16.mxu1 %v12024_v14  ;;  %8502 = vmatprep.subr.bf16.mxu0 %v12026_v34  ;;  %v6358_v9 = vadd.f32 %v6357_v57, %v6356_v33  ;;  %v10774_v59 = vadd.f32 %v10577_v10, %v617_v6  ;;  %v12033_v14 = vld [vmem:[#allocation82_spill] sm:$0xff]  ;;  %v12034_v6 = vld [vmem:[#allocation33_spill] sm:$0xff] }
 0x181   :  { %3424 = vmatmul.mubr.f32.gmra.mrb[136].mxu1 %v12025_v54  ;;  %v624_v51 = vadd.f32 %v6358_v9, %v10627_v36  ;;  %8504 = vmatpush3.bf16.msra.mxu0 %v12026_v34  ;;  %v12035_v34 = vld [vmem:[#allocation88_spill] sm:$0xff] }
 0x182   :  { %8436 = vmatpush3.bf16.msra.mxu1 %v12027_v45  ;;  %3429 = vmatprep.mubr.f32.mxu1 %v12028_v1  ;;  %v12036_v9 = vld [vmem:[#allocation104_spill] sm:$0xff] }
 0x183   :  { %8438 = vmatprep.subr.bf16.mxu1 %v12029_v31  ;;  %8506 = vmatprep.subr.bf16.mxu0 %v12031_v16  ;;  %v10784_v10 = vadd.f32 %v10599_v53, %v624_v51  ;;  %v12037_v31 = vld [vmem:[#allocation34_spill] sm:$0xff]  ;;  %v12039_v51 = vld [vmem:[#allocation39_spill] sm:$0xff] }
 0x184   :  { %v6447_v43 = vpop.f32.mrb[32].mxu1 }
 0x185   :  { %v6448_v4 = vpop.f32.mrb[33].mxu1  ;;  %3431 = vmatmul.mubr.f32.gmra.mrb[138].mxu1 %v12030_v62  ;;  %8508 = vmatpush3.bf16.msra.mxu0 %v12031_v16 }
 0x186   :  { %v6449_v19 = vadd.f32 %v6448_v4, %v6447_v43  ;;  %8440 = vmatpush3.bf16.msra.mxu1 %v12032_v20  ;;  %3436 = vmatprep.mubr.f32.mxu1 %v12033_v14  ;;  %v12038_v43 = vld [vmem:[#allocation75_spill] sm:$0xff]  ;;  %v12041_v20 = vld [vmem:[#allocation86_spill] sm:$0xff] }
 0x187   :  { %8442 = vmatprep.subr.bf16.mxu1 %v12034_v6  ;;  %8510 = vmatprep.subr.bf16.mxu0 %v12036_v9 }
 0x188   :  { %v933_v36 = vadd.f32 %v6449_v19, %v10681_v8  ;;  %v6450_v33 = vpop.f32.mrb[34].mxu1  ;;  %v12040_v19 = vld [vmem:[#allocation111_spill] sm:$0xff] }
 0x189   :  { %v6451_v57 = vpop.f32.mrb[35].mxu1  ;;  %3438 = vmatmul.mubr.f32.gmra.mrb[140].mxu1 %v12035_v34  ;;  %8512 = vmatpush3.bf16.msra.mxu0 %v12036_v9 }
 0x18a   :  { %v6452_v45 = vadd.f32 %v6451_v57, %v6450_v33  ;;  %8444 = vmatpush3.bf16.msra.mxu1 %v12037_v31  ;;  %3443 = vmatprep.mubr.f32.mxu1 %v12038_v43  ;;  %v10794_v53 = vadd.f32 %v10623_v23, %v933_v36 }
 0x18b   :  { %8446 = vmatprep.subr.bf16.mxu1 %v12039_v51  ;;  %8514 = vmatprep.subr.bf16.mxu0 %v12041_v20 }
 0x18c   :  { %v944_v8 = vadd.f32 %v6452_v45, %v10705_v46  ;;  %v6453_v4 = vpop.f32.mrb[36].mxu1  ;;  %7602 = vmatmul.mubr.f32.vlgmr.msra.gmra.mrb[40].mxu0 %v10596_v44 }
 0x18d   :  { %v6454_v16 = vpop.f32.mrb[37].mxu1  ;;  %3445 = vmatmul.mubr.f32.gmra.mrb[142].mxu1 %v12040_v19  ;;  %8516 = vmatpush3.bf16.msra.mxu0 %v12041_v20 }
 0x18e   :  { %v6455_v6 = vadd.f32 %v6454_v16, %v6453_v4  ;;  %8448 = vmatpush3.bf16.msra.mxu1 %v11973_v26  ;;  %3547 = vmatprep.mubr.f32.mxu1 %v10170_v56  ;;  %v10804_v23 = vadd.f32 %v10651_v17, %v944_v8  ;;  %v12042_v26 = vld [vmem:[#allocation91_spill] sm:$0xff] }
 0x18f   :  { %8641 = vmatprep.subr.bf16.mxu1 %v11870_v42  ;;  %7604 = vmatprep.mubr.f32.mxu0 %v10601_v27 }
 0x190   :  { %v955_v46 = vadd.f32 %v6455_v6, %v10724_v48  ;;  %v6456_v36 = vpop.f32.mrb[38].mxu1  ;;  %8518 = vmatprep.subr.bf16.mxu0 %v12042_v26  ;;  %7605 = vmatmul.mubr.f32.gmra.mrb[42].mxu0 %v10613_v37 }
 0x191   :  { %v6457_v33 = vpop.f32.mrb[39].mxu1  ;;  %3549 = vmatmul.mubr.f32.vlgmr.msra.gmra.mrb[144].mxu1 %v10176_v11  ;;  %8520 = vmatpush3.bf16.msra.mxu0 %v12042_v26  ;;  %v12043_v11 = vld [vmem:[#allocation54_spill] sm:$0xff] }
 0x192   :  { %v6458_v56 = vadd.f32 %v6457_v33, %v6456_v36  ;;  %3554 = vmatprep.mubr.f32.mxu1 %v10189_v40  ;;  %8649 = vmatpush3.bf16.msra.mxu1 %v11870_v42  ;;  %v10816_v17 = vadd.f32 %v10678_v28, %v955_v46  ;;  %v12044_v40 = vld [vmem:[#allocation94_spill] sm:$0xff]  ;;  %v12050_v46 = vld [vmem:[#allocation105_spill] sm:$0xff] }
 0x193   :  { %8642 = vmatprep.subr.bf16.mxu1 %v11881_v60  ;;  %7607 = vmatprep.mubr.f32.mxu0 %v12043_v11 }
 0x194   :  { %v966_v48 = vadd.f32 %v6458_v56, %v10739_v55  ;;  %v6459_v57 = vpop.f32.mrb[40].mxu1  ;;  %8522 = vmatprep.subr.bf16.mxu0 %v12044_v40  ;;  %7608 = vmatmul.mubr.f32.gmra.mrb[44].mxu0 %v10636_v32  ;;  %v12045_v55 = vld [vmem:[#allocation101_spill] sm:$0xff] }
 0x195   :  { %v6460_v9 = vpop.f32.mrb[41].mxu1  ;;  %3556 = vmatmul.mubr.f32.gmra.mrb[146].mxu1 %v10193_v2  ;;  %8524 = vmatpush3.bf16.msra.mxu0 %v12044_v40 }
 0x196   :  { %v6461_v45 = vadd.f32 %v6460_v9, %v6459_v57  ;;  %3561 = vmatprep.mubr.f32.mxu1 %v10204_v29  ;;  %8650 = vmatpush3.bf16.msra.mxu1 %v11881_v60  ;;  %v10828_v28 = vadd.f32 %v10702_v21, %v966_v48  ;;  %v12046_v29 = vld [vmem:[#allocation36_spill] sm:$0xff] }
 0x197   :  { %8643 = vmatprep.subr.bf16.mxu1 %v12045_v55  ;;  %7610 = vmatprep.mubr.f32.mxu0 %v10643_v58 }
 0x198   :  { %v977_v31 = vadd.f32 %v6461_v45, %v10751_v63  ;;  %v6462_v51 = vpop.f32.mrb[42].mxu1  ;;  %8526 = vmatprep.subr.bf16.mxu0 %v12046_v29  ;;  %7611 = vmatmul.mubr.f32.gmra.mrb[46].mxu0 %v10661_v38  ;;  %v12047_v63 = vld [vmem:[#allocation102_spill] sm:$0xff] }
 0x199   :  { %v6463_v2 = vpop.f32.mrb[43].mxu1  ;;  %3563 = vmatmul.mubr.f32.gmra.mrb[148].mxu1 %v10217_v50  ;;  %8528 = vmatpush3.bf16.msra.mxu0 %v12046_v29  ;;  %v12048_v50 = vld [vmem:[#allocation78_spill] sm:$0xff] }
 0x19a   :  { %v6464_v8 = vadd.f32 %v6463_v2, %v6462_v51  ;;  %3568 = vmatprep.mubr.f32.mxu1 %v10219_v61  ;;  %8651 = vmatpush3.bf16.msra.mxu1 %v12045_v55  ;;  %v10840_v21 = vadd.f32 %v10721_v41, %v977_v31  ;;  %v12049_v61 = vld [vmem:[#allocation106_spill] sm:$0xff]  ;;  %v12056_v31 = vld [vmem:[#allocation84_spill] sm:$0xff] }
 0x19b   :  { %8644 = vmatprep.subr.bf16.mxu1 %v12047_v63  ;;  %7645 = vmatprep.mubr.f32.mxu0 %v12048_v50 }
 0x19c   :  { %v988_v4 = vadd.f32 %v6464_v8, %v10764_v24  ;;  %v6465_v16 = vpop.f32.mrb[44].mxu1  ;;  %8530 = vmatprep.subr.bf16.mxu0 %v12049_v61 }
 0x19d   :  { %v6466_v20 = vpop.f32.mrb[45].mxu1  ;;  %3570 = vmatmul.mubr.f32.gmra.mrb[150].mxu1 %v12020_v3  ;;  %8532 = vmatpush3.bf16.msra.mxu0 %v12049_v61  ;;  %v12051_v3 = vld [vmem:[#allocation110_spill] sm:$0xff] }
 0x19e   :  { %v6467_v6 = vadd.f32 %v6466_v20, %v6465_v16  ;;  %3575 = vmatprep.mubr.f32.mxu1 %v12023_v35  ;;  %8652 = vmatpush3.bf16.msra.mxu1 %v12047_v63  ;;  %v10852_v41 = vadd.f32 %v10736_v22, %v988_v4  ;;  %v12052_v35 = vld [vmem:[#allocation109_spill] sm:$0xff] }
 0x19f   :  { %8645 = vmatprep.subr.bf16.mxu1 %v12050_v46  ;;  %8534 = vmatprep.subr.bf16.mxu0 %v12051_v3 }
 0x1a0   :  { %v999_v24 = vadd.f32 %v6467_v6, %v10774_v59  ;;  %v6468_v36 = vpop.f32.mrb[46].mxu1  ;;  %v12057_v6 = vand.u32 4294901760, %v12048_v50 }
 0x1a1   :  { %v6469_v33 = vpop.f32.mrb[47].mxu1  ;;  %3577 = vmatmul.mubr.f32.gmra.mrb[152].mxu1 %v12025_v54  ;;  %8536 = vmatpush3.bf16.msra.mxu0 %v12051_v3  ;;  %v12053_v54 = vld [vmem:[#allocation38_spill] sm:$0xff] }
 0x1a2   :  { %v6470_v26 = vadd.f32 %v6469_v33, %v6468_v36  ;;  %3582 = vmatprep.mubr.f32.mxu1 %v12028_v1  ;;  %8653 = vmatpush3.bf16.msra.mxu1 %v12050_v46  ;;  %v10862_v22 = vadd.f32 %v10748_v15, %v999_v24 }
 0x1a3   :  { %8646 = vmatprep.subr.bf16.mxu1 %v12052_v35  ;;  %8538 = vmatprep.subr.bf16.mxu0 %v12053_v54 }
 0x1a4   :  { %v1010_v59 = vadd.f32 %v6470_v26, %v10784_v10  ;;  %v6559_v56 = vpop.f32.mrb[48].mxu1 }
 0x1a5   :  { %v6560_v48 = vpop.f32.mrb[49].mxu1  ;;  %3584 = vmatmul.mubr.f32.gmra.mrb[154].mxu1 %v12030_v62  ;;  %8540 = vmatpush3.bf16.msra.mxu0 %v12053_v54  ;;  %v12054_v62 = vld [vmem:[#allocation47_spill] sm:$0xff] }
 0x1a6   :  { %v6561_v57 = vadd.f32 %v6560_v48, %v6559_v56  ;;  %3589 = vmatprep.mubr.f32.mxu1 %v12033_v14  ;;  %8654 = vmatpush3.bf16.msra.mxu1 %v12052_v35  ;;  %v10872_v15 = vadd.f32 %v10761_v13, %v1010_v59 }
 0x1a7   :  { %8647 = vmatprep.subr.bf16.mxu1 %v11914_v30  ;;  %8542 = vmatprep.subr.bf16.mxu0 %v12054_v62 }
 0x1a8   :  { %v6562_v1 = vpop.f32.mrb[50].mxu1  ;;  %v10877_v10 = vadd.f32 %v6561_v57, %v10794_v53 }
 0x1a9   :  { %v6563_v9 = vpop.f32.mrb[51].mxu1  ;;  %3591 = vmatmul.mubr.f32.gmra.mrb[156].mxu1 %v12035_v34  ;;  %8544 = vmatpush3.bf16.msra.mxu0 %v12054_v62 }
 0x1aa   :  { %v6564_v40 = vadd.f32 %v6563_v9, %v6562_v1  ;;  %3596 = vmatprep.mubr.f32.mxu1 %v12038_v43  ;;  %8655 = vmatpush3.bf16.msra.mxu1 %v11914_v30  ;;  %v12055_v43 = vld [vmem:[#allocation48_spill] sm:$0xff]  ;;  %v12058_v9 = vld [vmem:[#allocation73_spill] sm:$0xff] }
 0x1ab   :  { %8648 = vmatprep.subr.bf16.mxu1 %v11917_v5  ;;  %8546 = vmatprep.subr.bf16.mxu0 %v11870_v42 }
 0x1ac   :  { %v6565_v13 = vpop.f32.mrb[52].mxu1  ;;  %v10886_v14 = vadd.f32 %v6564_v40, %v10804_v23  ;;  %7646 = vmatmul.mubr.f32.vlgmr.msra.gmra.mrb[40].mxu0 %v12055_v43 }
 0x1ad   :  { %v6566_v53 = vpop.f32.mrb[53].mxu1  ;;  %3598 = vmatmul.mubr.f32.gmra.mrb[158].mxu1 %v12040_v19  ;;  %8548 = vmatpush3.bf16.msra.mxu0 %v11870_v42 }
 0x1ae   :  { %v6567_v34 = vadd.f32 %v6566_v53, %v6565_v13  ;;  %8656 = vmatpush3.bf16.msra.mxu1 %v11917_v5  ;;  %7783 = vmatprep.mubr.f32.mxu1 %v12043_v11  ;;  %v12060_v13 = vand.u32 4294901760, %v12056_v31 }
 0x1af   :  { %7648 = vmatprep.mubr.f32.mxu0 %v12056_v31  ;;  %8550 = vmatprep.subr.bf16.mxu0 %v11881_v60  ;;  %v12065_v31 = vld [vmem:[#allocation112_spill] sm:$0xff] }
 0x1b0   :  { %v6568_v45 = vpop.f32.mrb[54].mxu1  ;;  %v10896_v23 = vadd.f32 %v6567_v34, %v10816_v17  ;;  %7649 = vmatmul.mubr.f32.gmra.mrb[42].mxu0 %v10634_v12  ;;  %v12061_v34 = vld [vmem:[#allocation103_spill] sm:$0xff] }
 0x1b1   :  { %v6569_v51 = vpop.f32.mrb[55].mxu1  ;;  %7784 = vmatmul.mubr.f32.vlgmr.msra.gmra.mrb[160].mxu1 %v10636_v32  ;;  %8552 = vmatpush3.bf16.msra.mxu0 %v11881_v60 }
 0x1b2   :  { %v6570_v19 = vadd.f32 %v6569_v51, %v6568_v45  ;;  %7786 = vmatprep.mubr.f32.mxu1 %v10643_v58  ;;  %7651 = vmatprep.mubr.f32.mxu0 %v10641_v0 }
 0x1b3   :  { %8554 = vmatprep.subr.bf16.mxu0 %v12045_v55 }
 0x1b4   :  { %v6571_v2 = vpop.f32.mrb[56].mxu1  ;;  %v10905_v29 = vadd.f32 %v6570_v19, %v10828_v28  ;;  %7652 = vmatmul.mubr.f32.gmra.mrb[44].mxu0 %v10659_v39  ;;  %v12062_v19 = vand.u32 4294901760, %v10634_v12  ;;  %v12066_v39 = vld [vmem:[#allocation74_spill] sm:$0xff] }
 0x1b5   :  { %v6572_v17 = vpop.f32.mrb[57].mxu1  ;;  %7787 = vmatmul.mubr.f32.gmra.mrb[162].mxu1 %v10661_v38  ;;  %8556 = vmatpush3.bf16.msra.mxu0 %v12045_v55 }
 0x1b6   :  { %v6573_v8 = vadd.f32 %v6572_v17, %v6571_v2  ;;  %7654 = vmatprep.mubr.f32.mxu0 %v10670_v49  ;;  %8558 = vmatprep.subr.bf16.mxu0 %v12047_v63  ;;  %v12063_v2 = vand.u32 4294901760, %v10641_v0  ;;  %v12064_v17 = vld [vmem:[#allocation108_spill] sm:$0xff] }
 0x1b8   :  { %v6574_v4 = vpop.f32.mrb[58].mxu1  ;;  %v10913_v16 = vadd.f32 %v6573_v8, %v10840_v21  ;;  %7655 = vmatmul.mubr.f32.gmra.mrb[46].mxu0 %v10689_v7 }
 0x1b9   :  { %v6575_v20 = vpop.f32.mrb[59].mxu1  ;;  %8560 = vmatpush3.bf16.msra.mxu0 %v12047_v63  ;;  %7689 = vmatprep.mubr.f32.mxu0 %v12057_v6 }
 0x1ba   :  { %v6576_v28 = vadd.f32 %v6575_v20, %v6574_v4  ;;  %8562 = vmatprep.subr.bf16.mxu0 %v12050_v46 }
 0x1bc   :  { %v6577_v61 = vpop.f32.mrb[60].mxu1  ;;  %v10921_v24 = vadd.f32 %v6576_v28, %v10852_v41 }
 0x1bd   :  { %v6578_v36 = vpop.f32.mrb[61].mxu1  ;;  %8564 = vmatpush3.bf16.msra.mxu0 %v12050_v46 }
 0x1be   :  { %v6579_v21 = vadd.f32 %v6578_v36, %v6577_v61  ;;  %8566 = vmatprep.subr.bf16.mxu0 %v12052_v35 }
 0x1c0   :  { %v6580_v33 = vpop.f32.mrb[62].mxu1  ;;  %v10926_v3 = vadd.f32 %v6579_v21, %v10862_v22 }
 0x1c1   :  { %v6581_v26 = vpop.f32.mrb[63].mxu1  ;;  %8568 = vmatpush3.bf16.msra.mxu0 %v12052_v35 }
 0x1c2   :  { %v6582_v59 = vadd.f32 %v6581_v26, %v6580_v33  ;;  %8570 = vmatprep.subr.bf16.mxu0 %v11914_v30 }
 0x1c4   :  { %v6759_v50 = vpop.f32.mrb[64].mxu1  ;;  %v10931_v41 = vadd.f32 %v6582_v59, %v10872_v15  ;;  %v12059_v15 = vand.u32 4294901760, %v12055_v43 }
 0x1c5   :  { %v6760_v56 = vpop.f32.mrb[65].mxu1  ;;  %8572 = vmatpush3.bf16.msra.mxu0 %v11914_v30 }
 0x1c6   :  { %v6761_v48 = vadd.f32 %v6760_v56, %v6759_v50  ;;  %8574 = vmatprep.subr.bf16.mxu0 %v11917_v5  ;;  %v12069_v50 = vld [vmem:[#allocation129_spill] sm:$0xff] }
 0x1c8   :  { %v6762_v54 = vpop.f32.mrb[66].mxu1 }
 0x1c9   :  { %v6763_v22 = vpop.f32.mrb[67].mxu1  ;;  %8576 = vmatpush3.bf16.msra.mxu0 %v11917_v5 }
 0x1ca   :  { %v6764_v57 = vadd.f32 %v6763_v22, %v6762_v54  ;;  %8578 = vmatprep.subr.bf16.mxu0 %v12058_v9 }
 0x1cc   :  { %v6765_v1 = vpop.f32.mrb[68].mxu1  ;;  %7690 = vmatmul.mubr.f32.vlgmr.msra.gmra.mrb[40].mxu0 %v12059_v15 }
 0x1cd   :  { %v6766_v62 = vpop.f32.mrb[69].mxu1  ;;  %8580 = vmatpush3.bf16.msra.mxu0 %v12058_v9  ;;  %7692 = vmatprep.mubr.f32.mxu0 %v12060_v13 }
 0x1ce   :  { %v6767_v40 = vadd.f32 %v6766_v62, %v6765_v1  ;;  %8582 = vmatprep.subr.bf16.mxu0 %v12061_v34 }
 0x1d0   :  { %v6768_v53 = vpop.f32.mrb[70].mxu1  ;;  %7693 = vmatmul.mubr.f32.gmra.mrb[42].mxu0 %v12062_v19 }
 0x1d1   :  { %v6769_v45 = vpop.f32.mrb[71].mxu1  ;;  %8584 = vmatpush3.bf16.msra.mxu0 %v12061_v34  ;;  %7695 = vmatprep.mubr.f32.mxu0 %v12063_v2 }
 0x1d2   :  { %v6770_v51 = vadd.f32 %v6769_v45, %v6768_v53  ;;  %8586 = vmatprep.subr.bf16.mxu0 %v12064_v17 }
 0x1d4   :  { %v6771_v43 = vpop.f32.mrb[72].mxu1  ;;  %7696 = vmatmul.mubr.f32.gmra.mrb[44].mxu0 %v3736_v25 }
 0x1d5   :  { %v6772_v8 = vpop.f32.mrb[73].mxu1  ;;  %8588 = vmatpush3.bf16.msra.mxu0 %v12064_v17  ;;  %7698 = vmatprep.mubr.f32.mxu0 %v3746_v47  ;;  %v12067_v47 = vld [vmem:[#allocation81_spill] sm:$0xff] }
 0x1d6   :  { %v6773_v4 = vadd.f32 %v6772_v8, %v6771_v43  ;;  %8590 = vmatprep.subr.bf16.mxu0 %v12065_v31 }
 0x1d8   :  { %v6774_v12 = vpop.f32.mrb[74].mxu1  ;;  %7699 = vmatmul.mubr.f32.gmra.mrb[46].mxu0 %v3756_v52  ;;  %v12068_v52 = vld [vmem:[#allocation128_spill] sm:$0xff] }
 0x1d9   :  { %v6775_v20 = vpop.f32.mrb[75].mxu1  ;;  %8592 = vmatpush3.bf16.msra.mxu0 %v12065_v31  ;;  %7733 = vmatprep.mubr.f32.mxu0 %v12019_v18 }
 0x1da   :  { %v6776_v28 = vadd.f32 %v6775_v20, %v6774_v12  ;;  %8594 = vmatprep.subr.bf16.mxu0 %v12066_v39 }
 0x1dc   :  { %v6777_v0 = vpop.f32.mrb[76].mxu1 }
 0x1dd   :  { %v6778_v25 = vpop.f32.mrb[77].mxu1  ;;  %8596 = vmatpush3.bf16.msra.mxu0 %v12066_v39 }
 0x1de   :  { %v6779_v61 = vadd.f32 %v6778_v25, %v6777_v0  ;;  %8598 = vmatprep.subr.bf16.mxu0 %v12067_v47 }
 0x1e0   :  { %v6780_v49 = vpop.f32.mrb[78].mxu1 }
 0x1e1   :  { %v6781_v6 = vpop.f32.mrb[79].mxu1  ;;  %8600 = vmatpush3.bf16.msra.mxu0 %v12067_v47 }
 0x1e2   :  { %v6782_v36 = vadd.f32 %v6781_v6, %v6780_v49  ;;  %8602 = vmatprep.subr.bf16.mxu0 %v12068_v52 }
 0x1e4   :  { %v6815_v7 = vpop.f32.mrb[80].mxu1 }
 0x1e5   :  { %v6816_v21 = vpop.f32.mrb[81].mxu1  ;;  %8604 = vmatpush3.bf16.msra.mxu0 %v12068_v52 }
 0x1e6   :  { %v6817_v33 = vadd.f32 %v6816_v21, %v6815_v7  ;;  %8606 = vmatprep.subr.bf16.mxu0 %v12069_v50 }
 0x1e8   :  { %v2795_v26 = vadd.f32 %v6817_v33, %v6761_v48  ;;  %v6818_v59 = vpop.f32.mrb[82].mxu1 }
 0x1e9   :  { %v6819_v56 = vpop.f32.mrb[83].mxu1  ;;  %8608 = vmatpush3.bf16.msra.mxu0 %v12069_v50 }
 0x1ea   :  { %v6820_v54 = vadd.f32 %v6819_v56, %v6818_v59  ;;  %8610 = vmatprep.subr.bf16.mxu0 %v11870_v42 }
 0x1ec   :  { %v2802_v22 = vadd.f32 %v6820_v54, %v6764_v57  ;;  %v6821_v1 = vpop.f32.mrb[84].mxu1  ;;  %7734 = vmatmul.mubr.f32.vlgmr.msra.gmra.mrb[40].mxu0 %v10596_v44 }
 0x1ed   :  { %v6822_v9 = vpop.f32.mrb[85].mxu1  ;;  %8612 = vmatpush3.bf16.msra.mxu0 %v11870_v42  ;;  %7736 = vmatprep.mubr.f32.mxu0 %v10601_v27 }
 0x1ee   :  { %v6823_v62 = vadd.f32 %v6822_v9, %v6821_v1  ;;  %8614 = vmatprep.subr.bf16.mxu0 %v11881_v60 }
 0x1f0   :  { %v2809_v48 = vadd.f32 %v6823_v62, %v6767_v40  ;;  %v6824_v15 = vpop.f32.mrb[86].mxu1  ;;  %7737 = vmatmul.mubr.f32.gmra.mrb[42].mxu0 %v10613_v37 }
 0x1f1   :  { %v6825_v13 = vpop.f32.mrb[87].mxu1  ;;  %8616 = vmatpush3.bf16.msra.mxu0 %v11881_v60  ;;  %7739 = vmatprep.mubr.f32.mxu0 %v12043_v11 }
 0x1f2   :  { %v6826_v53 = vadd.f32 %v6825_v13, %v6824_v15  ;;  %8618 = vmatprep.subr.bf16.mxu0 %v12045_v55 }
 0x1f4   :  { %v2816_v57 = vadd.f32 %v6826_v53, %v6770_v51  ;;  %v6827_v34 = vpop.f32.mrb[88].mxu1  ;;  %7740 = vmatmul.mubr.f32.gmra.mrb[44].mxu0 %v10636_v32 }
 0x1f5   :  { %v6828_v45 = vpop.f32.mrb[89].mxu1  ;;  %8620 = vmatpush3.bf16.msra.mxu0 %v12045_v55  ;;  %7742 = vmatprep.mubr.f32.mxu0 %v10643_v58 }
 0x1f6   :  { %v6829_v42 = vadd.f32 %v6828_v45, %v6827_v34  ;;  %8622 = vmatprep.subr.bf16.mxu0 %v12047_v63 }
 0x1f8   :  { %v2823_v40 = vadd.f32 %v6829_v42, %v6773_v4  ;;  %v6830_v19 = vpop.f32.mrb[90].mxu1  ;;  %7743 = vmatmul.mubr.f32.gmra.mrb[46].mxu0 %v10661_v38 }
 0x1f9   :  { %v6831_v2 = vpop.f32.mrb[91].mxu1  ;;  %8624 = vmatpush3.bf16.msra.mxu0 %v12047_v63  ;;  %7777 = vmatprep.mubr.f32.mxu0 %v12019_v18 }
 0x1fa   :  { %v6832_v60 = vadd.f32 %v6831_v2, %v6830_v19  ;;  %8626 = vmatprep.subr.bf16.mxu0 %v12050_v46 }
 0x1fc   :  { %v2830_v11 = vadd.f32 %v6832_v60, %v6776_v28  ;;  %v6833_v51 = vpop.f32.mrb[92].mxu1 }
 0x1fd   :  { %v6834_v32 = vpop.f32.mrb[93].mxu1  ;;  %8628 = vmatpush3.bf16.msra.mxu0 %v12050_v46 }
 0x1fe   :  { %v6835_v55 = vadd.f32 %v6834_v32, %v6833_v51  ;;  %8630 = vmatprep.subr.bf16.mxu0 %v12052_v35 }
 0x200   :  { %v2837_v58 = vadd.f32 %v6835_v55, %v6779_v61  ;;  %v6836_v43 = vpop.f32.mrb[94].mxu1 }
 0x201   :  { %v6837_v17 = vpop.f32.mrb[95].mxu1  ;;  %8632 = vmatpush3.bf16.msra.mxu0 %v12052_v35 }
 0x202   :  { %v6838_v8 = vadd.f32 %v6837_v17, %v6836_v43  ;;  %8634 = vmatprep.subr.bf16.mxu0 %v11914_v30 }
 0x204   :  { %v2844_v38 = vadd.f32 %v6838_v8, %v6782_v36  ;;  %v6871_v63 = vpop.f32.mrb[96].mxu1 }
 0x205   :  { %v6872_v18 = vpop.f32.mrb[97].mxu1  ;;  %8636 = vmatpush3.bf16.msra.mxu0 %v11914_v30 }
 0x206   :  { %v6873_v4 = vadd.f32 %v6872_v18, %v6871_v63  ;;  %8638 = vmatprep.subr.bf16.mxu0 %v11917_v5 }
 0x208   :  { %v2982_v12 = vadd.f32 %v6873_v4, %v2795_v26  ;;  %v6874_v31 = vpop.f32.mrb[98].mxu1 }
 0x209   :  { %v6875_v46 = vpop.f32.mrb[99].mxu1  ;;  %8640 = vmatpush3.bf16.msra.mxu0 %v11917_v5 }
 0x20a   :  { %v6876_v20 = vadd.f32 %v6875_v46, %v6874_v31 }
 0x20c   :  { %v2991_v28 = vadd.f32 %v6876_v20, %v2802_v22  ;;  %v6877_v0 = vpop.f32.mrb[100].mxu1  ;;  %7778 = vmatmul.mubr.f32.vlgmr.msra.gmra.mrb[40].mxu0 %v10596_v44 }
 0x20d   :  { %v6878_v39 = vpop.f32.mrb[101].mxu1  ;;  %7780 = vmatprep.mubr.f32.mxu0 %v10601_v27 }
 0x20e   :  { %v6879_v35 = vadd.f32 %v6878_v39, %v6877_v0 }
 0x210   :  { %v3000_v25 = vadd.f32 %v6879_v35, %v2809_v48  ;;  %v6880_v61 = vpop.f32.mrb[102].mxu1  ;;  %7781 = vmatmul.mubr.f32.gmra.mrb[42].mxu0 %v10613_v37 }
 0x211   :  { %v6881_v49 = vpop.f32.mrb[103].mxu1 }
 0x212   :  { %v6882_v30 = vadd.f32 %v6881_v49, %v6880_v61 }
 0x214   :  { %v3009_v47 = vadd.f32 %v6882_v30, %v2816_v57  ;;  %v6883_v6 = vpop.f32.mrb[104].mxu1 }
 0x215   :  { %v6884_v36 = vpop.f32.mrb[105].mxu1 }
 0x216   :  { %v6885_v7 = vadd.f32 %v6884_v36, %v6883_v6 }
 0x218   :  { %v3018_v52 = vadd.f32 %v6885_v7, %v2823_v40  ;;  %v6886_v5 = vpop.f32.mrb[106].mxu1 }
 0x219   :  { %v6887_v21 = vpop.f32.mrb[107].mxu1 }
 0x21a   :  { %v6888_v33 = vadd.f32 %v6887_v21, %v6886_v5 }
 0x21c   :  { %v3027_v26 = vadd.f32 %v6888_v33, %v2830_v11  ;;  %v6889_v59 = vpop.f32.mrb[108].mxu1 }
 0x21d   :  { %v6890_v50 = vpop.f32.mrb[109].mxu1 }
 0x21e   :  { %v6891_v44 = vadd.f32 %v6890_v50, %v6889_v59 }
 0x21f   :  { %v7515_v22 = vpop.f32.mrb[32].mxu0 }
 0x220   :  { %v3036_v56 = vadd.f32 %v6891_v44, %v2837_v58  ;;  %v6892_v27 = vpop.f32.mrb[110].mxu1  ;;  %v10996_v9 = vadd.f32 %v7515_v22, %v10886_v14  ;;  %v2279_v37 = vpop.f32.mrb[33].mxu0 }
 0x221   :  { %v6893_v54 = vpop.f32.mrb[111].mxu1  ;;  %v10999_v62 = vadd.f32 %v2279_v37, %v10877_v10 }
 0x222   :  { %v6894_v1 = vadd.f32 %v6893_v54, %v6892_v27 }
 0x223   :  { %v7518_v53 = vpop.f32.mrb[34].mxu0 }
 0x224   :  { %v3045_v48 = vadd.f32 %v6894_v1, %v2844_v38  ;;  %v6927_v15 = vpop.f32.mrb[112].mxu1  ;;  %v11002_v34 = vadd.f32 %v7518_v53, %v10905_v29  ;;  %v2291_v45 = vpop.f32.mrb[35].mxu0 }
 0x225   :  { %v6928_v13 = vpop.f32.mrb[113].mxu1  ;;  %v11005_v42 = vadd.f32 %v2291_v45, %v10896_v23 }
 0x226   :  { %v6929_v57 = vadd.f32 %v6928_v13, %v6927_v15 }
 0x227   :  { %v7521_v2 = vpop.f32.mrb[36].mxu0 }
 0x228   :  { %v3153_v40 = vadd.f32 %v6929_v57, %v2982_v12  ;;  %v6930_v19 = vpop.f32.mrb[114].mxu1  ;;  %v11008_v10 = vadd.f32 %v7521_v2, %v10921_v24  ;;  %v2303_v11 = vpop.f32.mrb[37].mxu0 }
 0x229   :  { %v6931_v14 = vpop.f32.mrb[115].mxu1  ;;  %v11011_v51 = vadd.f32 %v2303_v11, %v10913_v16 }
 0x22a   :  { %v6932_v60 = vadd.f32 %v6931_v14, %v6930_v19 }
 0x22b   :  { %v7524_v58 = vpop.f32.mrb[38].mxu0 }
 0x22c   :  { %v3164_v32 = vadd.f32 %v6932_v60, %v2991_v28  ;;  %v6933_v55 = vpop.f32.mrb[116].mxu1  ;;  %v11014_v23 = vadd.f32 %v7524_v58, %v10931_v41  ;;  %v2315_v17 = vpop.f32.mrb[39].mxu0 }
 0x22d   :  { %v6934_v29 = vpop.f32.mrb[117].mxu1  ;;  %v11017_v8 = vadd.f32 %v2315_v17, %v10926_v3 }
 0x22e   :  { %v6935_v43 = vadd.f32 %v6934_v29, %v6933_v55 }
 0x230   :  { %v3175_v38 = vadd.f32 %v6935_v43, %v3000_v25  ;;  %v6936_v63 = vpop.f32.mrb[118].mxu1 }
 0x231   :  { %v6937_v24 = vpop.f32.mrb[119].mxu1 }
 0x232   :  { %v6938_v18 = vadd.f32 %v6937_v24, %v6936_v63 }
 0x234   :  { %v3186_v4 = vadd.f32 %v6938_v18, %v3009_v47  ;;  %v6939_v12 = vpop.f32.mrb[120].mxu1 }
 0x235   :  { %v6940_v16 = vpop.f32.mrb[121].mxu1 }
 0x236   :  { %v6941_v31 = vadd.f32 %v6940_v16, %v6939_v12 }
 0x238   :  { %v3197_v46 = vadd.f32 %v6941_v31, %v3018_v52  ;;  %v6942_v20 = vpop.f32.mrb[122].mxu1 }
 0x239   :  { %v6943_v28 = vpop.f32.mrb[123].mxu1 }
 0x23a   :  { %v6944_v0 = vadd.f32 %v6943_v28, %v6942_v20 }
 0x23c   :  { %v3208_v39 = vadd.f32 %v6944_v0, %v3027_v26  ;;  %v6945_v35 = vpop.f32.mrb[124].mxu1 }
 0x23d   :  { %v6946_v41 = vpop.f32.mrb[125].mxu1 }
 0x23e   :  { %v6947_v61 = vadd.f32 %v6946_v41, %v6945_v35 }
 0x240   :  { %v3219_v49 = vadd.f32 %v6947_v61, %v3036_v56  ;;  %v6948_v30 = vpop.f32.mrb[126].mxu1 }
 0x241   :  { %v6949_v3 = vpop.f32.mrb[127].mxu1 }
 0x242   :  { %v6950_v6 = vadd.f32 %v6949_v3, %v6948_v30 }
 0x244   :  { %v3230_v25 = vadd.f32 %v6950_v6, %v3045_v48  ;;  %v6983_v36 = vpop.f32.mrb[128].mxu1 }
 0x245   :  { %v6984_v7 = vpop.f32.mrb[129].mxu1 }
 0x246   :  { %v6985_v5 = vadd.f32 %v6984_v7, %v6983_v36  ;;  %v127_v7 = vld [vmem:[#allocation7 + $0x8] sm:$0xff] }
 0x248   :  { %v3398_v47 = vadd.f32 %v6985_v5, %v3153_v40  ;;  %v6986_v21 = vpop.f32.mrb[130].mxu1  ;;  %v11027_v5 = vld [vmem:[#allocation7] sm:$0xff] }
 0x249   :  { %v6987_v33 = vpop.f32.mrb[131].mxu1 }
 0x24a   :  { %v6988_v59 = vadd.f32 %v6987_v33, %v6986_v21  ;;  %v11029_v33 = vand.u32 4294901760, %v127_v7 }
 0x24c   :  { %v3405_v52 = vadd.f32 %v6988_v59, %v3164_v32  ;;  %v6989_v50 = vpop.f32.mrb[132].mxu1  ;;  %v11032_v59 = vand.u32 4294901760, %v11027_v5  ;;  %4627 = vmatprep.subr.mxu1 %v11029_v33 }
 0x24d   :  { %v6990_v44 = vpop.f32.mrb[133].mxu1 }
 0x24e   :  { %v6991_v27 = vadd.f32 %v6990_v44, %v6989_v50  ;;  %4629 = vmatpush1.msra.mxu1 %v11032_v59 }
 0x250   :  { %v3412_v26 = vadd.f32 %v6991_v27, %v3175_v38  ;;  %v6992_v54 = vpop.f32.mrb[134].mxu1  ;;  %v11039_v27 = vsub.f32 %v127_v7, %v11029_v33 }
 0x251   :  { %v6993_v22 = vpop.f32.mrb[135].mxu1 }
 0x252   :  { %v6994_v1 = vadd.f32 %v6993_v22, %v6992_v54 }
 0x254   :  { %v3419_v56 = vadd.f32 %v6994_v1, %v3186_v4  ;;  %v6995_v37 = vpop.f32.mrb[136].mxu1  ;;  %v4783_v1 = vand.u32 4294901760, %v11039_v27 }
 0x255   :  { %v6996_v15 = vpop.f32.mrb[137].mxu1 }
 0x256   :  { %v6997_v13 = vadd.f32 %v6996_v15, %v6995_v37  ;;  %v4784_v37 = vsub.f32 %v11039_v27, %v4783_v1 }
 0x258   :  { %v3426_v48 = vadd.f32 %v6997_v13, %v3197_v46  ;;  %v6998_v53 = vpop.f32.mrb[138].mxu1 }
 0x259   :  { %v6999_v57 = vpop.f32.mrb[139].mxu1 }
 0x25a   :  { %v7000_v45 = vadd.f32 %v6999_v57, %v6998_v53  ;;  %v4785_v53 = vand.u32 4294901760, %v4784_v37 }
 0x25c   :  { %v3433_v40 = vadd.f32 %v7000_v45, %v3208_v39  ;;  %v7001_v19 = vpop.f32.mrb[140].mxu1  ;;  %4786 = vmatprep.subr.mxu1 %v4785_v53 }
 0x25d   :  { %v7002_v14 = vpop.f32.mrb[141].mxu1 }
 0x25e   :  { %v7003_v2 = vadd.f32 %v7002_v14, %v7001_v19 }
 0x260   :  { %v3440_v60 = vadd.f32 %v7003_v2, %v3219_v49  ;;  %v7004_v11 = vpop.f32.mrb[142].mxu1 }
 0x261   :  { %v7005_v32 = vpop.f32.mrb[143].mxu1 }
 0x262   :  { %v7006_v55 = vadd.f32 %v7005_v32, %v7004_v11  ;;  %v4550_v11 = vmul.f32 0.020833334, %v11008_v10 }
 0x264   :  { %v3447_v29 = vadd.f32 %v7006_v55, %v3230_v25  ;;  %v7039_v58 = vpop.f32.mrb[144].mxu1 }
 0x265   :  { %v7040_v43 = vpop.f32.mrb[145].mxu1 }
 0x266   :  { %v7041_v17 = vadd.f32 %v7040_v43, %v7039_v58 }
 0x268   :  { %v7042_v38 = vpop.f32.mrb[146].mxu1  ;;  %v11019_v63 = vadd.f32 %v7041_v17, %v3398_v47  ;;  %v128_v47 = vld [vmem:[#allocation7 + $0x10] sm:$0xff] }
 0x269   :  { %v7043_v24 = vpop.f32.mrb[147].mxu1  ;;  %v11035_v50 = vand.u32 4294901760, %v128_v47 }
 0x26a   :  { %v7044_v18 = vadd.f32 %v7043_v24, %v7042_v38  ;;  %v4566_v24 = vmul.f32 %v4550_v11, %v4550_v11 }
 0x26b   :  { %7789 = vmatprep.subr.mxu0 %v11035_v50 }
 0x26c   :  { %v7045_v4 = vpop.f32.mrb[148].mxu1  ;;  %v11021_v12 = vadd.f32 %v7044_v18, %v3405_v52  ;;  %v9043_v52 = vmov 0.0   ;;  %7790 = vmatpush3.msra.mxu0 %v11035_v50  ;;  %v4552_v18 = vmul.f32 0.020833334, %v11014_v23  ;;  %v4546_v23 = vmul.f32 0.020833334, %v10996_v9 }
 0x26d   :  { %v7046_v16 = vpop.f32.mrb[149].mxu1  ;;  %4692 = vmatprep.mubr.f32.mxu1 %v9043_v52 }
 0x26e   :  { %v7047_v31 = vadd.f32 %v7046_v16, %v7045_v4  ;;  %v4562_v37 = vmul.f32 %v4546_v23, %v4546_v23 }
 0x270   :  { %v7048_v46 = vpop.f32.mrb[150].mxu1  ;;  %v11023_v20 = vadd.f32 %v7047_v31, %v3412_v26 }
 0x271   :  { %v7049_v28 = vpop.f32.mrb[151].mxu1 }
 0x272   :  { %v7050_v0 = vadd.f32 %v7049_v28, %v7048_v46  ;;  %v4551_v28 = vmul.f32 0.020833334, %v11017_v8 }
 0x274   :  { %v7051_v39 = vpop.f32.mrb[152].mxu1  ;;  %v11025_v35 = vadd.f32 %v7050_v0, %v3419_v56 }
 0x275   :  { %v7052_v41 = vpop.f32.mrb[153].mxu1 }
 0x276   :  { %v7053_v61 = vadd.f32 %v7052_v41, %v7051_v39 }
 0x278   :  { %v7054_v49 = vpop.f32.mrb[154].mxu1  ;;  %v3579_v30 = vadd.f32 %v7053_v61, %v3426_v48 }
 0x279   :  { %v7055_v3 = vpop.f32.mrb[155].mxu1 }
 0x27a   :  { %v7056_v6 = vadd.f32 %v7055_v3, %v7054_v49  ;;  %v4567_v3 = vmul.f32 %v4551_v28, %v4551_v28 }
 0x27c   :  { %v7057_v25 = vpop.f32.mrb[156].mxu1  ;;  %v3586_v36 = vadd.f32 %v7056_v6, %v3433_v40  ;;  %v11049_v40 = vsub.f32 %v128_v47, %v11035_v50  ;;  %v4545_v47 = vmul.f32 0.020833334, %v10999_v62 }
 0x27d   :  { %v7058_v21 = vpop.f32.mrb[157].mxu1 }
 0x27e   :  { %v7059_v44 = vadd.f32 %v7058_v21, %v7057_v25  ;;  %v11052_v19 = vand.u32 4294901760, %v11049_v40  ;;  %v4561_v53 = vmul.f32 %v4545_v47, %v4545_v47 }
 0x280   :  { %v7060_v26 = vpop.f32.mrb[158].mxu1  ;;  %v3593_v54 = vadd.f32 %v7059_v44, %v3440_v60  ;;  %v5584_v14 = vsub.f32 %v11049_v40, %v11052_v19 }
 0x281   :  { %v7061_v22 = vpop.f32.mrb[159].mxu1 }
 0x282   :  { %v7062_v56 = vadd.f32 %v7061_v22, %v7060_v26  ;;  %v11056_v2 = vand.u32 4294901760, %v5584_v14 }
 0x284   :  { %v7785_v15 = vpop.f32.mrb[160].mxu1  ;;  %v3600_v13 = vadd.f32 %v7062_v56, %v3447_v29  ;;  %7803 = vmatprep.subr.mxu0 %v11056_v2  ;;  %v4549_v29 = vmul.f32 0.020833334, %v11011_v51  ;;  %v4568_v51 = vmul.f32 %v4552_v18, %v4552_v18 }
 0x285   :  { %v4523_v48 = vpop.f32.mrb[161].mxu1 }
 0x286   :  { %v4565_v46 = vmul.f32 %v4549_v29, %v4549_v29 }
 0x288   :  { %v7788_v57 = vpop.f32.mrb[162].mxu1 }
 0x289   :  { %v4535_v45 = vpop.f32.mrb[163].mxu1 }
 0x2c7   :  { %v7741_v60 = vpop.f32.mrb[44].mxu0 }
 0x2c8   :  { %v8669_v32 = vadd.f32 %v7741_v60, %v3586_v36  ;;  %v4394_v55 = vpop.f32.mrb[45].mxu0 }
 0x2c9   :  { %v8671_v58 = vadd.f32 %v4394_v55, %v3579_v30 }
 0x2ca   :  { %v8670_v43 = vadd.f32 %v8669_v32, %v7785_v15  ;;  %v4548_v15 = vmul.f32 0.020833334, %v11002_v34 }
 0x2cb   :  { %v8672_v17 = vadd.f32 %v8671_v58, %v4523_v48  ;;  %v7744_v38 = vpop.f32.mrb[46].mxu0 }
 0x2cc   :  { %v4558_v4 = vmul.f32 0.020833334, %v8670_v43  ;;  %v8673_v16 = vadd.f32 %v7744_v38, %v3600_v13  ;;  %v4406_v31 = vpop.f32.mrb[47].mxu0  ;;  %v4547_v13 = vmul.f32 0.020833334, %v11005_v42  ;;  %v4564_v55 = vmul.f32 %v4548_v15, %v4548_v15 }
 0x2cd   :  { %v4557_v0 = vmul.f32 0.020833334, %v8672_v17  ;;  %v8675_v39 = vadd.f32 %v4406_v31, %v3593_v54 }
 0x2ce   :  { %v4574_v10 = vsub.f32 %v4558_v4, %v4566_v24  ;;  %v8674_v41 = vadd.f32 %v8673_v16, %v7788_v57  ;;  %v4563_v58 = vmul.f32 %v4547_v13, %v4547_v13 }
 0x2cf   :  { %v4573_v61 = vsub.f32 %v4557_v0, %v4565_v46  ;;  %v8676_v49 = vadd.f32 %v8675_v39, %v4535_v45  ;;  %v11074_v39 = vsub.f32 %v11027_v5, %v11032_v59 }
 0x2d0   :  { %v4560_v30 = vmul.f32 0.020833334, %v8674_v41  ;;  %v4582_v21 = vmax.f32 %v4574_v10, 0.0 }
 0x2d1   :  { %v4559_v6 = vmul.f32 0.020833334, %v8676_v49  ;;  %v4581_v7 = vmax.f32 %v4573_v61, 0.0 }
 0x2d2   :  { %v4576_v25 = vsub.f32 %v4560_v30, %v4568_v51  ;;  %v4590_v57 = vadd.f32 1e-05, %v4582_v21 }
 0x2d3   :  { %v4575_v36 = vsub.f32 %v4559_v6, %v4567_v3  ;;  %v4589_v8 = vadd.f32 1e-05, %v4581_v7 }
 0x2d4   :  { %v4584_v62 = vmax.f32 %v4576_v25, 0.0 }
 0x2d5   :  { %v4583_v22 = vmax.f32 %v4575_v36, 0.0  ;;  %8882 = vrsqrt.f32 %v4589_v8  ;;  %v4789_v36 = vand.u32 4294901760, %v11074_v39 }
 0x2d6   :  { %8884 = vrsqrt.f32 %v4590_v57  ;;  %v4592_v17 = vadd.f32 1e-05, %v4584_v62 }
 0x2d7   :  { %v4591_v11 = vadd.f32 1e-05, %v4583_v22 }
 0x2d9   :  { %8886 = vrsqrt.f32 %v4591_v11 }
 0x2df   :  { %v7779_v44 = vpop.f32.mrb[40].mxu0  ;;  %v8883_v46 = vpop.eup %8882 }
 0x2e0   :  { %v8665_v26 = vadd.f32 %v7779_v44, %v11021_v12  ;;  %v4499_v54 = vpop.f32.mrb[41].mxu0  ;;  %v4615_v28 = vsel %vm4601_vm0, %v8883_v46, 0  ;;  %v8885_v0 = vpop.eup %8884 }
 0x2e1   :  { %v8666_v56 = vadd.f32 %v4499_v54, %v11019_v63  ;;  %v11076_v61 = vand.u32 4294901760, %v4615_v28  ;;  %v4618_v30 = vsel %vm4601_vm0, %v8885_v0, 0 }
 0x2e2   :  { %v4554_v48 = vmul.f32 0.020833334, %v8665_v26  ;;  %v11093_v44 = vand.u32 4294901760, %v4618_v30 }
 0x2e3   :  { %v4553_v9 = vmul.f32 0.020833334, %v8666_v56  ;;  %v7782_v45 = vpop.f32.mrb[42].mxu0  ;;  %v8887_v10 = vpop.eup %8886  ;;  %v11091_v21 = vsub.f32 %v4615_v28, %v11076_v61 }
 0x2e4   :  { %v4570_v14 = vsub.f32 %v4554_v48, %v4562_v37  ;;  %v8667_v60 = vadd.f32 %v7782_v45, %v11025_v35  ;;  %v4511_v12 = vpop.f32.mrb[43].mxu0  ;;  %v4621_v7 = vsel %vm4601_vm0, %v8887_v10, 0  ;;  %v4790_v37 = vsub.f32 %v11074_v39, %v4789_v36 }
 0x2e5   :  { %v4569_v32 = vsub.f32 %v4553_v9, %v4561_v53  ;;  %v8668_v63 = vadd.f32 %v4511_v12, %v11023_v20  ;;  %v11099_v22 = vand.u32 4294901760, %v4621_v7  ;;  %v11122_v62 = vsub.f32 %v4618_v30, %v11093_v44 }
 0x2e6   :  { %v4578_v29 = vmax.f32 %v4570_v14, 0.0  ;;  %v4556_v34 = vmul.f32 0.020833334, %v8667_v60  ;;  %v11132_v11 = vand.u32 4294901760, %v11091_v21 }
 0x2e7   :  { %v4577_v42 = vmax.f32 %v4569_v32, 0.0  ;;  %v4555_v43 = vmul.f32 0.020833334, %v8668_v63  ;;  %v11135_v32 = vsub.f32 %v4621_v7, %v11099_v22  ;;  %v4791_v63 = vand.u32 4294901760, %v4790_v37 }
 0x2e8   :  { %v4586_v38 = vadd.f32 1e-05, %v4578_v29  ;;  %v4572_v24 = vsub.f32 %v4556_v34, %v4564_v55 }
 0x2e9   :  { %v4585_v18 = vadd.f32 1e-05, %v4577_v42  ;;  %v4571_v4 = vsub.f32 %v4555_v43, %v4563_v58  ;;  %v11146_v43 = vand.u32 4294901760, %v11122_v62 }
 0x2ea   :  { %8888 = vrsqrt.f32 %v4586_v38  ;;  %v4580_v35 = vmax.f32 %v4572_v24, 0.0  ;;  %v4740_v24 = vsub.f32 %v11091_v21, %v11132_v11 }
 0x2eb   :  { %8890 = vrsqrt.f32 %v4585_v18  ;;  %v4579_v16 = vmax.f32 %v4571_v4, 0.0  ;;  %v11156_v18 = vand.u32 4294901760, %v11135_v32 }
 0x2ec   :  { %8892 = vrsqrt.f32 %v4592_v17  ;;  %v4588_v31 = vadd.f32 1e-05, %v4580_v35 }
 0x2ed   :  { %v4587_v20 = vadd.f32 1e-05, %v4579_v16  ;;  %v4751_v16 = vsub.f32 %v11122_v62, %v11146_v43  ;;  %v4762_v46 = vsub.f32 %v11135_v32, %v11156_v18 }
 0x2ee   :  { %8894 = vrsqrt.f32 %v4588_v31 }
 0x2ef   :  { %8896 = vrsqrt.f32 %v4587_v20  ;;  %v4741_v20 = vand.u32 4294901760, %v4740_v24  ;;  %v4763_v0 = vand.u32 4294901760, %v4762_v46  ;;  %v8935_v24 = vld [vmem:[#allocation2 + $0x68] sm:$0xff] }
 0x2f4   :  { %v8889_v41 = vpop.eup %8888 }
 0x2f5   :  { %v8891_v49 = vpop.eup %8890  ;;  %v4606_v51 = vsel %vm4601_vm0, %v8889_v41, 0 }
 0x2f6   :  { %v8893_v3 = vpop.eup %8892  ;;  %v11080_v6 = vand.u32 4294901760, %v4606_v51  ;;  %v4603_v25 = vsel %vm4601_vm0, %v8891_v49, 0  ;;  %v8921_v49 = vld [vmem:[#allocation2 + $0x40] sm:$0xff] }
 0x2f7   :  { %v11085_v5 = vand.u32 4294901760, %v4603_v25  ;;  %v4624_v56 = vsel %vm4601_vm0, %v8893_v3, 0 }
 0x2f8   :  { %v8895_v23 = vpop.eup %8894  ;;  %v11088_v47 = vsub.f32 %v4606_v51, %v11080_v6  ;;  %v11124_v14 = vand.u32 4294901760, %v4624_v56 }
 0x2f9   :  { %v8897_v8 = vpop.eup %8896  ;;  %v11096_v26 = vsub.f32 %v4603_v25, %v11085_v5  ;;  %v4612_v54 = vsel %vm4601_vm0, %v8895_v23, 0  ;;  %v8923_v25 = vld [vmem:[#allocation2 + $0x70] sm:$0xff] }
 0x2fa   :  { %v11106_v15 = vand.u32 4294901760, %v11088_v47  ;;  %v4609_v13 = vsel %vm4601_vm0, %v8897_v8, 0  ;;  %v11109_v48 = vand.u32 4294901760, %v4612_v54  ;;  %v11149_v17 = vsub.f32 %v4624_v56, %v11124_v14  ;;  %v8927_v56 = vld [vmem:[#allocation2 + $0x8] sm:$0xff] }
 0x2fb   :  { %v11112_v53 = vand.u32 4294901760, %v11096_v26  ;;  %v11114_v57 = vand.u32 4294901760, %v4609_v13 }
 0x2fc   :  { %v4707_v9 = vsub.f32 %v11088_v47, %v11106_v15  ;;  %v11119_v45 = vsub.f32 %v4612_v54, %v11109_v48  ;;  %v11163_v31 = vand.u32 4294901760, %v11149_v17 }
 0x2fd   :  { %v4696_v60 = vsub.f32 %v11096_v26, %v11112_v53  ;;  %v11129_v12 = vsub.f32 %v4609_v13, %v11114_v57  ;;  %v8928_v13 = vld [vmem:[#allocation2 + $0x18] sm:$0xff] }
 0x2fe   :  { %v11138_v55 = vand.u32 4294901760, %v11119_v45  ;;  %v4708_v58 = vand.u32 4294901760, %v4707_v9  ;;  %v4773_v28 = vsub.f32 %v11149_v17, %v11163_v31 }
 0x2ff   :  { %v4697_v29 = vand.u32 4294901760, %v4696_v60  ;;  %v11141_v34 = vand.u32 4294901760, %v11129_v12 }
 0x300   :  { %v4729_v42 = vsub.f32 %v11119_v45, %v11138_v55  ;;  %v4774_v10 = vand.u32 4294901760, %v4773_v28  ;;  %v8938_v28 = vld [vmem:[#allocation2 + $0x90] sm:$0xff] }
 0x301   :  { %4698 = vmatmul.mubr.f32.vlgmr.msra.gmra.mrb[164].mxu1 %v4697_v29  ;;  %7791 = vmatprep.mubr.f32.mxu0 %v4697_v29  ;;  %v4718_v38 = vsub.f32 %v11129_v12, %v11141_v34 }
 0x302   :  { %4792 = vmatpush1.msra.mxu1 %v4791_v63  ;;  %7792 = vmatmul.mubr.f32.vlgmr.msra.gmra.mrb[48].mxu0 %v4708_v58  ;;  %v4730_v35 = vand.u32 4294901760, %v4729_v42  ;;  %v8932_v63 = vld [vmem:[#allocation2 + $0x48] sm:$0xff] }
 0x303   :  { %4703 = vmatprep.mubr.f32.mxu1 %v9043_v52  ;;  %v4719_v4 = vand.u32 4294901760, %v4718_v38  ;;  %7804 = vmatpush3.msra.mxu0 %v11056_v2  ;;  %v4752_v2 = vand.u32 4294901760, %v4751_v16 }
 0x304   :  { %4914 = vmatprep.subr.mxu1 %v11039_v27  ;;  %7817 = vmatprep.subr.mxu0 %v11049_v40 }
 0x305   :  { %4709 = vmatmul.mubr.f32.gmra.mrb[166].mxu1 %v4708_v58  ;;  %7794 = vmatprep.mubr.f32.mxu0 %v4719_v4 }
 0x306   :  { %7795 = vmatmul.mubr.f32.gmra.mrb[50].mxu0 %v4730_v35  ;;  %4714 = vmatprep.mubr.f32.mxu1 %v9043_v52 }
 0x307   :  { %7797 = vmatprep.mubr.f32.mxu0 %v4741_v20 }
 0x309   :  { %4720 = vmatmul.mubr.f32.gmra.mrb[168].mxu1 %v4719_v4 }
 0x30a   :  { %7798 = vmatmul.mubr.f32.gmra.mrb[52].mxu0 %v4752_v2  ;;  %4725 = vmatprep.mubr.f32.mxu1 %v9043_v52 }
 0x30b   :  { %7800 = vmatprep.mubr.f32.mxu0 %v4763_v0 }
 0x30d   :  { %4731 = vmatmul.mubr.f32.gmra.mrb[170].mxu1 %v4730_v35  ;;  %v8936_v35 = vld [vmem:[#allocation2 + $0x78] sm:$0xff] }
 0x30e   :  { %7801 = vmatmul.mubr.f32.gmra.mrb[54].mxu0 %v4774_v10  ;;  %4736 = vmatprep.mubr.f32.mxu1 %v9043_v52 }
 0x30f   :  { %7805 = vmatprep.mubr.f32.mxu0 %v11085_v5 }
 0x311   :  { %4742 = vmatmul.mubr.f32.gmra.mrb[172].mxu1 %v4741_v20  ;;  %v8937_v20 = vld [vmem:[#allocation2 + $0x80] sm:$0xff] }
 0x312   :  { %7806 = vmatmul.mubr.f32.vlgmr.msra.gmra.mrb[48].mxu0 %v11080_v6  ;;  %4747 = vmatprep.mubr.f32.mxu1 %v9043_v52 }
 0x313   :  { %7808 = vmatprep.mubr.f32.mxu0 %v11114_v57  ;;  %7818 = vmatpush3.msra.mxu0 %v11049_v40 }
 0x314   :  { %7831 = vmatprep.subr.mxu0 %v11035_v50 }
 0x315   :  { %4753 = vmatmul.mubr.f32.gmra.mrb[174].mxu1 %v4752_v2 }
 0x316   :  { %7809 = vmatmul.mubr.f32.gmra.mrb[50].mxu0 %v11109_v48  ;;  %4758 = vmatprep.mubr.f32.mxu1 %v9043_v52 }
 0x317   :  { %7811 = vmatprep.mubr.f32.mxu0 %v11076_v61 }
 0x319   :  { %4764 = vmatmul.mubr.f32.gmra.mrb[176].mxu1 %v4763_v0 }
 0x31a   :  { %7812 = vmatmul.mubr.f32.gmra.mrb[52].mxu0 %v11093_v44  ;;  %4769 = vmatprep.mubr.f32.mxu1 %v9043_v52 }
 0x31b   :  { %7814 = vmatprep.mubr.f32.mxu0 %v11099_v22 }
 0x31d   :  { %4775 = vmatmul.mubr.f32.gmra.mrb[178].mxu1 %v4774_v10 }
 0x31e   :  { %7815 = vmatmul.mubr.f32.gmra.mrb[54].mxu0 %v11124_v14  ;;  %4855 = vmatprep.mubr.f32.mxu1 %v9043_v52 }
 0x31f   :  { %7819 = vmatprep.mubr.f32.mxu0 %v11096_v26 }
 0x321   :  { %4857 = vmatmul.mubr.f32.vlgmr.msra.gmra.mrb[164].mxu1 %v11085_v5 }
 0x322   :  { %4917 = vmatpush1.msra.mxu1 %v11074_v39  ;;  %7820 = vmatmul.mubr.f32.vlgmr.msra.gmra.mrb[48].mxu0 %v11088_v47  ;;  %v8920_v39 = vld [vmem:[#allocation2 + $0x58] sm:$0xff] }
 0x323   :  { %7822 = vmatprep.mubr.f32.mxu0 %v11129_v12  ;;  %4862 = vmatprep.mubr.f32.mxu1 %v9043_v52 }
 0x324   :  { %7832 = vmatpush3.msra.mxu0 %v11035_v50  ;;  %5046 = vmatprep.subr.mxu1 %v11029_v33 }
 0x325   :  { %4864 = vmatmul.mubr.f32.gmra.mrb[166].mxu1 %v11080_v6  ;;  %7845 = vmatprep.subr.mxu0 %v11052_v19 }
 0x326   :  { %7823 = vmatmul.mubr.f32.gmra.mrb[50].mxu0 %v11119_v45  ;;  %4869 = vmatprep.mubr.f32.mxu1 %v9043_v52 }
 0x327   :  { %7825 = vmatprep.mubr.f32.mxu0 %v11091_v21 }
 0x329   :  { %4871 = vmatmul.mubr.f32.gmra.mrb[168].mxu1 %v11114_v57 }
 0x32a   :  { %7826 = vmatmul.mubr.f32.gmra.mrb[52].mxu0 %v11122_v62  ;;  %4876 = vmatprep.mubr.f32.mxu1 %v9043_v52 }
 0x32b   :  { %7828 = vmatprep.mubr.f32.mxu0 %v11135_v32 }
 0x32d   :  { %4878 = vmatmul.mubr.f32.gmra.mrb[170].mxu1 %v11109_v48 }
 0x32e   :  { %7829 = vmatmul.mubr.f32.gmra.mrb[54].mxu0 %v11149_v17  ;;  %4883 = vmatprep.mubr.f32.mxu1 %v9043_v52 }
 0x32f   :  { %7833 = vmatprep.mubr.f32.mxu0 %v11112_v53 }
 0x331   :  { %4885 = vmatmul.mubr.f32.gmra.mrb[172].mxu1 %v11076_v61 }
 0x332   :  { %7834 = vmatmul.mubr.f32.vlgmr.msra.gmra.mrb[48].mxu0 %v11106_v15  ;;  %4890 = vmatprep.mubr.f32.mxu1 %v9043_v52 }
 0x333   :  { %7836 = vmatprep.mubr.f32.mxu0 %v11141_v34  ;;  %7846 = vmatpush3.msra.mxu0 %v11052_v19 }
 0x334   :  { %7859 = vmatprep.subr.mxu0 %v11035_v50 }
 0x335   :  { %4892 = vmatmul.mubr.f32.gmra.mrb[174].mxu1 %v11093_v44 }
 0x336   :  { %7837 = vmatmul.mubr.f32.gmra.mrb[50].mxu0 %v11138_v55  ;;  %4897 = vmatprep.mubr.f32.mxu1 %v9043_v52 }
 0x337   :  { %7839 = vmatprep.mubr.f32.mxu0 %v11132_v11 }
 0x339   :  { %4899 = vmatmul.mubr.f32.gmra.mrb[176].mxu1 %v11099_v22 }
 0x33a   :  { %7840 = vmatmul.mubr.f32.gmra.mrb[52].mxu0 %v11146_v43  ;;  %4904 = vmatprep.mubr.f32.mxu1 %v9043_v52 }
 0x33b   :  { %7842 = vmatprep.mubr.f32.mxu0 %v11156_v18 }
 0x33d   :  { %4906 = vmatmul.mubr.f32.gmra.mrb[178].mxu1 %v11124_v14 }
 0x33e   :  { %7843 = vmatmul.mubr.f32.gmra.mrb[54].mxu0 %v11163_v31  ;;  %4980 = vmatprep.mubr.f32.mxu1 %v9043_v52 }
 0x33f   :  { %7847 = vmatprep.mubr.f32.mxu0 %v11085_v5 }
 0x341   :  { %4983 = vmatmul.mubr.f32.vlgmr.msra.gmra.mrb[164].mxu1 %v11096_v26  ;;  %v8926_v26 = vld [vmem:[#allocation2] sm:$0xff] }
 0x342   :  { %5048 = vmatpush1.msra.mxu1 %v11032_v59  ;;  %7848 = vmatmul.mubr.f32.vlgmr.msra.gmra.mrb[48].mxu0 %v11080_v6 }
 0x343   :  { %7850 = vmatprep.mubr.f32.mxu0 %v11114_v57  ;;  %4988 = vmatprep.mubr.f32.mxu1 %v9043_v52 }
 0x344   :  { %7860 = vmatpush3.msra.mxu0 %v11035_v50  ;;  %5187 = vmatprep.subr.mxu1 %v4783_v1  ;;  %v8919_v1 = vld [vmem:[#allocation2 + $0x10] sm:$0xff] }
 0x345   :  { %4991 = vmatmul.mubr.f32.gmra.mrb[166].mxu1 %v11088_v47 }
 0x346   :  { %7851 = vmatmul.mubr.f32.gmra.mrb[50].mxu0 %v11109_v48  ;;  %4996 = vmatprep.mubr.f32.mxu1 %v9043_v52 }
 0x347   :  { %7853 = vmatprep.mubr.f32.mxu0 %v11076_v61 }
 0x349   :  { %4999 = vmatmul.mubr.f32.gmra.mrb[168].mxu1 %v11129_v12  ;;  %v8931_v12 = vld [vmem:[#allocation2 + $0x38] sm:$0xff] }
 0x34a   :  { %7854 = vmatmul.mubr.f32.gmra.mrb[52].mxu0 %v11093_v44  ;;  %5004 = vmatprep.mubr.f32.mxu1 %v9043_v52 }
 0x34b   :  { %7856 = vmatprep.mubr.f32.mxu0 %v11099_v22 }
 0x34d   :  { %5007 = vmatmul.mubr.f32.gmra.mrb[170].mxu1 %v11119_v45 }
 0x34e   :  { %7857 = vmatmul.mubr.f32.gmra.mrb[54].mxu0 %v11124_v14  ;;  %5012 = vmatprep.mubr.f32.mxu1 %v9043_v52 }
 0x34f   :  { %7861 = vmatprep.mubr.f32.mxu0 %v11085_v5 }
 0x351   :  { %5015 = vmatmul.mubr.f32.gmra.mrb[172].mxu1 %v11091_v21  ;;  %v8925_v21 = vld [vmem:[#allocation2 + $0xa0] sm:$0xff] }
 0x352   :  { %7862 = vmatmul.mubr.f32.vlgmr.msra.gmra.mrb[48].mxu0 %v11080_v6  ;;  %5020 = vmatprep.mubr.f32.mxu1 %v9043_v52 }
 0x353   :  { %7864 = vmatprep.mubr.f32.mxu0 %v11114_v57 }
 0x355   :  { %5023 = vmatmul.mubr.f32.gmra.mrb[174].mxu1 %v11122_v62  ;;  %v8930_v62 = vld [vmem:[#allocation2 + $0x30] sm:$0xff] }
 0x356   :  { %7865 = vmatmul.mubr.f32.gmra.mrb[50].mxu0 %v11109_v48  ;;  %5028 = vmatprep.mubr.f32.mxu1 %v9043_v52 }
 0x357   :  { %7867 = vmatprep.mubr.f32.mxu0 %v11076_v61 }
 0x359   :  { %5031 = vmatmul.mubr.f32.gmra.mrb[176].mxu1 %v11135_v32 }
 0x35a   :  { %7868 = vmatmul.mubr.f32.gmra.mrb[52].mxu0 %v11093_v44  ;;  %5036 = vmatprep.mubr.f32.mxu1 %v9043_v52 }
 0x35b   :  { %7870 = vmatprep.mubr.f32.mxu0 %v11099_v22 }
 0x35d   :  { %5039 = vmatmul.mubr.f32.gmra.mrb[178].mxu1 %v11149_v17 }
 0x35e   :  { %7871 = vmatmul.mubr.f32.gmra.mrb[54].mxu0 %v11124_v14  ;;  %5111 = vmatprep.mubr.f32.mxu1 %v9043_v52 }
 0x361   :  { %5115 = vmatmul.mubr.f32.vlgmr.msra.gmra.mrb[164].mxu1 %v11112_v53 }
 0x362   :  { %5191 = vmatpush1.msra.mxu1 %v4789_v36  ;;  %5120 = vmatprep.mubr.f32.mxu1 %v9043_v52 }
 0x363   :  { %5312 = vmatprep.subr.mxu1 %v11029_v33 }
 0x365   :  { %5124 = vmatmul.mubr.f32.gmra.mrb[166].mxu1 %v11106_v15 }
 0x366   :  { %5129 = vmatprep.mubr.f32.mxu1 %v9043_v52 }
 0x369   :  { %5133 = vmatmul.mubr.f32.gmra.mrb[168].mxu1 %v11141_v34  ;;  %v8933_v34 = vld [vmem:[#allocation2 + $0x50] sm:$0xff] }
 0x36a   :  { %5138 = vmatprep.mubr.f32.mxu1 %v9043_v52 }
 0x36d   :  { %5142 = vmatmul.mubr.f32.gmra.mrb[170].mxu1 %v11138_v55 }
 0x36e   :  { %5147 = vmatprep.mubr.f32.mxu1 %v9043_v52 }
 0x371   :  { %5151 = vmatmul.mubr.f32.gmra.mrb[172].mxu1 %v11132_v11 }
 0x372   :  { %5156 = vmatprep.mubr.f32.mxu1 %v9043_v52 }
 0x375   :  { %5160 = vmatmul.mubr.f32.gmra.mrb[174].mxu1 %v11146_v43  ;;  %v8934_v43 = vld [vmem:[#allocation2 + $0x60] sm:$0xff] }
 0x376   :  { %5165 = vmatprep.mubr.f32.mxu1 %v9043_v52 }
 0x379   :  { %5169 = vmatmul.mubr.f32.gmra.mrb[176].mxu1 %v11156_v18 }
 0x37a   :  { %5174 = vmatprep.mubr.f32.mxu1 %v9043_v52 }
 0x37d   :  { %5178 = vmatmul.mubr.f32.gmra.mrb[178].mxu1 %v11163_v31 }
 0x37e   :  { %5254 = vmatprep.mubr.f32.mxu1 %v9043_v52 }
 0x381   :  { %5256 = vmatmul.mubr.f32.vlgmr.msra.gmra.mrb[164].mxu1 %v11085_v5 }
 0x382   :  { %5314 = vmatpush1.msra.mxu1 %v11032_v59  ;;  %5261 = vmatprep.mubr.f32.mxu1 %v9043_v52  ;;  %v8918_v59 = vld [vmem:[#allocation2 + $0x28] sm:$0xff] }
 0x385   :  { %5263 = vmatmul.mubr.f32.gmra.mrb[166].mxu1 %v11080_v6 }
 0x386   :  { %5268 = vmatprep.mubr.f32.mxu1 %v9043_v52 }
 0x389   :  { %5270 = vmatmul.mubr.f32.gmra.mrb[168].mxu1 %v11114_v57 }
 0x38a   :  { %5275 = vmatprep.mubr.f32.mxu1 %v9043_v52 }
 0x38d   :  { %5277 = vmatmul.mubr.f32.gmra.mrb[170].mxu1 %v11109_v48 }
 0x38e   :  { %5282 = vmatprep.mubr.f32.mxu1 %v9043_v52 }
 0x391   :  { %5284 = vmatmul.mubr.f32.gmra.mrb[172].mxu1 %v11076_v61 }
 0x392   :  { %5289 = vmatprep.mubr.f32.mxu1 %v9043_v52 }
 0x395   :  { %5291 = vmatmul.mubr.f32.gmra.mrb[174].mxu1 %v11093_v44 }
 0x396   :  { %5296 = vmatprep.mubr.f32.mxu1 %v9043_v52 }
 0x399   :  { %5298 = vmatmul.mubr.f32.gmra.mrb[176].mxu1 %v11099_v22 }
 0x39a   :  { %5303 = vmatprep.mubr.f32.mxu1 %v9043_v52 }
 0x39d   :  { %5305 = vmatmul.mubr.f32.gmra.mrb[178].mxu1 %v11124_v14 }
 0x39e   :  { %5377 = vmatprep.mubr.f32.mxu1 %v9043_v52 }
 0x3a1   :  { %5379 = vmatmul.mubr.f32.vlgmr.msra.gmra.mrb[164].mxu1 %v11085_v5  ;;  %v8924_v5 = vld [vmem:[#allocation2 + $0xb8] sm:$0xff] }
 0x3a2   :  { %5384 = vmatprep.mubr.f32.mxu1 %v9043_v52 }
 0x3a5   :  { %5386 = vmatmul.mubr.f32.gmra.mrb[166].mxu1 %v11080_v6 }
 0x3a6   :  { %5391 = vmatprep.mubr.f32.mxu1 %v9043_v52 }
 0x3a9   :  { %5393 = vmatmul.mubr.f32.gmra.mrb[168].mxu1 %v11114_v57  ;;  %v8929_v57 = vld [vmem:[#allocation2 + $0x20] sm:$0xff] }
 0x3aa   :  { %5398 = vmatprep.mubr.f32.mxu1 %v9043_v52 }
 0x3ad   :  { %5400 = vmatmul.mubr.f32.gmra.mrb[170].mxu1 %v11109_v48 }
 0x3ae   :  { %5405 = vmatprep.mubr.f32.mxu1 %v9043_v52 }
 0x3b1   :  { %5407 = vmatmul.mubr.f32.gmra.mrb[172].mxu1 %v11076_v61 }
 0x3b2   :  { %5412 = vmatprep.mubr.f32.mxu1 %v9043_v52 }
 0x3b5   :  { %5414 = vmatmul.mubr.f32.gmra.mrb[174].mxu1 %v11093_v44 }
 0x3b6   :  { %5419 = vmatprep.mubr.f32.mxu1 %v9043_v52 }
 0x3b9   :  { %5421 = vmatmul.mubr.f32.gmra.mrb[176].mxu1 %v11099_v22 }
 0x3ba   :  { %5426 = vmatprep.mubr.f32.mxu1 %v9043_v52  ;;  %v8922_v52 = vld [vmem:[#allocation2 + $0x88] sm:$0xff] }
 0x3bd   :  { %5428 = vmatmul.mubr.f32.gmra.mrb[178].mxu1 %v11124_v14 }
 0x425   :  { %v7863_v33 = vpop.f32.mrb[48].mxu0 }
 0x426   :  { %v6186_v50 = vmul.f32 %v8918_v59, %v7863_v33  ;;  %v6135_v27 = vpop.f32.mrb[49].mxu0  ;;  %v8939_v33 = vld [vmem:[#allocation2 + $0x98] sm:$0xff] }
 0x427   :  { %v6183_v40 = vmul.f32 %v8919_v1, %v6135_v27  ;;  %v8940_v27 = vld [vmem:[#allocation2 + $0xa8] sm:$0xff] }
 0x428   :  { %6210 = vst [vmem:[#allocation8 + $0x28] sm:$0xff] %v6186_v50 }
 0x429   :  { %6207 = vst [vmem:[#allocation8 + $0x10] sm:$0xff] %v6183_v40  ;;  %v7866_v19 = vpop.f32.mrb[50].mxu0 }
 0x42a   :  { %v6192_v41 = vmul.f32 %v8920_v39, %v7866_v19  ;;  %v6147_v61 = vpop.f32.mrb[51].mxu0  ;;  %v8941_v19 = vld [vmem:[#allocation2 + $0xb0] sm:$0xff] }
 0x42b   :  { %v6189_v51 = vmul.f32 %v8921_v49, %v6147_v61 }
 0x42c   :  { %6216 = vst [vmem:[#allocation8 + $0x58] sm:$0xff] %v6192_v41 }
 0x42d   :  { %6213 = vst [vmem:[#allocation8 + $0x40] sm:$0xff] %v6189_v51  ;;  %v7869_v30 = vpop.f32.mrb[52].mxu0 }
 0x42e   :  { %v6198_v3 = vmul.f32 %v8922_v52, %v7869_v30  ;;  %v6159_v6 = vpop.f32.mrb[53].mxu0 }
 0x42f   :  { %v6195_v36 = vmul.f32 %v8923_v25, %v6159_v6 }
 0x430   :  { %6222 = vst [vmem:[#allocation8 + $0x88] sm:$0xff] %v6198_v3 }
 0x431   :  { %6219 = vst [vmem:[#allocation8 + $0x70] sm:$0xff] %v6195_v36  ;;  %v7872_v7 = vpop.f32.mrb[54].mxu0 }
 0x432   :  { %v6204_v23 = vmul.f32 %v8924_v5, %v7872_v7  ;;  %v6171_v47 = vpop.f32.mrb[55].mxu0 }
 0x433   :  { %v6201_v44 = vmul.f32 %v8925_v21, %v6171_v47 }
 0x434   :  { %6228 = vst [vmem:[#allocation8 + $0xb8] sm:$0xff] %v6204_v23 }
 0x435   :  { %6225 = vst [vmem:[#allocation8 + $0xa0] sm:$0xff] %v6201_v44 }
 0x474   :  { %v5380_v8 = vpop.f32.mrb[164].mxu1 }
 0x475   :  { %v6181_v54 = vmul.f32 %v8926_v26, %v5380_v8  ;;  %v5382_v22 = vpop.f32.mrb[165].mxu1 }
 0x476   :  { %v6182_v37 = vmul.f32 %v8927_v56, %v5382_v22 }
 0x477   :  { %6205 = vst [vmem:[#allocation8] sm:$0xff] %v6181_v54 }
 0x478   :  { %6206 = vst [vmem:[#allocation8 + $0x8] sm:$0xff] %v6182_v37  ;;  %v5387_v15 = vpop.f32.mrb[166].mxu1 }
 0x479   :  { %v6184_v48 = vmul.f32 %v8928_v13, %v5387_v15  ;;  %v5389_v53 = vpop.f32.mrb[167].mxu1 }
 0x47a   :  { %v6185_v9 = vmul.f32 %v8929_v57, %v5389_v53 }
 0x47b   :  { %6208 = vst [vmem:[#allocation8 + $0x18] sm:$0xff] %v6184_v48 }
 0x47c   :  { %6209 = vst [vmem:[#allocation8 + $0x20] sm:$0xff] %v6185_v9  ;;  %v5394_v45 = vpop.f32.mrb[168].mxu1 }
 0x47d   :  { %v6187_v14 = vmul.f32 %v8930_v62, %v5394_v45  ;;  %v5396_v60 = vpop.f32.mrb[169].mxu1 }
 0x47e   :  { %v6188_v11 = vmul.f32 %v8931_v12, %v5396_v60 }
 0x47f   :  { %6211 = vst [vmem:[#allocation8 + $0x30] sm:$0xff] %v6187_v14 }
 0x480   :  { %6212 = vst [vmem:[#allocation8 + $0x38] sm:$0xff] %v6188_v11  ;;  %v5401_v32 = vpop.f32.mrb[170].mxu1 }
 0x481   :  { %v6190_v55 = vmul.f32 %v8932_v63, %v5401_v32  ;;  %v5403_v29 = vpop.f32.mrb[171].mxu1 }
 0x482   :  { %v6191_v58 = vmul.f32 %v8933_v34, %v5403_v29 }
 0x483   :  { %6214 = vst [vmem:[#allocation8 + $0x48] sm:$0xff] %v6190_v55 }
 0x484   :  { %6215 = vst [vmem:[#allocation8 + $0x50] sm:$0xff] %v6191_v58  ;;  %v5408_v42 = vpop.f32.mrb[172].mxu1 }
 0x485   :  { %v6193_v17 = vmul.f32 %v8934_v43, %v5408_v42  ;;  %v5410_v38 = vpop.f32.mrb[173].mxu1 }
 0x486   :  { %v6194_v18 = vmul.f32 %v8935_v24, %v5410_v38 }
 0x487   :  { %6217 = vst [vmem:[#allocation8 + $0x60] sm:$0xff] %v6193_v17 }
 0x488   :  { %6218 = vst [vmem:[#allocation8 + $0x68] sm:$0xff] %v6194_v18  ;;  %v5415_v4 = vpop.f32.mrb[174].mxu1 }
 0x489   :  { %v6196_v16 = vmul.f32 %v8936_v35, %v5415_v4  ;;  %v5417_v31 = vpop.f32.mrb[175].mxu1 }
 0x48a   :  { %v6197_v46 = vmul.f32 %v8937_v20, %v5417_v31 }
 0x48b   :  { %6220 = vst [vmem:[#allocation8 + $0x78] sm:$0xff] %v6196_v16 }
 0x48c   :  { %6221 = vst [vmem:[#allocation8 + $0x80] sm:$0xff] %v6197_v46  ;;  %v5422_v2 = vpop.f32.mrb[176].mxu1 }
 0x48d   :  { %v6199_v0 = vmul.f32 %v8938_v28, %v5422_v2  ;;  %v5424_v10 = vpop.f32.mrb[177].mxu1 }
 0x48e   :  { %v6200_v59 = vmul.f32 %v8939_v33, %v5424_v10 }
 0x48f   :  { %6223 = vst [vmem:[#allocation8 + $0x90] sm:$0xff] %v6199_v0 }
 0x490   :  { %6224 = vst [vmem:[#allocation8 + $0x98] sm:$0xff] %v6200_v59  ;;  %v5429_v50 = vpop.f32.mrb[178].mxu1 }
 0x491   :  { %v6202_v1 = vmul.f32 %v8940_v27, %v5429_v50  ;;  %v5431_v40 = vpop.f32.mrb[179].mxu1 }
 0x492   :  { %v6203_v39 = vmul.f32 %v8941_v19, %v5431_v40 }
 0x493   :  { %6226 = vst [vmem:[#allocation8 + $0xa8] sm:$0xff] %v6202_v1 }
 0x494   :  { %6227 = vst [vmem:[#allocation8 + $0xb0] sm:$0xff] %v6203_v39 }
 0x495   :  { %9019 = shalt.err (!%p9016_p0)
}
 0x496   :  { %s9020_s27 = scalar_lea.hbm %s11331_s3, 3072 }
 0x497   :  { %p9021_p1 = scmp.ne.s32.totalorder %s11331_s3, %s9020_s27  ;;  %p9024_p2 = scmp.lt.u32.totalorder %s9020_s27, %s11331_s3 }
 0x499   :  { %p9026_p3 = pnand %p9024_p2, %p9021_p1 }
 0x49b   :  { %9029 = shalt.err (!%p9026_p3)
}
 0x49c   :  { %6240 = dma.vmem_to_hbm [thread:$0]  %s6235_s23, 3072, %s11331_s3, [#allocation4], %s9040_s1, %s9040_s1, %s9041_s9  }
 0x49d   :  { %9034 = dma.done.wait [#allocation4], 3072  }
 0x49e   :  { %9035 = vsyncadd [#allocation4], 4294964224 }
 0x49f   :  { %6244 = vsyncpa [#allocation3], 1 }
 0x4a0   :  { %6245 = vsyncpa [#allocation6], 1 }
 0x4a1   :  { %6246 = vsyncpa [#allocation4], 1 }

</bundles_post_ra>
